<compile_context>
chip_gen: v5e
topology: v5e:2x2
jax: 0.10.0
libtpu: 0.0.40
codegen_flags: <defaults>
</compile_context>

<pallas_src>
import functools

import jax
import jax.numpy as jnp
from jax import lax
from jax.experimental import pallas as pl
from jax.experimental.pallas import tpu as pltpu
import numpy as np

_SUBLANE = 8  # f32 sublane tile height

_LAYER_KEYS = ('w_ih_f', 'w_ih_b', 'w_hh_f', 'w_hh_b',
               'b_gi_f', 'b_gi_b', 'b_hn_f', 'b_hn_b')


def _num_act_bufs(n_layers):
    # Ping-pong activation buffers needed to chain layers inside the kernel.
    return max(1, min(2, n_layers - 1))


# ----------------------------------------------------------------------------
# The fused kernel
# ----------------------------------------------------------------------------
def _hai_fused_kernel(*refs, T, Bp, H, n_layers, mxu_dtype):
    """Whole HAIModel forward in one kernel.

    refs = [ x (T*Bp, F),
             per layer: w_ih_f, w_ih_b, w_hh_f, w_hh_b,
                        b_gi_f, b_gi_b, b_hn_f, b_hn_b,
             w_fc (2H, n_tags), b_fc (1, n_tags),          # inputs
             out (Bp, n_tags),                             # output
             gi_f, gi_b (T*Bp, 3H), act_f[...], act_b[...] # VMEM scratch ]
    """
    H3 = 3 * H
    n_act = _num_act_bufs(n_layers)
    unroll = min(T, 8)  # bounded unroll: LLO visibility without vreg spill

    it = iter(refs)
    x_ref = next(it)
    layers = [tuple(next(it) for _ in range(8)) for _ in range(n_layers)]
    w_fc_ref = next(it)
    b_fc_ref = next(it)
    out_ref = next(it)
    gi_f_ref = next(it)
    gi_b_ref = next(it)
    act_f = [next(it) for _ in range(n_act)]
    act_b = [next(it) for _ in range(n_act)]

    def gate(gi, gh_rz, gh_n, h_prev):
        # PyTorch GRU gate math; r/z hidden biases are already folded into gi.
        r = jax.nn.sigmoid(gi[:, 0:H] + gh_rz[:, 0:H])
        z = jax.nn.sigmoid(gi[:, H:2 * H] + gh_rz[:, H:2 * H])
        n = jnp.tanh(gi[:, 2 * H:H3] + r * gh_n)
        return (1.0 - z) * n + z * h_prev

    for l in range(n_layers):
        (w_ih_f, w_ih_b, w_hh_f, w_hh_b,
         b_gi_f, b_gi_b, b_hn_f, b_hn_b) = layers[l]
        is_last = l == n_layers - 1

        # ---- hoisted input projection: one big GEMM per direction ----------
        if l == 0:
            xin = x_ref[...].astype(mxu_dtype)                      # (T*Bp, F)
            gi_f_ref[...] = jnp.dot(
                xin, w_ih_f[...], preferred_element_type=jnp.float32) + b_gi_f[...]
            if not is_last:
                gi_b_ref[...] = jnp.dot(
                    xin, w_ih_b[...], preferred_element_type=jnp.float32) + b_gi_b[...]
            else:
                # Only x[T-1] feeds the single backward step of the last layer.
                x_last = x_ref[(T - 1) * Bp:T * Bp, :].astype(mxu_dtype)
                gi_b_last = jnp.dot(
                    x_last, w_ih_b[...], preferred_element_type=jnp.float32) + b_gi_b[...]
        else:
            src = (l - 1) % n_act
            pf = act_f[src][...].astype(mxu_dtype)                  # (T*Bp, H)
            pb = act_b[src][...].astype(mxu_dtype)                  # (T*Bp, H)
            # w_ih split into fwd-input / bwd-input halves: no concat needed.
            gi_f_ref[...] = (
                jnp.dot(pf, w_ih_f[0:H, :], preferred_element_type=jnp.float32)
                + jnp.dot(pb, w_ih_f[H:2 * H, :], preferred_element_type=jnp.float32)
                + b_gi_f[...])
            if not is_last:
                gi_b_ref[...] = (
                    jnp.dot(pf, w_ih_b[0:H, :], preferred_element_type=jnp.float32)
                    + jnp.dot(pb, w_ih_b[H:2 * H, :], preferred_element_type=jnp.float32)
                    + b_gi_b[...])
            else:
                row = (T - 1) * Bp
                pf_last = act_f[src][row:row + Bp, :].astype(mxu_dtype)
                pb_last = act_b[src][row:row + Bp, :].astype(mxu_dtype)
                gi_b_last = (
                    jnp.dot(pf_last, w_ih_b[0:H, :], preferred_element_type=jnp.float32)
                    + jnp.dot(pb_last, w_ih_b[H:2 * H, :], preferred_element_type=jnp.float32)
                    + b_gi_b[...])

        # Hoisted out of the recurrence (JAX does not CSE broadcast_in_dim).
        b_hn_f_bc = jnp.broadcast_to(b_hn_f[...], (Bp, H))
        w_hh_f_v = w_hh_f[...]                                      # (H, 3H)

        if not is_last:
            b_hn_b_bc = jnp.broadcast_to(b_hn_b[...], (Bp, H))
            w_hh_b_v = w_hh_b[...]
            dst = l % n_act
            out_f_ref = act_f[dst]
            out_b_ref = act_b[dst]

            def step(t, carry):
                h_f, h_b = carry
                fwd_row = pl.multiple_of(t * Bp, Bp)
                bwd_row = pl.multiple_of((T - 1 - t) * Bp, Bp)
                gi_f_t = gi_f_ref[pl.ds(fwd_row, Bp), :]
                gi_b_t = gi_b_ref[pl.ds(bwd_row, Bp), :]
                # Two small independent MXU matmuls (no zero-padded block-diag).
                gh_f = jnp.dot(h_f.astype(mxu_dtype), w_hh_f_v,
                               preferred_element_type=jnp.float32)
                gh_b = jnp.dot(h_b.astype(mxu_dtype), w_hh_b_v,
                               preferred_element_type=jnp.float32)
                h_f = gate(gi_f_t, gh_f, gh_f[:, 2 * H:H3] + b_hn_f_bc, h_f)
                h_b = gate(gi_b_t, gh_b, gh_b[:, 2 * H:H3] + b_hn_b_bc, h_b)
                out_f_ref[pl.ds(fwd_row, Bp), :] = h_f
                out_b_ref[pl.ds(bwd_row, Bp), :] = h_b
                return (h_f, h_b)

            h0 = jnp.zeros((Bp, H), jnp.float32)
            lax.fori_loop(0, T, step, (h0, h0), unroll=unroll)
        else:
            def step(t, h_f):
                row = pl.multiple_of(t * Bp, Bp)
                gi_f_t = gi_f_ref[pl.ds(row, Bp), :]
                gh_f = jnp.dot(h_f.astype(mxu_dtype), w_hh_f_v,
                               preferred_element_type=jnp.float32)
                return gate(gi_f_t, gh_f, gh_f[:, 2 * H:H3] + b_hn_f_bc, h_f)

            h_f_last = lax.fori_loop(0, T, step,
                                     jnp.zeros((Bp, H), jnp.float32),
                                     unroll=unroll)

            # Single backward step from h_b0 = 0 on the last timestep
            # (gh_b = 0 @ W_hh_b = 0; only the n-gate hidden bias remains).
            r_b = jax.nn.sigmoid(gi_b_last[:, 0:H])
            z_b = jax.nn.sigmoid(gi_b_last[:, H:2 * H])
            n_b = jnp.tanh(gi_b_last[:, 2 * H:H3]
                           + r_b * jnp.broadcast_to(b_hn_b[...], (Bp, H)))
            h_b_last = (1.0 - z_b) * n_b

            # Fused fc + residual epilogue (w_fc split -> no h_f|h_b concat).
            out_ref[...] = (
                x_ref[0:Bp, :]
                + jnp.dot(h_f_last.astype(mxu_dtype), w_fc_ref[0:H, :],
                          preferred_element_type=jnp.float32)
                + jnp.dot(h_b_last.astype(mxu_dtype), w_fc_ref[H:2 * H, :],
                          preferred_element_type=jnp.float32)
                + b_fc_ref[...])


# ----------------------------------------------------------------------------
# pallas_call wrapper
# ----------------------------------------------------------------------------
_VMEM_SPEC = pl.BlockSpec(memory_space=pltpu.MemorySpace.VMEM)


def hai_forward(x_bt, params):
    """x_bt: (B, T, n_tags), batch-first, like the PyTorch module's input."""
    B, T, F = x_bt.shape
    H = params['n_hid']
    n_layers = params['n_layers']
    n_tags = params['n_tags']
    mxu_dtype = params['mxu_dtype']
    assert F == n_tags

    # Pad batch to the f32 sublane width so every per-step row block inside
    # the kernel is (8,128)-tile aligned; padded rows are sliced off at the end.
    Bp = ((B + _SUBLANE - 1) // _SUBLANE) * _SUBLANE
    x = x_bt.astype(jnp.float32)
    if Bp != B:
        x = jnp.pad(x, ((0, Bp - B), (0, 0), (0, 0)))
    x_flat = jnp.transpose(x, (1, 0, 2)).reshape(T * Bp, F)  # flat time-major

    args = [x_flat]
    for layer in params['layers']:
        args += [layer[k] for k in _LAYER_KEYS]
    args += [params['w_fc'], params['b_fc']]

    n_act = _num_act_bufs(n_layers)
    scratch = [pltpu.VMEM((T * Bp, 3 * H), jnp.float32),   # gi_f
               pltpu.VMEM((T * Bp, 3 * H), jnp.float32)]   # gi_b
    scratch += [pltpu.VMEM((T * Bp, H), jnp.float32) for _ in range(2 * n_act)]

    # Explicit scoped-VMEM budget (v5e's default is only ~16 MiB).
    arg_bytes = sum(int(np.prod(a.shape)) * a.dtype.itemsize for a in args)
    scr_bytes = (2 * T * Bp * 3 * H + 2 * n_act * T * Bp * H + Bp * n_tags) * 4
    vmem_limit = int(min(max(2 * (arg_bytes + scr_bytes) + (2 << 20), 32 << 20),
                         64 << 20))

    kernel = functools.partial(_hai_fused_kernel, T=T, Bp=Bp, H=H,
                               n_layers=n_layers, mxu_dtype=mxu_dtype)
    out = pl.pallas_call(
        kernel,
        out_shape=jax.ShapeDtypeStruct((Bp, n_tags), jnp.float32),
        in_specs=[_VMEM_SPEC] * len(args),
        out_specs=_VMEM_SPEC,
        scratch_shapes=scratch,
        compiler_params=pltpu.CompilerParams(vmem_limit_bytes=vmem_limit),
    )(*args)
    return out[:B]


# ----------------------------------------------------------------------------
# Parameters: raw PyTorch-shaped weights + packed per-direction kernel layout
# ----------------------------------------------------------------------------
def init_raw_params(key, n_tags, n_hid, n_layers):
    H = n_hid

    def uni(k, shape, scale):
        return jax.random.uniform(k, shape, jnp.float32, -scale, scale)

    raw_layers = []
    for layer in range(n_layers):
        in_size = n_tags if layer == 0 else 2 * H
        s = 1.0 / np.sqrt(H)
        raw = {}
        for d in ("fwd", "bwd"):
            key, k1, k2, k3, k4 = jax.random.split(key, 5)
            raw[d] = dict(
                w_ih=uni(k1, (3 * H, in_size), s),   # rows [r; z; n], torch layout
                w_hh=uni(k2, (3 * H, H), s),
                b_ih=uni(k3, (3 * H,), s),
                b_hh=uni(k4, (3 * H,), s),
            )
        raw_layers.append(raw)

    key, kf1, kf2 = jax.random.split(key, 3)
    sf = 1.0 / np.sqrt(2 * H)
    w_fc = uni(kf1, (n_tags, 2 * H), sf)             # torch Linear weight shape
    b_fc = uni(kf2, (n_tags,), sf)
    return dict(layers=raw_layers, w_fc=w_fc, b_fc=b_fc)


def pack_params(raw, n_tags, n_hid, n_layers, mxu_dtype=jnp.float32):
    H = n_hid

    def pack_dir(r):
        w_ih = r["w_ih"].T.astype(mxu_dtype)         # (in, 3H), cols [r|z|n]
        w_hh = r["w_hh"].T.astype(mxu_dtype)         # (H, 3H)
        b_gi = jnp.concatenate([                     # fold b_hh into b_ih for r, z
            r["b_ih"][0:H] + r["b_hh"][0:H],
            r["b_ih"][H:2 * H] + r["b_hh"][H:2 * H],
            r["b_ih"][2 * H:3 * H],
        ]).reshape(1, 3 * H)
        b_hn = r["b_hh"][2 * H:3 * H].reshape(1, H)  # only n-gate hidden bias
        return w_ih, w_hh, b_gi, b_hn

    packed_layers = []
    for raw_layer in raw["layers"]:
        wf = pack_dir(raw_layer["fwd"])
        wb = pack_dir(raw_layer["bwd"])
        packed_layers.append(dict(
            w_ih_f=wf[0], w_ih_b=wb[0], w_hh_f=wf[1], w_hh_b=wb[1],
            b_gi_f=wf[2], b_gi_b=wb[2], b_hn_f=wf[3], b_hn_b=wb[3]))

    return dict(layers=packed_layers,
                w_fc=raw["w_fc"].T.astype(mxu_dtype),
                b_fc=raw["b_fc"].reshape(1, n_tags).astype(jnp.float32),
                n_tags=n_tags, n_hid=H, n_layers=n_layers,
                mxu_dtype=mxu_dtype)


# ----------------------------------------------------------------------------
# Pure-JAX reference (raw, unpacked PyTorch-shaped weights)
# ----------------------------------------------------------------------------
def _ref_gru_dir(xs, w_ih, w_hh, b_ih, b_hh):
    H = w_hh.shape[1]

    def step(h, x_t):
        gi = x_t @ w_ih.T + b_ih
        gh = h @ w_hh.T + b_hh
        r = jax.nn.sigmoid(gi[:, :H] + gh[:, :H])
        z = jax.nn.sigmoid(gi[:, H:2 * H] + gh[:, H:2 * H])
        n = jnp.tanh(gi[:, 2 * H:] + r * gh[:, 2 * H:])
        h_new = (1.0 - z) * n + z * h
        return h_new, h_new

    h0 = jnp.zeros((xs.shape[1], H), jnp.float32)
    _, outs = lax.scan(step, h0, xs)
    return outs


def ref_forward(x_bt, raw):
    x = jnp.transpose(x_bt, (1, 0, 2)).astype(jnp.float32)
    inp = x
    for layer in raw["layers"]:
        f, b = layer["fwd"], layer["bwd"]
        out_f = _ref_gru_dir(inp, f["w_ih"], f["w_hh"], f["b_ih"], f["b_hh"])
        out_b = jnp.flip(
            _ref_gru_dir(jnp.flip(inp, 0), b["w_ih"], b["w_hh"],
                         b["b_ih"], b["b_hh"]), 0)
        inp = jnp.concatenate([out_f, out_b], axis=-1)
    return x[0] + inp[-1] @ raw["w_fc"].T + raw["b_fc"]


# ----------------------------------------------------------------------------
if __name__ == "__main__":
    B, T = 4, 8
    n_tags, n_hid, n_layers = 16, 32, 2

    key = jax.random.PRNGKey(0)
    key, kx, kp = jax.random.split(key, 3)
    x = jax.random.normal(kx, (B, T, n_tags), jnp.float32)

    raw = init_raw_params(kp, n_tags, n_hid, n_layers)
    ref = jax.block_until_ready(ref_forward(x, raw))

    # f32 MXU path: tight check against the pure-JAX reference.
    packed_f32 = pack_params(raw, n_tags, n_hid, n_layers, mxu_dtype=jnp.float32)
    fwd_f32 = jax.jit(functools.partial(hai_forward, params=packed_f32))
    out_f32 = jax.block_until_ready(fwd_f32(x))
    assert out_f32.shape == (B, n_tags)
    np.testing.assert_allclose(np.asarray(out_f32), np.asarray(ref),
                               rtol=2e-3, atol=2e-3)

    # bf16 MXU-operand path (f32 accumulation, f32 gate math): loose check.
    packed_bf16 = pack_params(raw, n_tags, n_hid, n_layers, mxu_dtype=jnp.bfloat16)
    fwd_bf16 = jax.jit(functools.partial(hai_forward, params=packed_bf16))
    out_bf16 = jax.block_until_ready(fwd_bf16(x))
    max_err = float(jnp.max(jnp.abs(out_bf16.astype(jnp.float32) - ref)))
    assert np.isfinite(max_err) and max_err < 0.25, f"bf16 max abs err {max_err}"

    print("KERNEL_OK")
</pallas_src>

<mosaic_0001>
module attributes {stable_mosaic.version = 11 : i64} {
  func.func @_hai_fused_kernel(%arg0: memref<64x16xf32, #tpu.memory_space<vmem>>, %arg1: memref<16x96xf32, #tpu.memory_space<vmem>>, %arg2: memref<16x96xf32, #tpu.memory_space<vmem>>, %arg3: memref<32x96xf32, #tpu.memory_space<vmem>>, %arg4: memref<32x96xf32, #tpu.memory_space<vmem>>, %arg5: memref<1x96xf32, #tpu.memory_space<vmem>>, %arg6: memref<1x96xf32, #tpu.memory_space<vmem>>, %arg7: memref<1x32xf32, #tpu.memory_space<vmem>>, %arg8: memref<1x32xf32, #tpu.memory_space<vmem>>, %arg9: memref<64x96xf32, #tpu.memory_space<vmem>>, %arg10: memref<64x96xf32, #tpu.memory_space<vmem>>, %arg11: memref<32x96xf32, #tpu.memory_space<vmem>>, %arg12: memref<32x96xf32, #tpu.memory_space<vmem>>, %arg13: memref<1x96xf32, #tpu.memory_space<vmem>>, %arg14: memref<1x96xf32, #tpu.memory_space<vmem>>, %arg15: memref<1x32xf32, #tpu.memory_space<vmem>>, %arg16: memref<1x32xf32, #tpu.memory_space<vmem>>, %arg17: memref<64x16xf32, #tpu.memory_space<vmem>>, %arg18: memref<1x16xf32, #tpu.memory_space<vmem>>, %arg19: memref<8x16xf32, #tpu.memory_space<vmem>>, %arg20: memref<64x96xf32, #tpu.memory_space<vmem>>, %arg21: memref<64x96xf32, #tpu.memory_space<vmem>>, %arg22: memref<64x32xf32, #tpu.memory_space<vmem>>, %arg23: memref<64x32xf32, #tpu.memory_space<vmem>>) attributes {dimension_semantics = [], scalar_prefetch = 0 : i64, scratch_operands = 4 : i64, tpu.core_type = #tpu.core_type<tc>} {
    %c0 = arith.constant 0 : index
    %c0_0 = arith.constant 0 : index
    %0 = vector.load %arg0[%c0, %c0_0] : memref<64x16xf32, #tpu.memory_space<vmem>>, vector<64x16xf32>
    %c0_1 = arith.constant 0 : index
    %c0_2 = arith.constant 0 : index
    %1 = vector.load %arg1[%c0_1, %c0_2] : memref<16x96xf32, #tpu.memory_space<vmem>>, vector<16x96xf32>
    %cst = arith.constant dense<0.000000e+00> : vector<64x96xf32>
    %2 = tpu.matmul %0, %1, %cst {dimension_numbers = #tpu.dot_dimension_numbers<[1], [0], [0], [1], [0, 0, 1, 1], [], []>} : vector<64x16xf32>, vector<16x96xf32>, vector<64x96xf32> -> vector<64x96xf32>
    %c0_3 = arith.constant 0 : index
    %c0_4 = arith.constant 0 : index
    %3 = vector.load %arg5[%c0_3, %c0_4] : memref<1x96xf32, #tpu.memory_space<vmem>>, vector<1x96xf32>
    %4 = vector.broadcast %3 : vector<1x96xf32> to vector<64x96xf32>
    %5 = arith.addf %2, %4 : vector<64x96xf32>
    %c0_5 = arith.constant 0 : index
    %c0_6 = arith.constant 0 : index
    %6 = vector.load %arg20[%c0_5, %c0_6] : memref<64x96xf32, #tpu.memory_space<vmem>>, vector<64x96xf32>
    tpu.vector_store %arg20[%c0_5, %c0_6], %5 {strides = array<i32>} : memref<64x96xf32, #tpu.memory_space<vmem>>, vector<64x96xf32>,
    %c0_7 = arith.constant 0 : index
    %c0_8 = arith.constant 0 : index
    %7 = vector.load %arg2[%c0_7, %c0_8] : memref<16x96xf32, #tpu.memory_space<vmem>>, vector<16x96xf32>
    %cst_9 = arith.constant dense<0.000000e+00> : vector<64x96xf32>
    %8 = tpu.matmul %0, %7, %cst_9 {dimension_numbers = #tpu.dot_dimension_numbers<[1], [0], [0], [1], [0, 0, 1, 1], [], []>} : vector<64x16xf32>, vector<16x96xf32>, vector<64x96xf32> -> vector<64x96xf32>
    %c0_10 = arith.constant 0 : index
    %c0_11 = arith.constant 0 : index
    %9 = vector.load %arg6[%c0_10, %c0_11] : memref<1x96xf32, #tpu.memory_space<vmem>>, vector<1x96xf32>
    %10 = vector.broadcast %9 : vector<1x96xf32> to vector<64x96xf32>
    %11 = arith.addf %8, %10 : vector<64x96xf32>
    %c0_12 = arith.constant 0 : index
    %c0_13 = arith.constant 0 : index
    %12 = vector.load %arg21[%c0_12, %c0_13] : memref<64x96xf32, #tpu.memory_space<vmem>>, vector<64x96xf32>
    tpu.vector_store %arg21[%c0_12, %c0_13], %11 {strides = array<i32>} : memref<64x96xf32, #tpu.memory_space<vmem>>, vector<64x96xf32>,
    %c0_14 = arith.constant 0 : index
    %c0_15 = arith.constant 0 : index
    %13 = vector.load %arg7[%c0_14, %c0_15] : memref<1x32xf32, #tpu.memory_space<vmem>>, vector<1x32xf32>
    %14 = vector.shape_cast %13 : vector<1x32xf32> to vector<1x32xf32>
    %15 = vector.broadcast %14 : vector<1x32xf32> to vector<8x32xf32>
    %c0_16 = arith.constant 0 : index
    %c0_17 = arith.constant 0 : index
    %16 = vector.load %arg3[%c0_16, %c0_17] : memref<32x96xf32, #tpu.memory_space<vmem>>, vector<32x96xf32>
    %c0_18 = arith.constant 0 : index
    %c0_19 = arith.constant 0 : index
    %17 = vector.load %arg8[%c0_18, %c0_19] : memref<1x32xf32, #tpu.memory_space<vmem>>, vector<1x32xf32>
    %18 = vector.shape_cast %17 : vector<1x32xf32> to vector<1x32xf32>
    %19 = vector.broadcast %18 : vector<1x32xf32> to vector<8x32xf32>
    %c0_20 = arith.constant 0 : index
    %c0_21 = arith.constant 0 : index
    %20 = vector.load %arg4[%c0_20, %c0_21] : memref<32x96xf32, #tpu.memory_space<vmem>>, vector<32x96xf32>
    %cst_22 = arith.constant 0.000000e+00 : f32
    %21 = vector.broadcast %cst_22 : f32 to vector<8x32xf32>
    %c0_i32 = arith.constant 0 : i32
    %c8_i32 = arith.constant 8 : i32
    %22 = arith.muli %c0_i32, %c8_i32 : i32
    %23 = tpu.assume_multiple %22, 8 : i32
    %c7_i32 = arith.constant 7 : i32
    %24 = arith.subi %c7_i32, %c0_i32 : i32
    %c8_i32_23 = arith.constant 8 : i32
    %25 = arith.muli %24, %c8_i32_23 : i32
    %26 = tpu.assume_multiple %25, 8 : i32
    %27 = arith.index_cast %23 : i32 to index
    %c0_24 = arith.constant 0 : index
    %28 = vector.load %arg20[%27, %c0_24] : memref<64x96xf32, #tpu.memory_space<vmem>>, vector<8x96xf32>
    %29 = arith.index_cast %26 : i32 to index
    %c0_25 = arith.constant 0 : index
    %30 = vector.load %arg21[%29, %c0_25] : memref<64x96xf32, #tpu.memory_space<vmem>>, vector<8x96xf32>
    %cst_26 = arith.constant dense<0.000000e+00> : vector<8x96xf32>
    %31 = tpu.matmul %21, %16, %cst_26 {dimension_numbers = #tpu.dot_dimension_numbers<[1], [0], [0], [1], [0, 0, 1, 1], [], []>} : vector<8x32xf32>, vector<32x96xf32>, vector<8x96xf32> -> vector<8x96xf32>
    %cst_27 = arith.constant dense<0.000000e+00> : vector<8x96xf32>
    %32 = tpu.matmul %21, %20, %cst_27 {dimension_numbers = #tpu.dot_dimension_numbers<[1], [0], [0], [1], [0, 0, 1, 1], [], []>} : vector<8x32xf32>, vector<32x96xf32>, vector<8x96xf32> -> vector<8x96xf32>
    %33 = vector.extract_strided_slice %31 {offsets = [0, 64], sizes = [8, 32], strides = [1, 1]} : vector<8x96xf32> to vector<8x32xf32>
    %34 = arith.addf %33, %15 : vector<8x32xf32>
    %35 = vector.extract_strided_slice %28 {offsets = [0, 0], sizes = [8, 32], strides = [1, 1]} : vector<8x96xf32> to vector<8x32xf32>
    %36 = vector.extract_strided_slice %31 {offsets = [0, 0], sizes = [8, 32], strides = [1, 1]} : vector<8x96xf32> to vector<8x32xf32>
    %37 = arith.addf %35, %36 : vector<8x32xf32>
    %38 = arith.negf %37 : vector<8x32xf32>
    %39 = math.exp %38 : vector<8x32xf32>
    %cst_28 = arith.constant 1.000000e+00 : f32
    %40 = vector.broadcast %cst_28 : f32 to vector<8x32xf32>
    %41 = arith.addf %40, %39 : vector<8x32xf32>
    %42 = arith.divf %40, %41 : vector<8x32xf32>
    %43 = vector.extract_strided_slice %28 {offsets = [0, 32], sizes = [8, 32], strides = [1, 1]} : vector<8x96xf32> to vector<8x32xf32>
    %44 = vector.extract_strided_slice %31 {offsets = [0, 32], sizes = [8, 32], strides = [1, 1]} : vector<8x96xf32> to vector<8x32xf32>
    %45 = arith.addf %43, %44 : vector<8x32xf32>
    %46 = arith.negf %45 : vector<8x32xf32>
    %47 = math.exp %46 : vector<8x32xf32>
    %cst_29 = arith.constant 1.000000e+00 : f32
    %48 = vector.broadcast %cst_29 : f32 to vector<8x32xf32>
    %49 = arith.addf %48, %47 : vector<8x32xf32>
    %50 = arith.divf %48, %49 : vector<8x32xf32>
    %51 = vector.extract_strided_slice %28 {offsets = [0, 64], sizes = [8, 32], strides = [1, 1]} : vector<8x96xf32> to vector<8x32xf32>
    %52 = arith.mulf %42, %34 : vector<8x32xf32>
    %53 = arith.addf %51, %52 : vector<8x32xf32>
    %54 = math.tanh %53 : vector<8x32xf32>
    %cst_30 = arith.constant 1.000000e+00 : f32
    %55 = vector.broadcast %cst_30 : f32 to vector<8x32xf32>
    %56 = arith.subf %55, %50 : vector<8x32xf32>
    %57 = arith.mulf %56, %54 : vector<8x32xf32>
    %58 = arith.mulf %50, %21 : vector<8x32xf32>
    %59 = arith.addf %57, %58 : vector<8x32xf32>
    %60 = vector.extract_strided_slice %32 {offsets = [0, 64], sizes = [8, 32], strides = [1, 1]} : vector<8x96xf32> to vector<8x32xf32>
    %61 = arith.addf %60, %19 : vector<8x32xf32>
    %62 = vector.extract_strided_slice %30 {offsets = [0, 0], sizes = [8, 32], strides = [1, 1]} : vector<8x96xf32> to vector<8x32xf32>
    %63 = vector.extract_strided_slice %32 {offsets = [0, 0], sizes = [8, 32], strides = [1, 1]} : vector<8x96xf32> to vector<8x32xf32>
    %64 = arith.addf %62, %63 : vector<8x32xf32>
    %65 = arith.negf %64 : vector<8x32xf32>
    %66 = math.exp %65 : vector<8x32xf32>
    %cst_31 = arith.constant 1.000000e+00 : f32
    %67 = vector.broadcast %cst_31 : f32 to vector<8x32xf32>
    %68 = arith.addf %67, %66 : vector<8x32xf32>
    %69 = arith.divf %67, %68 : vector<8x32xf32>
    %70 = vector.extract_strided_slice %30 {offsets = [0, 32], sizes = [8, 32], strides = [1, 1]} : vector<8x96xf32> to vector<8x32xf32>
    %71 = vector.extract_strided_slice %32 {offsets = [0, 32], sizes = [8, 32], strides = [1, 1]} : vector<8x96xf32> to vector<8x32xf32>
    %72 = arith.addf %70, %71 : vector<8x32xf32>
    %73 = arith.negf %72 : vector<8x32xf32>
    %74 = math.exp %73 : vector<8x32xf32>
    %cst_32 = arith.constant 1.000000e+00 : f32
    %75 = vector.broadcast %cst_32 : f32 to vector<8x32xf32>
    %76 = arith.addf %75, %74 : vector<8x32xf32>
    %77 = arith.divf %75, %76 : vector<8x32xf32>
    %78 = vector.extract_strided_slice %30 {offsets = [0, 64], sizes = [8, 32], strides = [1, 1]} : vector<8x96xf32> to vector<8x32xf32>
    %79 = arith.mulf %69, %61 : vector<8x32xf32>
    %80 = arith.addf %78, %79 : vector<8x32xf32>
    %81 = math.tanh %80 : vector<8x32xf32>
    %cst_33 = arith.constant 1.000000e+00 : f32
    %82 = vector.broadcast %cst_33 : f32 to vector<8x32xf32>
    %83 = arith.subf %82, %77 : vector<8x32xf32>
    %84 = arith.mulf %83, %81 : vector<8x32xf32>
    %85 = arith.mulf %77, %21 : vector<8x32xf32>
    %86 = arith.addf %84, %85 : vector<8x32xf32>
    %87 = arith.index_cast %23 : i32 to index
    %c0_34 = arith.constant 0 : index
    %88 = vector.load %arg22[%87, %c0_34] : memref<64x32xf32, #tpu.memory_space<vmem>>, vector<8x32xf32>
    tpu.vector_store %arg22[%87, %c0_34], %59 {strides = array<i32>} : memref<64x32xf32, #tpu.memory_space<vmem>>, vector<8x32xf32>,
    %89 = arith.index_cast %26 : i32 to index
    %c0_35 = arith.constant 0 : index
    %90 = vector.load %arg23[%89, %c0_35] : memref<64x32xf32, #tpu.memory_space<vmem>>, vector<8x32xf32>
    tpu.vector_store %arg23[%89, %c0_35], %86 {strides = array<i32>} : memref<64x32xf32, #tpu.memory_space<vmem>>, vector<8x32xf32>,
    %c1_i32 = arith.constant 1 : i32
    %c8_i32_36 = arith.constant 8 : i32
    %91 = arith.muli %c1_i32, %c8_i32_36 : i32
    %92 = tpu.assume_multiple %91, 8 : i32
    %c7_i32_37 = arith.constant 7 : i32
    %93 = arith.subi %c7_i32_37, %c1_i32 : i32
    %c8_i32_38 = arith.constant 8 : i32
    %94 = arith.muli %93, %c8_i32_38 : i32
    %95 = tpu.assume_multiple %94, 8 : i32
    %96 = arith.index_cast %92 : i32 to index
    %c0_39 = arith.constant 0 : index
    %97 = vector.load %arg20[%96, %c0_39] : memref<64x96xf32, #tpu.memory_space<vmem>>, vector<8x96xf32>
    %98 = arith.index_cast %95 : i32 to index
    %c0_40 = arith.constant 0 : index
    %99 = vector.load %arg21[%98, %c0_40] : memref<64x96xf32, #tpu.memory_space<vmem>>, vector<8x96xf32>
    %cst_41 = arith.constant dense<0.000000e+00> : vector<8x96xf32>
    %100 = tpu.matmul %59, %16, %cst_41 {dimension_numbers = #tpu.dot_dimension_numbers<[1], [0], [0], [1], [0, 0, 1, 1], [], []>} : vector<8x32xf32>, vector<32x96xf32>, vector<8x96xf32> -> vector<8x96xf32>
    %cst_42 = arith.constant dense<0.000000e+00> : vector<8x96xf32>
    %101 = tpu.matmul %86, %20, %cst_42 {dimension_numbers = #tpu.dot_dimension_numbers<[1], [0], [0], [1], [0, 0, 1, 1], [], []>} : vector<8x32xf32>, vector<32x96xf32>, vector<8x96xf32> -> vector<8x96xf32>
    %102 = vector.extract_strided_slice %100 {offsets = [0, 64], sizes = [8, 32], strides = [1, 1]} : vector<8x96xf32> to vector<8x32xf32>
    %103 = arith.addf %102, %15 : vector<8x32xf32>
    %104 = vector.extract_strided_slice %97 {offsets = [0, 0], sizes = [8, 32], strides = [1, 1]} : vector<8x96xf32> to vector<8x32xf32>
    %105 = vector.extract_strided_slice %100 {offsets = [0, 0], sizes = [8, 32], strides = [1, 1]} : vector<8x96xf32> to vector<8x32xf32>
    %106 = arith.addf %104, %105 : vector<8x32xf32>
    %107 = arith.negf %106 : vector<8x32xf32>
    %108 = math.exp %107 : vector<8x32xf32>
    %cst_43 = arith.constant 1.000000e+00 : f32
    %109 = vector.broadcast %cst_43 : f32 to vector<8x32xf32>
    %110 = arith.addf %109, %108 : vector<8x32xf32>
    %111 = arith.divf %109, %110 : vector<8x32xf32>
    %112 = vector.extract_strided_slice %97 {offsets = [0, 32], sizes = [8, 32], strides = [1, 1]} : vector<8x96xf32> to vector<8x32xf32>
    %113 = vector.extract_strided_slice %100 {offsets = [0, 32], sizes = [8, 32], strides = [1, 1]} : vector<8x96xf32> to vector<8x32xf32>
    %114 = arith.addf %112, %113 : vector<8x32xf32>
    %115 = arith.negf %114 : vector<8x32xf32>
    %116 = math.exp %115 : vector<8x32xf32>
    %cst_44 = arith.constant 1.000000e+00 : f32
    %117 = vector.broadcast %cst_44 : f32 to vector<8x32xf32>
    %118 = arith.addf %117, %116 : vector<8x32xf32>
    %119 = arith.divf %117, %118 : vector<8x32xf32>
    %120 = vector.extract_strided_slice %97 {offsets = [0, 64], sizes = [8, 32], strides = [1, 1]} : vector<8x96xf32> to vector<8x32xf32>
    %121 = arith.mulf %111, %103 : vector<8x32xf32>
    %122 = arith.addf %120, %121 : vector<8x32xf32>
    %123 = math.tanh %122 : vector<8x32xf32>
    %cst_45 = arith.constant 1.000000e+00 : f32
    %124 = vector.broadcast %cst_45 : f32 to vector<8x32xf32>
    %125 = arith.subf %124, %119 : vector<8x32xf32>
    %126 = arith.mulf %125, %123 : vector<8x32xf32>
    %127 = arith.mulf %119, %59 : vector<8x32xf32>
    %128 = arith.addf %126, %127 : vector<8x32xf32>
    %129 = vector.extract_strided_slice %101 {offsets = [0, 64], sizes = [8, 32], strides = [1, 1]} : vector<8x96xf32> to vector<8x32xf32>
    %130 = arith.addf %129, %19 : vector<8x32xf32>
    %131 = vector.extract_strided_slice %99 {offsets = [0, 0], sizes = [8, 32], strides = [1, 1]} : vector<8x96xf32> to vector<8x32xf32>
    %132 = vector.extract_strided_slice %101 {offsets = [0, 0], sizes = [8, 32], strides = [1, 1]} : vector<8x96xf32> to vector<8x32xf32>
    %133 = arith.addf %131, %132 : vector<8x32xf32>
    %134 = arith.negf %133 : vector<8x32xf32>
    %135 = math.exp %134 : vector<8x32xf32>
    %cst_46 = arith.constant 1.000000e+00 : f32
    %136 = vector.broadcast %cst_46 : f32 to vector<8x32xf32>
    %137 = arith.addf %136, %135 : vector<8x32xf32>
    %138 = arith.divf %136, %137 : vector<8x32xf32>
    %139 = vector.extract_strided_slice %99 {offsets = [0, 32], sizes = [8, 32], strides = [1, 1]} : vector<8x96xf32> to vector<8x32xf32>
    %140 = vector.extract_strided_slice %101 {offsets = [0, 32], sizes = [8, 32], strides = [1, 1]} : vector<8x96xf32> to vector<8x32xf32>
    %141 = arith.addf %139, %140 : vector<8x32xf32>
    %142 = arith.negf %141 : vector<8x32xf32>
    %143 = math.exp %142 : vector<8x32xf32>
    %cst_47 = arith.constant 1.000000e+00 : f32
    %144 = vector.broadcast %cst_47 : f32 to vector<8x32xf32>
    %145 = arith.addf %144, %143 : vector<8x32xf32>
    %146 = arith.divf %144, %145 : vector<8x32xf32>
    %147 = vector.extract_strided_slice %99 {offsets = [0, 64], sizes = [8, 32], strides = [1, 1]} : vector<8x96xf32> to vector<8x32xf32>
    %148 = arith.mulf %138, %130 : vector<8x32xf32>
    %149 = arith.addf %147, %148 : vector<8x32xf32>
    %150 = math.tanh %149 : vector<8x32xf32>
    %cst_48 = arith.constant 1.000000e+00 : f32
    %151 = vector.broadcast %cst_48 : f32 to vector<8x32xf32>
    %152 = arith.subf %151, %146 : vector<8x32xf32>
    %153 = arith.mulf %152, %150 : vector<8x32xf32>
    %154 = arith.mulf %146, %86 : vector<8x32xf32>
    %155 = arith.addf %153, %154 : vector<8x32xf32>
    %156 = arith.index_cast %92 : i32 to index
    %c0_49 = arith.constant 0 : index
    %157 = vector.load %arg22[%156, %c0_49] : memref<64x32xf32, #tpu.memory_space<vmem>>, vector<8x32xf32>
    tpu.vector_store %arg22[%156, %c0_49], %128 {strides = array<i32>} : memref<64x32xf32, #tpu.memory_space<vmem>>, vector<8x32xf32>,
    %158 = arith.index_cast %95 : i32 to index
    %c0_50 = arith.constant 0 : index
    %159 = vector.load %arg23[%158, %c0_50] : memref<64x32xf32, #tpu.memory_space<vmem>>, vector<8x32xf32>
    tpu.vector_store %arg23[%158, %c0_50], %155 {strides = array<i32>} : memref<64x32xf32, #tpu.memory_space<vmem>>, vector<8x32xf32>,
    %c2_i32 = arith.constant 2 : i32
    %c8_i32_51 = arith.constant 8 : i32
    %160 = arith.muli %c2_i32, %c8_i32_51 : i32
    %161 = tpu.assume_multiple %160, 8 : i32
    %c7_i32_52 = arith.constant 7 : i32
    %162 = arith.subi %c7_i32_52, %c2_i32 : i32
    %c8_i32_53 = arith.constant 8 : i32
    %163 = arith.muli %162, %c8_i32_53 : i32
    %164 = tpu.assume_multiple %163, 8 : i32
    %165 = arith.index_cast %161 : i32 to index
    %c0_54 = arith.constant 0 : index
    %166 = vector.load %arg20[%165, %c0_54] : memref<64x96xf32, #tpu.memory_space<vmem>>, vector<8x96xf32>
    %167 = arith.index_cast %164 : i32 to index
    %c0_55 = arith.constant 0 : index
    %168 = vector.load %arg21[%167, %c0_55] : memref<64x96xf32, #tpu.memory_space<vmem>>, vector<8x96xf32>
    %cst_56 = arith.constant dense<0.000000e+00> : vector<8x96xf32>
    %169 = tpu.matmul %128, %16, %cst_56 {dimension_numbers = #tpu.dot_dimension_numbers<[1], [0], [0], [1], [0, 0, 1, 1], [], []>} : vector<8x32xf32>, vector<32x96xf32>, vector<8x96xf32> -> vector<8x96xf32>
    %cst_57 = arith.constant dense<0.000000e+00> : vector<8x96xf32>
    %170 = tpu.matmul %155, %20, %cst_57 {dimension_numbers = #tpu.dot_dimension_numbers<[1], [0], [0], [1], [0, 0, 1, 1], [], []>} : vector<8x32xf32>, vector<32x96xf32>, vector<8x96xf32> -> vector<8x96xf32>
    %171 = vector.extract_strided_slice %169 {offsets = [0, 64], sizes = [8, 32], strides = [1, 1]} : vector<8x96xf32> to vector<8x32xf32>
    %172 = arith.addf %171, %15 : vector<8x32xf32>
    %173 = vector.extract_strided_slice %166 {offsets = [0, 0], sizes = [8, 32], strides = [1, 1]} : vector<8x96xf32> to vector<8x32xf32>
    %174 = vector.extract_strided_slice %169 {offsets = [0, 0], sizes = [8, 32], strides = [1, 1]} : vector<8x96xf32> to vector<8x32xf32>
    %175 = arith.addf %173, %174 : vector<8x32xf32>
    %176 = arith.negf %175 : vector<8x32xf32>
    %177 = math.exp %176 : vector<8x32xf32>
    %cst_58 = arith.constant 1.000000e+00 : f32
    %178 = vector.broadcast %cst_58 : f32 to vector<8x32xf32>
    %179 = arith.addf %178, %177 : vector<8x32xf32>
    %180 = arith.divf %178, %179 : vector<8x32xf32>
    %181 = vector.extract_strided_slice %166 {offsets = [0, 32], sizes = [8, 32], strides = [1, 1]} : vector<8x96xf32> to vector<8x32xf32>
    %182 = vector.extract_strided_slice %169 {offsets = [0, 32], sizes = [8, 32], strides = [1, 1]} : vector<8x96xf32> to vector<8x32xf32>
    %183 = arith.addf %181, %182 : vector<8x32xf32>
    %184 = arith.negf %183 : vector<8x32xf32>
    %185 = math.exp %184 : vector<8x32xf32>
    %cst_59 = arith.constant 1.000000e+00 : f32
    %186 = vector.broadcast %cst_59 : f32 to vector<8x32xf32>
    %187 = arith.addf %186, %185 : vector<8x32xf32>
    %188 = arith.divf %186, %187 : vector<8x32xf32>
    %189 = vector.extract_strided_slice %166 {offsets = [0, 64], sizes = [8, 32], strides = [1, 1]} : vector<8x96xf32> to vector<8x32xf32>
    %190 = arith.mulf %180, %172 : vector<8x32xf32>
    %191 = arith.addf %189, %190 : vector<8x32xf32>
    %192 = math.tanh %191 : vector<8x32xf32>
    %cst_60 = arith.constant 1.000000e+00 : f32
    %193 = vector.broadcast %cst_60 : f32 to vector<8x32xf32>
    %194 = arith.subf %193, %188 : vector<8x32xf32>
    %195 = arith.mulf %194, %192 : vector<8x32xf32>
    %196 = arith.mulf %188, %128 : vector<8x32xf32>
    %197 = arith.addf %195, %196 : vector<8x32xf32>
    %198 = vector.extract_strided_slice %170 {offsets = [0, 64], sizes = [8, 32], strides = [1, 1]} : vector<8x96xf32> to vector<8x32xf32>
    %199 = arith.addf %198, %19 : vector<8x32xf32>
    %200 = vector.extract_strided_slice %168 {offsets = [0, 0], sizes = [8, 32], strides = [1, 1]} : vector<8x96xf32> to vector<8x32xf32>
    %201 = vector.extract_strided_slice %170 {offsets = [0, 0], sizes = [8, 32], strides = [1, 1]} : vector<8x96xf32> to vector<8x32xf32>
    %202 = arith.addf %200, %201 : vector<8x32xf32>
    %203 = arith.negf %202 : vector<8x32xf32>
    %204 = math.exp %203 : vector<8x32xf32>
    %cst_61 = arith.constant 1.000000e+00 : f32
    %205 = vector.broadcast %cst_61 : f32 to vector<8x32xf32>
    %206 = arith.addf %205, %204 : vector<8x32xf32>
    %207 = arith.divf %205, %206 : vector<8x32xf32>
    %208 = vector.extract_strided_slice %168 {offsets = [0, 32], sizes = [8, 32], strides = [1, 1]} : vector<8x96xf32> to vector<8x32xf32>
    %209 = vector.extract_strided_slice %170 {offsets = [0, 32], sizes = [8, 32], strides = [1, 1]} : vector<8x96xf32> to vector<8x32xf32>
    %210 = arith.addf %208, %209 : vector<8x32xf32>
    %211 = arith.negf %210 : vector<8x32xf32>
    %212 = math.exp %211 : vector<8x32xf32>
    %cst_62 = arith.constant 1.000000e+00 : f32
    %213 = vector.broadcast %cst_62 : f32 to vector<8x32xf32>
    %214 = arith.addf %213, %212 : vector<8x32xf32>
    %215 = arith.divf %213, %214 : vector<8x32xf32>
    %216 = vector.extract_strided_slice %168 {offsets = [0, 64], sizes = [8, 32], strides = [1, 1]} : vector<8x96xf32> to vector<8x32xf32>
    %217 = arith.mulf %207, %199 : vector<8x32xf32>
    %218 = arith.addf %216, %217 : vector<8x32xf32>
    %219 = math.tanh %218 : vector<8x32xf32>
    %cst_63 = arith.constant 1.000000e+00 : f32
    %220 = vector.broadcast %cst_63 : f32 to vector<8x32xf32>
    %221 = arith.subf %220, %215 : vector<8x32xf32>
    %222 = arith.mulf %221, %219 : vector<8x32xf32>
    %223 = arith.mulf %215, %155 : vector<8x32xf32>
    %224 = arith.addf %222, %223 : vector<8x32xf32>
    %225 = arith.index_cast %161 : i32 to index
    %c0_64 = arith.constant 0 : index
    %226 = vector.load %arg22[%225, %c0_64] : memref<64x32xf32, #tpu.memory_space<vmem>>, vector<8x32xf32>
    tpu.vector_store %arg22[%225, %c0_64], %197 {strides = array<i32>} : memref<64x32xf32, #tpu.memory_space<vmem>>, vector<8x32xf32>,
    %227 = arith.index_cast %164 : i32 to index
    %c0_65 = arith.constant 0 : index
    %228 = vector.load %arg23[%227, %c0_65] : memref<64x32xf32, #tpu.memory_space<vmem>>, vector<8x32xf32>
    tpu.vector_store %arg23[%227, %c0_65], %224 {strides = array<i32>} : memref<64x32xf32, #tpu.memory_space<vmem>>, vector<8x32xf32>,
    %c3_i32 = arith.constant 3 : i32
    %c8_i32_66 = arith.constant 8 : i32
    %229 = arith.muli %c3_i32, %c8_i32_66 : i32
    %230 = tpu.assume_multiple %229, 8 : i32
    %c7_i32_67 = arith.constant 7 : i32
    %231 = arith.subi %c7_i32_67, %c3_i32 : i32
    %c8_i32_68 = arith.constant 8 : i32
    %232 = arith.muli %231, %c8_i32_68 : i32
    %233 = tpu.assume_multiple %232, 8 : i32
    %234 = arith.index_cast %230 : i32 to index
    %c0_69 = arith.constant 0 : index
    %235 = vector.load %arg20[%234, %c0_69] : memref<64x96xf32, #tpu.memory_space<vmem>>, vector<8x96xf32>
    %236 = arith.index_cast %233 : i32 to index
    %c0_70 = arith.constant 0 : index
    %237 = vector.load %arg21[%236, %c0_70] : memref<64x96xf32, #tpu.memory_space<vmem>>, vector<8x96xf32>
    %cst_71 = arith.constant dense<0.000000e+00> : vector<8x96xf32>
    %238 = tpu.matmul %197, %16, %cst_71 {dimension_numbers = #tpu.dot_dimension_numbers<[1], [0], [0], [1], [0, 0, 1, 1], [], []>} : vector<8x32xf32>, vector<32x96xf32>, vector<8x96xf32> -> vector<8x96xf32>
    %cst_72 = arith.constant dense<0.000000e+00> : vector<8x96xf32>
    %239 = tpu.matmul %224, %20, %cst_72 {dimension_numbers = #tpu.dot_dimension_numbers<[1], [0], [0], [1], [0, 0, 1, 1], [], []>} : vector<8x32xf32>, vector<32x96xf32>, vector<8x96xf32> -> vector<8x96xf32>
    %240 = vector.extract_strided_slice %238 {offsets = [0, 64], sizes = [8, 32], strides = [1, 1]} : vector<8x96xf32> to vector<8x32xf32>
    %241 = arith.addf %240, %15 : vector<8x32xf32>
    %242 = vector.extract_strided_slice %235 {offsets = [0, 0], sizes = [8, 32], strides = [1, 1]} : vector<8x96xf32> to vector<8x32xf32>
    %243 = vector.extract_strided_slice %238 {offsets = [0, 0], sizes = [8, 32], strides = [1, 1]} : vector<8x96xf32> to vector<8x32xf32>
    %244 = arith.addf %242, %243 : vector<8x32xf32>
    %245 = arith.negf %244 : vector<8x32xf32>
    %246 = math.exp %245 : vector<8x32xf32>
    %cst_73 = arith.constant 1.000000e+00 : f32
    %247 = vector.broadcast %cst_73 : f32 to vector<8x32xf32>
    %248 = arith.addf %247, %246 : vector<8x32xf32>
    %249 = arith.divf %247, %248 : vector<8x32xf32>
    %250 = vector.extract_strided_slice %235 {offsets = [0, 32], sizes = [8, 32], strides = [1, 1]} : vector<8x96xf32> to vector<8x32xf32>
    %251 = vector.extract_strided_slice %238 {offsets = [0, 32], sizes = [8, 32], strides = [1, 1]} : vector<8x96xf32> to vector<8x32xf32>
    %252 = arith.addf %250, %251 : vector<8x32xf32>
    %253 = arith.negf %252 : vector<8x32xf32>
    %254 = math.exp %253 : vector<8x32xf32>
    %cst_74 = arith.constant 1.000000e+00 : f32
    %255 = vector.broadcast %cst_74 : f32 to vector<8x32xf32>
    %256 = arith.addf %255, %254 : vector<8x32xf32>
    %257 = arith.divf %255, %256 : vector<8x32xf32>
    %258 = vector.extract_strided_slice %235 {offsets = [0, 64], sizes = [8, 32], strides = [1, 1]} : vector<8x96xf32> to vector<8x32xf32>
    %259 = arith.mulf %249, %241 : vector<8x32xf32>
    %260 = arith.addf %258, %259 : vector<8x32xf32>
    %261 = math.tanh %260 : vector<8x32xf32>
    %cst_75 = arith.constant 1.000000e+00 : f32
    %262 = vector.broadcast %cst_75 : f32 to vector<8x32xf32>
    %263 = arith.subf %262, %257 : vector<8x32xf32>
    %264 = arith.mulf %263, %261 : vector<8x32xf32>
    %265 = arith.mulf %257, %197 : vector<8x32xf32>
    %266 = arith.addf %264, %265 : vector<8x32xf32>
    %267 = vector.extract_strided_slice %239 {offsets = [0, 64], sizes = [8, 32], strides = [1, 1]} : vector<8x96xf32> to vector<8x32xf32>
    %268 = arith.addf %267, %19 : vector<8x32xf32>
    %269 = vector.extract_strided_slice %237 {offsets = [0, 0], sizes = [8, 32], strides = [1, 1]} : vector<8x96xf32> to vector<8x32xf32>
    %270 = vector.extract_strided_slice %239 {offsets = [0, 0], sizes = [8, 32], strides = [1, 1]} : vector<8x96xf32> to vector<8x32xf32>
    %271 = arith.addf %269, %270 : vector<8x32xf32>
    %272 = arith.negf %271 : vector<8x32xf32>
    %273 = math.exp %272 : vector<8x32xf32>
    %cst_76 = arith.constant 1.000000e+00 : f32
    %274 = vector.broadcast %cst_76 : f32 to vector<8x32xf32>
    %275 = arith.addf %274, %273 : vector<8x32xf32>
    %276 = arith.divf %274, %275 : vector<8x32xf32>
    %277 = vector.extract_strided_slice %237 {offsets = [0, 32], sizes = [8, 32], strides = [1, 1]} : vector<8x96xf32> to vector<8x32xf32>
    %278 = vector.extract_strided_slice %239 {offsets = [0, 32], sizes = [8, 32], strides = [1, 1]} : vector<8x96xf32> to vector<8x32xf32>
    %279 = arith.addf %277, %278 : vector<8x32xf32>
    %280 = arith.negf %279 : vector<8x32xf32>
    %281 = math.exp %280 : vector<8x32xf32>
    %cst_77 = arith.constant 1.000000e+00 : f32
    %282 = vector.broadcast %cst_77 : f32 to vector<8x32xf32>
    %283 = arith.addf %282, %281 : vector<8x32xf32>
    %284 = arith.divf %282, %283 : vector<8x32xf32>
    %285 = vector.extract_strided_slice %237 {offsets = [0, 64], sizes = [8, 32], strides = [1, 1]} : vector<8x96xf32> to vector<8x32xf32>
    %286 = arith.mulf %276, %268 : vector<8x32xf32>
    %287 = arith.addf %285, %286 : vector<8x32xf32>
    %288 = math.tanh %287 : vector<8x32xf32>
    %cst_78 = arith.constant 1.000000e+00 : f32
    %289 = vector.broadcast %cst_78 : f32 to vector<8x32xf32>
    %290 = arith.subf %289, %284 : vector<8x32xf32>
    %291 = arith.mulf %290, %288 : vector<8x32xf32>
    %292 = arith.mulf %284, %224 : vector<8x32xf32>
    %293 = arith.addf %291, %292 : vector<8x32xf32>
    %294 = arith.index_cast %230 : i32 to index
    %c0_79 = arith.constant 0 : index
    %295 = vector.load %arg22[%294, %c0_79] : memref<64x32xf32, #tpu.memory_space<vmem>>, vector<8x32xf32>
    tpu.vector_store %arg22[%294, %c0_79], %266 {strides = array<i32>} : memref<64x32xf32, #tpu.memory_space<vmem>>, vector<8x32xf32>,
    %296 = arith.index_cast %233 : i32 to index
    %c0_80 = arith.constant 0 : index
    %297 = vector.load %arg23[%296, %c0_80] : memref<64x32xf32, #tpu.memory_space<vmem>>, vector<8x32xf32>
    tpu.vector_store %arg23[%296, %c0_80], %293 {strides = array<i32>} : memref<64x32xf32, #tpu.memory_space<vmem>>, vector<8x32xf32>,
    %c4_i32 = arith.constant 4 : i32
    %c8_i32_81 = arith.constant 8 : i32
    %298 = arith.muli %c4_i32, %c8_i32_81 : i32
    %299 = tpu.assume_multiple %298, 8 : i32
    %c7_i32_82 = arith.constant 7 : i32
    %300 = arith.subi %c7_i32_82, %c4_i32 : i32
    %c8_i32_83 = arith.constant 8 : i32
    %301 = arith.muli %300, %c8_i32_83 : i32
    %302 = tpu.assume_multiple %301, 8 : i32
    %303 = arith.index_cast %299 : i32 to index
    %c0_84 = arith.constant 0 : index
    %304 = vector.load %arg20[%303, %c0_84] : memref<64x96xf32, #tpu.memory_space<vmem>>, vector<8x96xf32>
    %305 = arith.index_cast %302 : i32 to index
    %c0_85 = arith.constant 0 : index
    %306 = vector.load %arg21[%305, %c0_85] : memref<64x96xf32, #tpu.memory_space<vmem>>, vector<8x96xf32>
    %cst_86 = arith.constant dense<0.000000e+00> : vector<8x96xf32>
    %307 = tpu.matmul %266, %16, %cst_86 {dimension_numbers = #tpu.dot_dimension_numbers<[1], [0], [0], [1], [0, 0, 1, 1], [], []>} : vector<8x32xf32>, vector<32x96xf32>, vector<8x96xf32> -> vector<8x96xf32>
    %cst_87 = arith.constant dense<0.000000e+00> : vector<8x96xf32>
    %308 = tpu.matmul %293, %20, %cst_87 {dimension_numbers = #tpu.dot_dimension_numbers<[1], [0], [0], [1], [0, 0, 1, 1], [], []>} : vector<8x32xf32>, vector<32x96xf32>, vector<8x96xf32> -> vector<8x96xf32>
    %309 = vector.extract_strided_slice %307 {offsets = [0, 64], sizes = [8, 32], strides = [1, 1]} : vector<8x96xf32> to vector<8x32xf32>
    %310 = arith.addf %309, %15 : vector<8x32xf32>
    %311 = vector.extract_strided_slice %304 {offsets = [0, 0], sizes = [8, 32], strides = [1, 1]} : vector<8x96xf32> to vector<8x32xf32>
    %312 = vector.extract_strided_slice %307 {offsets = [0, 0], sizes = [8, 32], strides = [1, 1]} : vector<8x96xf32> to vector<8x32xf32>
    %313 = arith.addf %311, %312 : vector<8x32xf32>
    %314 = arith.negf %313 : vector<8x32xf32>
    %315 = math.exp %314 : vector<8x32xf32>
    %cst_88 = arith.constant 1.000000e+00 : f32
    %316 = vector.broadcast %cst_88 : f32 to vector<8x32xf32>
    %317 = arith.addf %316, %315 : vector<8x32xf32>
    %318 = arith.divf %316, %317 : vector<8x32xf32>
    %319 = vector.extract_strided_slice %304 {offsets = [0, 32], sizes = [8, 32], strides = [1, 1]} : vector<8x96xf32> to vector<8x32xf32>
    %320 = vector.extract_strided_slice %307 {offsets = [0, 32], sizes = [8, 32], strides = [1, 1]} : vector<8x96xf32> to vector<8x32xf32>
    %321 = arith.addf %319, %320 : vector<8x32xf32>
    %322 = arith.negf %321 : vector<8x32xf32>
    %323 = math.exp %322 : vector<8x32xf32>
    %cst_89 = arith.constant 1.000000e+00 : f32
    %324 = vector.broadcast %cst_89 : f32 to vector<8x32xf32>
    %325 = arith.addf %324, %323 : vector<8x32xf32>
    %326 = arith.divf %324, %325 : vector<8x32xf32>
    %327 = vector.extract_strided_slice %304 {offsets = [0, 64], sizes = [8, 32], strides = [1, 1]} : vector<8x96xf32> to vector<8x32xf32>
    %328 = arith.mulf %318, %310 : vector<8x32xf32>
    %329 = arith.addf %327, %328 : vector<8x32xf32>
    %330 = math.tanh %329 : vector<8x32xf32>
    %cst_90 = arith.constant 1.000000e+00 : f32
    %331 = vector.broadcast %cst_90 : f32 to vector<8x32xf32>
    %332 = arith.subf %331, %326 : vector<8x32xf32>
    %333 = arith.mulf %332, %330 : vector<8x32xf32>
    %334 = arith.mulf %326, %266 : vector<8x32xf32>
    %335 = arith.addf %333, %334 : vector<8x32xf32>
    %336 = vector.extract_strided_slice %308 {offsets = [0, 64], sizes = [8, 32], strides = [1, 1]} : vector<8x96xf32> to vector<8x32xf32>
    %337 = arith.addf %336, %19 : vector<8x32xf32>
    %338 = vector.extract_strided_slice %306 {offsets = [0, 0], sizes = [8, 32], strides = [1, 1]} : vector<8x96xf32> to vector<8x32xf32>
    %339 = vector.extract_strided_slice %308 {offsets = [0, 0], sizes = [8, 32], strides = [1, 1]} : vector<8x96xf32> to vector<8x32xf32>
    %340 = arith.addf %338, %339 : vector<8x32xf32>
    %341 = arith.negf %340 : vector<8x32xf32>
    %342 = math.exp %341 : vector<8x32xf32>
    %cst_91 = arith.constant 1.000000e+00 : f32
    %343 = vector.broadcast %cst_91 : f32 to vector<8x32xf32>
    %344 = arith.addf %343, %342 : vector<8x32xf32>
    %345 = arith.divf %343, %344 : vector<8x32xf32>
    %346 = vector.extract_strided_slice %306 {offsets = [0, 32], sizes = [8, 32], strides = [1, 1]} : vector<8x96xf32> to vector<8x32xf32>
    %347 = vector.extract_strided_slice %308 {offsets = [0, 32], sizes = [8, 32], strides = [1, 1]} : vector<8x96xf32> to vector<8x32xf32>
    %348 = arith.addf %346, %347 : vector<8x32xf32>
    %349 = arith.negf %348 : vector<8x32xf32>
    %350 = math.exp %349 : vector<8x32xf32>
    %cst_92 = arith.constant 1.000000e+00 : f32
    %351 = vector.broadcast %cst_92 : f32 to vector<8x32xf32>
    %352 = arith.addf %351, %350 : vector<8x32xf32>
    %353 = arith.divf %351, %352 : vector<8x32xf32>
    %354 = vector.extract_strided_slice %306 {offsets = [0, 64], sizes = [8, 32], strides = [1, 1]} : vector<8x96xf32> to vector<8x32xf32>
    %355 = arith.mulf %345, %337 : vector<8x32xf32>
    %356 = arith.addf %354, %355 : vector<8x32xf32>
    %357 = math.tanh %356 : vector<8x32xf32>
    %cst_93 = arith.constant 1.000000e+00 : f32
    %358 = vector.broadcast %cst_93 : f32 to vector<8x32xf32>
    %359 = arith.subf %358, %353 : vector<8x32xf32>
    %360 = arith.mulf %359, %357 : vector<8x32xf32>
    %361 = arith.mulf %353, %293 : vector<8x32xf32>
    %362 = arith.addf %360, %361 : vector<8x32xf32>
    %363 = arith.index_cast %299 : i32 to index
    %c0_94 = arith.constant 0 : index
    %364 = vector.load %arg22[%363, %c0_94] : memref<64x32xf32, #tpu.memory_space<vmem>>, vector<8x32xf32>
    tpu.vector_store %arg22[%363, %c0_94], %335 {strides = array<i32>} : memref<64x32xf32, #tpu.memory_space<vmem>>, vector<8x32xf32>,
    %365 = arith.index_cast %302 : i32 to index
    %c0_95 = arith.constant 0 : index
    %366 = vector.load %arg23[%365, %c0_95] : memref<64x32xf32, #tpu.memory_space<vmem>>, vector<8x32xf32>
    tpu.vector_store %arg23[%365, %c0_95], %362 {strides = array<i32>} : memref<64x32xf32, #tpu.memory_space<vmem>>, vector<8x32xf32>,
    %c5_i32 = arith.constant 5 : i32
    %c8_i32_96 = arith.constant 8 : i32
    %367 = arith.muli %c5_i32, %c8_i32_96 : i32
    %368 = tpu.assume_multiple %367, 8 : i32
    %c7_i32_97 = arith.constant 7 : i32
    %369 = arith.subi %c7_i32_97, %c5_i32 : i32
    %c8_i32_98 = arith.constant 8 : i32
    %370 = arith.muli %369, %c8_i32_98 : i32
    %371 = tpu.assume_multiple %370, 8 : i32
    %372 = arith.index_cast %368 : i32 to index
    %c0_99 = arith.constant 0 : index
    %373 = vector.load %arg20[%372, %c0_99] : memref<64x96xf32, #tpu.memory_space<vmem>>, vector<8x96xf32>
    %374 = arith.index_cast %371 : i32 to index
    %c0_100 = arith.constant 0 : index
    %375 = vector.load %arg21[%374, %c0_100] : memref<64x96xf32, #tpu.memory_space<vmem>>, vector<8x96xf32>
    %cst_101 = arith.constant dense<0.000000e+00> : vector<8x96xf32>
    %376 = tpu.matmul %335, %16, %cst_101 {dimension_numbers = #tpu.dot_dimension_numbers<[1], [0], [0], [1], [0, 0, 1, 1], [], []>} : vector<8x32xf32>, vector<32x96xf32>, vector<8x96xf32> -> vector<8x96xf32>
    %cst_102 = arith.constant dense<0.000000e+00> : vector<8x96xf32>
    %377 = tpu.matmul %362, %20, %cst_102 {dimension_numbers = #tpu.dot_dimension_numbers<[1], [0], [0], [1], [0, 0, 1, 1], [], []>} : vector<8x32xf32>, vector<32x96xf32>, vector<8x96xf32> -> vector<8x96xf32>
    %378 = vector.extract_strided_slice %376 {offsets = [0, 64], sizes = [8, 32], strides = [1, 1]} : vector<8x96xf32> to vector<8x32xf32>
    %379 = arith.addf %378, %15 : vector<8x32xf32>
    %380 = vector.extract_strided_slice %373 {offsets = [0, 0], sizes = [8, 32], strides = [1, 1]} : vector<8x96xf32> to vector<8x32xf32>
    %381 = vector.extract_strided_slice %376 {offsets = [0, 0], sizes = [8, 32], strides = [1, 1]} : vector<8x96xf32> to vector<8x32xf32>
    %382 = arith.addf %380, %381 : vector<8x32xf32>
    %383 = arith.negf %382 : vector<8x32xf32>
    %384 = math.exp %383 : vector<8x32xf32>
    %cst_103 = arith.constant 1.000000e+00 : f32
    %385 = vector.broadcast %cst_103 : f32 to vector<8x32xf32>
    %386 = arith.addf %385, %384 : vector<8x32xf32>
    %387 = arith.divf %385, %386 : vector<8x32xf32>
    %388 = vector.extract_strided_slice %373 {offsets = [0, 32], sizes = [8, 32], strides = [1, 1]} : vector<8x96xf32> to vector<8x32xf32>
    %389 = vector.extract_strided_slice %376 {offsets = [0, 32], sizes = [8, 32], strides = [1, 1]} : vector<8x96xf32> to vector<8x32xf32>
    %390 = arith.addf %388, %389 : vector<8x32xf32>
    %391 = arith.negf %390 : vector<8x32xf32>
    %392 = math.exp %391 : vector<8x32xf32>
    %cst_104 = arith.constant 1.000000e+00 : f32
    %393 = vector.broadcast %cst_104 : f32 to vector<8x32xf32>
    %394 = arith.addf %393, %392 : vector<8x32xf32>
    %395 = arith.divf %393, %394 : vector<8x32xf32>
    %396 = vector.extract_strided_slice %373 {offsets = [0, 64], sizes = [8, 32], strides = [1, 1]} : vector<8x96xf32> to vector<8x32xf32>
    %397 = arith.mulf %387, %379 : vector<8x32xf32>
    %398 = arith.addf %396, %397 : vector<8x32xf32>
    %399 = math.tanh %398 : vector<8x32xf32>
    %cst_105 = arith.constant 1.000000e+00 : f32
    %400 = vector.broadcast %cst_105 : f32 to vector<8x32xf32>
    %401 = arith.subf %400, %395 : vector<8x32xf32>
    %402 = arith.mulf %401, %399 : vector<8x32xf32>
    %403 = arith.mulf %395, %335 : vector<8x32xf32>
    %404 = arith.addf %402, %403 : vector<8x32xf32>
    %405 = vector.extract_strided_slice %377 {offsets = [0, 64], sizes = [8, 32], strides = [1, 1]} : vector<8x96xf32> to vector<8x32xf32>
    %406 = arith.addf %405, %19 : vector<8x32xf32>
    %407 = vector.extract_strided_slice %375 {offsets = [0, 0], sizes = [8, 32], strides = [1, 1]} : vector<8x96xf32> to vector<8x32xf32>
    %408 = vector.extract_strided_slice %377 {offsets = [0, 0], sizes = [8, 32], strides = [1, 1]} : vector<8x96xf32> to vector<8x32xf32>
    %409 = arith.addf %407, %408 : vector<8x32xf32>
    %410 = arith.negf %409 : vector<8x32xf32>
    %411 = math.exp %410 : vector<8x32xf32>
    %cst_106 = arith.constant 1.000000e+00 : f32
    %412 = vector.broadcast %cst_106 : f32 to vector<8x32xf32>
    %413 = arith.addf %412, %411 : vector<8x32xf32>
    %414 = arith.divf %412, %413 : vector<8x32xf32>
    %415 = vector.extract_strided_slice %375 {offsets = [0, 32], sizes = [8, 32], strides = [1, 1]} : vector<8x96xf32> to vector<8x32xf32>
    %416 = vector.extract_strided_slice %377 {offsets = [0, 32], sizes = [8, 32], strides = [1, 1]} : vector<8x96xf32> to vector<8x32xf32>
    %417 = arith.addf %415, %416 : vector<8x32xf32>
    %418 = arith.negf %417 : vector<8x32xf32>
    %419 = math.exp %418 : vector<8x32xf32>
    %cst_107 = arith.constant 1.000000e+00 : f32
    %420 = vector.broadcast %cst_107 : f32 to vector<8x32xf32>
    %421 = arith.addf %420, %419 : vector<8x32xf32>
    %422 = arith.divf %420, %421 : vector<8x32xf32>
    %423 = vector.extract_strided_slice %375 {offsets = [0, 64], sizes = [8, 32], strides = [1, 1]} : vector<8x96xf32> to vector<8x32xf32>
    %424 = arith.mulf %414, %406 : vector<8x32xf32>
    %425 = arith.addf %423, %424 : vector<8x32xf32>
    %426 = math.tanh %425 : vector<8x32xf32>
    %cst_108 = arith.constant 1.000000e+00 : f32
    %427 = vector.broadcast %cst_108 : f32 to vector<8x32xf32>
    %428 = arith.subf %427, %422 : vector<8x32xf32>
    %429 = arith.mulf %428, %426 : vector<8x32xf32>
    %430 = arith.mulf %422, %362 : vector<8x32xf32>
    %431 = arith.addf %429, %430 : vector<8x32xf32>
    %432 = arith.index_cast %368 : i32 to index
    %c0_109 = arith.constant 0 : index
    %433 = vector.load %arg22[%432, %c0_109] : memref<64x32xf32, #tpu.memory_space<vmem>>, vector<8x32xf32>
    tpu.vector_store %arg22[%432, %c0_109], %404 {strides = array<i32>} : memref<64x32xf32, #tpu.memory_space<vmem>>, vector<8x32xf32>,
    %434 = arith.index_cast %371 : i32 to index
    %c0_110 = arith.constant 0 : index
    %435 = vector.load %arg23[%434, %c0_110] : memref<64x32xf32, #tpu.memory_space<vmem>>, vector<8x32xf32>
    tpu.vector_store %arg23[%434, %c0_110], %431 {strides = array<i32>} : memref<64x32xf32, #tpu.memory_space<vmem>>, vector<8x32xf32>,
    %c6_i32 = arith.constant 6 : i32
    %c8_i32_111 = arith.constant 8 : i32
    %436 = arith.muli %c6_i32, %c8_i32_111 : i32
    %437 = tpu.assume_multiple %436, 8 : i32
    %c7_i32_112 = arith.constant 7 : i32
    %438 = arith.subi %c7_i32_112, %c6_i32 : i32
    %c8_i32_113 = arith.constant 8 : i32
    %439 = arith.muli %438, %c8_i32_113 : i32
    %440 = tpu.assume_multiple %439, 8 : i32
    %441 = arith.index_cast %437 : i32 to index
    %c0_114 = arith.constant 0 : index
    %442 = vector.load %arg20[%441, %c0_114] : memref<64x96xf32, #tpu.memory_space<vmem>>, vector<8x96xf32>
    %443 = arith.index_cast %440 : i32 to index
    %c0_115 = arith.constant 0 : index
    %444 = vector.load %arg21[%443, %c0_115] : memref<64x96xf32, #tpu.memory_space<vmem>>, vector<8x96xf32>
    %cst_116 = arith.constant dense<0.000000e+00> : vector<8x96xf32>
    %445 = tpu.matmul %404, %16, %cst_116 {dimension_numbers = #tpu.dot_dimension_numbers<[1], [0], [0], [1], [0, 0, 1, 1], [], []>} : vector<8x32xf32>, vector<32x96xf32>, vector<8x96xf32> -> vector<8x96xf32>
    %cst_117 = arith.constant dense<0.000000e+00> : vector<8x96xf32>
    %446 = tpu.matmul %431, %20, %cst_117 {dimension_numbers = #tpu.dot_dimension_numbers<[1], [0], [0], [1], [0, 0, 1, 1], [], []>} : vector<8x32xf32>, vector<32x96xf32>, vector<8x96xf32> -> vector<8x96xf32>
    %447 = vector.extract_strided_slice %445 {offsets = [0, 64], sizes = [8, 32], strides = [1, 1]} : vector<8x96xf32> to vector<8x32xf32>
    %448 = arith.addf %447, %15 : vector<8x32xf32>
    %449 = vector.extract_strided_slice %442 {offsets = [0, 0], sizes = [8, 32], strides = [1, 1]} : vector<8x96xf32> to vector<8x32xf32>
    %450 = vector.extract_strided_slice %445 {offsets = [0, 0], sizes = [8, 32], strides = [1, 1]} : vector<8x96xf32> to vector<8x32xf32>
    %451 = arith.addf %449, %450 : vector<8x32xf32>
    %452 = arith.negf %451 : vector<8x32xf32>
    %453 = math.exp %452 : vector<8x32xf32>
    %cst_118 = arith.constant 1.000000e+00 : f32
    %454 = vector.broadcast %cst_118 : f32 to vector<8x32xf32>
    %455 = arith.addf %454, %453 : vector<8x32xf32>
    %456 = arith.divf %454, %455 : vector<8x32xf32>
    %457 = vector.extract_strided_slice %442 {offsets = [0, 32], sizes = [8, 32], strides = [1, 1]} : vector<8x96xf32> to vector<8x32xf32>
    %458 = vector.extract_strided_slice %445 {offsets = [0, 32], sizes = [8, 32], strides = [1, 1]} : vector<8x96xf32> to vector<8x32xf32>
    %459 = arith.addf %457, %458 : vector<8x32xf32>
    %460 = arith.negf %459 : vector<8x32xf32>
    %461 = math.exp %460 : vector<8x32xf32>
    %cst_119 = arith.constant 1.000000e+00 : f32
    %462 = vector.broadcast %cst_119 : f32 to vector<8x32xf32>
    %463 = arith.addf %462, %461 : vector<8x32xf32>
    %464 = arith.divf %462, %463 : vector<8x32xf32>
    %465 = vector.extract_strided_slice %442 {offsets = [0, 64], sizes = [8, 32], strides = [1, 1]} : vector<8x96xf32> to vector<8x32xf32>
    %466 = arith.mulf %456, %448 : vector<8x32xf32>
    %467 = arith.addf %465, %466 : vector<8x32xf32>
    %468 = math.tanh %467 : vector<8x32xf32>
    %cst_120 = arith.constant 1.000000e+00 : f32
    %469 = vector.broadcast %cst_120 : f32 to vector<8x32xf32>
    %470 = arith.subf %469, %464 : vector<8x32xf32>
    %471 = arith.mulf %470, %468 : vector<8x32xf32>
    %472 = arith.mulf %464, %404 : vector<8x32xf32>
    %473 = arith.addf %471, %472 : vector<8x32xf32>
    %474 = vector.extract_strided_slice %446 {offsets = [0, 64], sizes = [8, 32], strides = [1, 1]} : vector<8x96xf32> to vector<8x32xf32>
    %475 = arith.addf %474, %19 : vector<8x32xf32>
    %476 = vector.extract_strided_slice %444 {offsets = [0, 0], sizes = [8, 32], strides = [1, 1]} : vector<8x96xf32> to vector<8x32xf32>
    %477 = vector.extract_strided_slice %446 {offsets = [0, 0], sizes = [8, 32], strides = [1, 1]} : vector<8x96xf32> to vector<8x32xf32>
    %478 = arith.addf %476, %477 : vector<8x32xf32>
    %479 = arith.negf %478 : vector<8x32xf32>
    %480 = math.exp %479 : vector<8x32xf32>
    %cst_121 = arith.constant 1.000000e+00 : f32
    %481 = vector.broadcast %cst_121 : f32 to vector<8x32xf32>
    %482 = arith.addf %481, %480 : vector<8x32xf32>
    %483 = arith.divf %481, %482 : vector<8x32xf32>
    %484 = vector.extract_strided_slice %444 {offsets = [0, 32], sizes = [8, 32], strides = [1, 1]} : vector<8x96xf32> to vector<8x32xf32>
    %485 = vector.extract_strided_slice %446 {offsets = [0, 32], sizes = [8, 32], strides = [1, 1]} : vector<8x96xf32> to vector<8x32xf32>
    %486 = arith.addf %484, %485 : vector<8x32xf32>
    %487 = arith.negf %486 : vector<8x32xf32>
    %488 = math.exp %487 : vector<8x32xf32>
    %cst_122 = arith.constant 1.000000e+00 : f32
    %489 = vector.broadcast %cst_122 : f32 to vector<8x32xf32>
    %490 = arith.addf %489, %488 : vector<8x32xf32>
    %491 = arith.divf %489, %490 : vector<8x32xf32>
    %492 = vector.extract_strided_slice %444 {offsets = [0, 64], sizes = [8, 32], strides = [1, 1]} : vector<8x96xf32> to vector<8x32xf32>
    %493 = arith.mulf %483, %475 : vector<8x32xf32>
    %494 = arith.addf %492, %493 : vector<8x32xf32>
    %495 = math.tanh %494 : vector<8x32xf32>
    %cst_123 = arith.constant 1.000000e+00 : f32
    %496 = vector.broadcast %cst_123 : f32 to vector<8x32xf32>
    %497 = arith.subf %496, %491 : vector<8x32xf32>
    %498 = arith.mulf %497, %495 : vector<8x32xf32>
    %499 = arith.mulf %491, %431 : vector<8x32xf32>
    %500 = arith.addf %498, %499 : vector<8x32xf32>
    %501 = arith.index_cast %437 : i32 to index
    %c0_124 = arith.constant 0 : index
    %502 = vector.load %arg22[%501, %c0_124] : memref<64x32xf32, #tpu.memory_space<vmem>>, vector<8x32xf32>
    tpu.vector_store %arg22[%501, %c0_124], %473 {strides = array<i32>} : memref<64x32xf32, #tpu.memory_space<vmem>>, vector<8x32xf32>,
    %503 = arith.index_cast %440 : i32 to index
    %c0_125 = arith.constant 0 : index
    %504 = vector.load %arg23[%503, %c0_125] : memref<64x32xf32, #tpu.memory_space<vmem>>, vector<8x32xf32>
    tpu.vector_store %arg23[%503, %c0_125], %500 {strides = array<i32>} : memref<64x32xf32, #tpu.memory_space<vmem>>, vector<8x32xf32>,
    %c7_i32_126 = arith.constant 7 : i32
    %c8_i32_127 = arith.constant 8 : i32
    %505 = arith.muli %c7_i32_126, %c8_i32_127 : i32
    %506 = tpu.assume_multiple %505, 8 : i32
    %c7_i32_128 = arith.constant 7 : i32
    %507 = arith.subi %c7_i32_128, %c7_i32_126 : i32
    %c8_i32_129 = arith.constant 8 : i32
    %508 = arith.muli %507, %c8_i32_129 : i32
    %509 = tpu.assume_multiple %508, 8 : i32
    %510 = arith.index_cast %506 : i32 to index
    %c0_130 = arith.constant 0 : index
    %511 = vector.load %arg20[%510, %c0_130] : memref<64x96xf32, #tpu.memory_space<vmem>>, vector<8x96xf32>
    %512 = arith.index_cast %509 : i32 to index
    %c0_131 = arith.constant 0 : index
    %513 = vector.load %arg21[%512, %c0_131] : memref<64x96xf32, #tpu.memory_space<vmem>>, vector<8x96xf32>
    %cst_132 = arith.constant dense<0.000000e+00> : vector<8x96xf32>
    %514 = tpu.matmul %473, %16, %cst_132 {dimension_numbers = #tpu.dot_dimension_numbers<[1], [0], [0], [1], [0, 0, 1, 1], [], []>} : vector<8x32xf32>, vector<32x96xf32>, vector<8x96xf32> -> vector<8x96xf32>
    %cst_133 = arith.constant dense<0.000000e+00> : vector<8x96xf32>
    %515 = tpu.matmul %500, %20, %cst_133 {dimension_numbers = #tpu.dot_dimension_numbers<[1], [0], [0], [1], [0, 0, 1, 1], [], []>} : vector<8x32xf32>, vector<32x96xf32>, vector<8x96xf32> -> vector<8x96xf32>
    %516 = vector.extract_strided_slice %514 {offsets = [0, 64], sizes = [8, 32], strides = [1, 1]} : vector<8x96xf32> to vector<8x32xf32>
    %517 = arith.addf %516, %15 : vector<8x32xf32>
    %518 = vector.extract_strided_slice %511 {offsets = [0, 0], sizes = [8, 32], strides = [1, 1]} : vector<8x96xf32> to vector<8x32xf32>
    %519 = vector.extract_strided_slice %514 {offsets = [0, 0], sizes = [8, 32], strides = [1, 1]} : vector<8x96xf32> to vector<8x32xf32>
    %520 = arith.addf %518, %519 : vector<8x32xf32>
    %521 = arith.negf %520 : vector<8x32xf32>
    %522 = math.exp %521 : vector<8x32xf32>
    %cst_134 = arith.constant 1.000000e+00 : f32
    %523 = vector.broadcast %cst_134 : f32 to vector<8x32xf32>
    %524 = arith.addf %523, %522 : vector<8x32xf32>
    %525 = arith.divf %523, %524 : vector<8x32xf32>
    %526 = vector.extract_strided_slice %511 {offsets = [0, 32], sizes = [8, 32], strides = [1, 1]} : vector<8x96xf32> to vector<8x32xf32>
    %527 = vector.extract_strided_slice %514 {offsets = [0, 32], sizes = [8, 32], strides = [1, 1]} : vector<8x96xf32> to vector<8x32xf32>
    %528 = arith.addf %526, %527 : vector<8x32xf32>
    %529 = arith.negf %528 : vector<8x32xf32>
    %530 = math.exp %529 : vector<8x32xf32>
    %cst_135 = arith.constant 1.000000e+00 : f32
    %531 = vector.broadcast %cst_135 : f32 to vector<8x32xf32>
    %532 = arith.addf %531, %530 : vector<8x32xf32>
    %533 = arith.divf %531, %532 : vector<8x32xf32>
    %534 = vector.extract_strided_slice %511 {offsets = [0, 64], sizes = [8, 32], strides = [1, 1]} : vector<8x96xf32> to vector<8x32xf32>
    %535 = arith.mulf %525, %517 : vector<8x32xf32>
    %536 = arith.addf %534, %535 : vector<8x32xf32>
    %537 = math.tanh %536 : vector<8x32xf32>
    %cst_136 = arith.constant 1.000000e+00 : f32
    %538 = vector.broadcast %cst_136 : f32 to vector<8x32xf32>
    %539 = arith.subf %538, %533 : vector<8x32xf32>
    %540 = arith.mulf %539, %537 : vector<8x32xf32>
    %541 = arith.mulf %533, %473 : vector<8x32xf32>
    %542 = arith.addf %540, %541 : vector<8x32xf32>
    %543 = vector.extract_strided_slice %515 {offsets = [0, 64], sizes = [8, 32], strides = [1, 1]} : vector<8x96xf32> to vector<8x32xf32>
    %544 = arith.addf %543, %19 : vector<8x32xf32>
    %545 = vector.extract_strided_slice %513 {offsets = [0, 0], sizes = [8, 32], strides = [1, 1]} : vector<8x96xf32> to vector<8x32xf32>
    %546 = vector.extract_strided_slice %515 {offsets = [0, 0], sizes = [8, 32], strides = [1, 1]} : vector<8x96xf32> to vector<8x32xf32>
    %547 = arith.addf %545, %546 : vector<8x32xf32>
    %548 = arith.negf %547 : vector<8x32xf32>
    %549 = math.exp %548 : vector<8x32xf32>
    %cst_137 = arith.constant 1.000000e+00 : f32
    %550 = vector.broadcast %cst_137 : f32 to vector<8x32xf32>
    %551 = arith.addf %550, %549 : vector<8x32xf32>
    %552 = arith.divf %550, %551 : vector<8x32xf32>
    %553 = vector.extract_strided_slice %513 {offsets = [0, 32], sizes = [8, 32], strides = [1, 1]} : vector<8x96xf32> to vector<8x32xf32>
    %554 = vector.extract_strided_slice %515 {offsets = [0, 32], sizes = [8, 32], strides = [1, 1]} : vector<8x96xf32> to vector<8x32xf32>
    %555 = arith.addf %553, %554 : vector<8x32xf32>
    %556 = arith.negf %555 : vector<8x32xf32>
    %557 = math.exp %556 : vector<8x32xf32>
    %cst_138 = arith.constant 1.000000e+00 : f32
    %558 = vector.broadcast %cst_138 : f32 to vector<8x32xf32>
    %559 = arith.addf %558, %557 : vector<8x32xf32>
    %560 = arith.divf %558, %559 : vector<8x32xf32>
    %561 = vector.extract_strided_slice %513 {offsets = [0, 64], sizes = [8, 32], strides = [1, 1]} : vector<8x96xf32> to vector<8x32xf32>
    %562 = arith.mulf %552, %544 : vector<8x32xf32>
    %563 = arith.addf %561, %562 : vector<8x32xf32>
    %564 = math.tanh %563 : vector<8x32xf32>
    %cst_139 = arith.constant 1.000000e+00 : f32
    %565 = vector.broadcast %cst_139 : f32 to vector<8x32xf32>
    %566 = arith.subf %565, %560 : vector<8x32xf32>
    %567 = arith.mulf %566, %564 : vector<8x32xf32>
    %568 = arith.mulf %560, %500 : vector<8x32xf32>
    %569 = arith.addf %567, %568 : vector<8x32xf32>
    %570 = arith.index_cast %506 : i32 to index
    %c0_140 = arith.constant 0 : index
    %571 = vector.load %arg22[%570, %c0_140] : memref<64x32xf32, #tpu.memory_space<vmem>>, vector<8x32xf32>
    tpu.vector_store %arg22[%570, %c0_140], %542 {strides = array<i32>} : memref<64x32xf32, #tpu.memory_space<vmem>>, vector<8x32xf32>,
    %572 = arith.index_cast %509 : i32 to index
    %c0_141 = arith.constant 0 : index
    %573 = vector.load %arg23[%572, %c0_141] : memref<64x32xf32, #tpu.memory_space<vmem>>, vector<8x32xf32>
    tpu.vector_store %arg23[%572, %c0_141], %569 {strides = array<i32>} : memref<64x32xf32, #tpu.memory_space<vmem>>, vector<8x32xf32>,
    %c8_i32_142 = arith.constant 8 : i32
    %c0_143 = arith.constant 0 : index
    %c0_144 = arith.constant 0 : index
    %574 = vector.load %arg22[%c0_143, %c0_144] : memref<64x32xf32, #tpu.memory_space<vmem>>, vector<64x32xf32>
    %c0_145 = arith.constant 0 : index
    %c0_146 = arith.constant 0 : index
    %575 = vector.load %arg23[%c0_145, %c0_146] : memref<64x32xf32, #tpu.memory_space<vmem>>, vector<64x32xf32>
    %c0_147 = arith.constant 0 : index
    %c0_148 = arith.constant 0 : index
    %576 = vector.load %arg9[%c0_147, %c0_148] : memref<64x96xf32, #tpu.memory_space<vmem>>, vector<32x96xf32>
    %cst_149 = arith.constant dense<0.000000e+00> : vector<64x96xf32>
    %577 = tpu.matmul %574, %576, %cst_149 {dimension_numbers = #tpu.dot_dimension_numbers<[1], [0], [0], [1], [0, 0, 1, 1], [], []>} : vector<64x32xf32>, vector<32x96xf32>, vector<64x96xf32> -> vector<64x96xf32>
    %c32 = arith.constant 32 : index
    %c0_150 = arith.constant 0 : index
    %578 = vector.load %arg9[%c32, %c0_150] : memref<64x96xf32, #tpu.memory_space<vmem>>, vector<32x96xf32>
    %cst_151 = arith.constant dense<0.000000e+00> : vector<64x96xf32>
    %579 = tpu.matmul %575, %578, %cst_151 {dimension_numbers = #tpu.dot_dimension_numbers<[1], [0], [0], [1], [0, 0, 1, 1], [], []>} : vector<64x32xf32>, vector<32x96xf32>, vector<64x96xf32> -> vector<64x96xf32>
    %580 = arith.addf %577, %579 : vector<64x96xf32>
    %c0_152 = arith.constant 0 : index
    %c0_153 = arith.constant 0 : index
    %581 = vector.load %arg13[%c0_152, %c0_153] : memref<1x96xf32, #tpu.memory_space<vmem>>, vector<1x96xf32>
    %582 = vector.broadcast %581 : vector<1x96xf32> to vector<64x96xf32>
    %583 = arith.addf %580, %582 : vector<64x96xf32>
    %c0_154 = arith.constant 0 : index
    %c0_155 = arith.constant 0 : index
    %584 = vector.load %arg20[%c0_154, %c0_155] : memref<64x96xf32, #tpu.memory_space<vmem>>, vector<64x96xf32>
    tpu.vector_store %arg20[%c0_154, %c0_155], %583 {strides = array<i32>} : memref<64x96xf32, #tpu.memory_space<vmem>>, vector<64x96xf32>,
    %c56 = arith.constant 56 : index
    %c0_156 = arith.constant 0 : index
    %585 = vector.load %arg22[%c56, %c0_156] : memref<64x32xf32, #tpu.memory_space<vmem>>, vector<8x32xf32>
    %c56_157 = arith.constant 56 : index
    %c0_158 = arith.constant 0 : index
    %586 = vector.load %arg23[%c56_157, %c0_158] : memref<64x32xf32, #tpu.memory_space<vmem>>, vector<8x32xf32>
    %c0_159 = arith.constant 0 : index
    %c0_160 = arith.constant 0 : index
    %587 = vector.load %arg10[%c0_159, %c0_160] : memref<64x96xf32, #tpu.memory_space<vmem>>, vector<32x96xf32>
    %cst_161 = arith.constant dense<0.000000e+00> : vector<8x96xf32>
    %588 = tpu.matmul %585, %587, %cst_161 {dimension_numbers = #tpu.dot_dimension_numbers<[1], [0], [0], [1], [0, 0, 1, 1], [], []>} : vector<8x32xf32>, vector<32x96xf32>, vector<8x96xf32> -> vector<8x96xf32>
    %c32_162 = arith.constant 32 : index
    %c0_163 = arith.constant 0 : index
    %589 = vector.load %arg10[%c32_162, %c0_163] : memref<64x96xf32, #tpu.memory_space<vmem>>, vector<32x96xf32>
    %cst_164 = arith.constant dense<0.000000e+00> : vector<8x96xf32>
    %590 = tpu.matmul %586, %589, %cst_164 {dimension_numbers = #tpu.dot_dimension_numbers<[1], [0], [0], [1], [0, 0, 1, 1], [], []>} : vector<8x32xf32>, vector<32x96xf32>, vector<8x96xf32> -> vector<8x96xf32>
    %591 = arith.addf %588, %590 : vector<8x96xf32>
    %c0_165 = arith.constant 0 : index
    %c0_166 = arith.constant 0 : index
    %592 = vector.load %arg14[%c0_165, %c0_166] : memref<1x96xf32, #tpu.memory_space<vmem>>, vector<1x96xf32>
    %593 = vector.broadcast %592 : vector<1x96xf32> to vector<8x96xf32>
    %594 = arith.addf %591, %593 : vector<8x96xf32>
    %c0_167 = arith.constant 0 : index
    %c0_168 = arith.constant 0 : index
    %595 = vector.load %arg15[%c0_167, %c0_168] : memref<1x32xf32, #tpu.memory_space<vmem>>, vector<1x32xf32>
    %596 = vector.shape_cast %595 : vector<1x32xf32> to vector<1x32xf32>
    %597 = vector.broadcast %596 : vector<1x32xf32> to vector<8x32xf32>
    %c0_169 = arith.constant 0 : index
    %c0_170 = arith.constant 0 : index
    %598 = vector.load %arg11[%c0_169, %c0_170] : memref<32x96xf32, #tpu.memory_space<vmem>>, vector<32x96xf32>
    %cst_171 = arith.constant 0.000000e+00 : f32
    %599 = vector.broadcast %cst_171 : f32 to vector<8x32xf32>
    %c0_i32_172 = arith.constant 0 : i32
    %c8_i32_173 = arith.constant 8 : i32
    %600 = arith.muli %c0_i32_172, %c8_i32_173 : i32
    %601 = tpu.assume_multiple %600, 8 : i32
    %602 = arith.index_cast %601 : i32 to index
    %c0_174 = arith.constant 0 : index
    %603 = vector.load %arg20[%602, %c0_174] : memref<64x96xf32, #tpu.memory_space<vmem>>, vector<8x96xf32>
    %cst_175 = arith.constant dense<0.000000e+00> : vector<8x96xf32>
    %604 = tpu.matmul %599, %598, %cst_175 {dimension_numbers = #tpu.dot_dimension_numbers<[1], [0], [0], [1], [0, 0, 1, 1], [], []>} : vector<8x32xf32>, vector<32x96xf32>, vector<8x96xf32> -> vector<8x96xf32>
    %605 = vector.extract_strided_slice %604 {offsets = [0, 64], sizes = [8, 32], strides = [1, 1]} : vector<8x96xf32> to vector<8x32xf32>
    %606 = arith.addf %605, %597 : vector<8x32xf32>
    %607 = vector.extract_strided_slice %603 {offsets = [0, 0], sizes = [8, 32], strides = [1, 1]} : vector<8x96xf32> to vector<8x32xf32>
    %608 = vector.extract_strided_slice %604 {offsets = [0, 0], sizes = [8, 32], strides = [1, 1]} : vector<8x96xf32> to vector<8x32xf32>
    %609 = arith.addf %607, %608 : vector<8x32xf32>
    %610 = arith.negf %609 : vector<8x32xf32>
    %611 = math.exp %610 : vector<8x32xf32>
    %cst_176 = arith.constant 1.000000e+00 : f32
    %612 = vector.broadcast %cst_176 : f32 to vector<8x32xf32>
    %613 = arith.addf %612, %611 : vector<8x32xf32>
    %614 = arith.divf %612, %613 : vector<8x32xf32>
    %615 = vector.extract_strided_slice %603 {offsets = [0, 32], sizes = [8, 32], strides = [1, 1]} : vector<8x96xf32> to vector<8x32xf32>
    %616 = vector.extract_strided_slice %604 {offsets = [0, 32], sizes = [8, 32], strides = [1, 1]} : vector<8x96xf32> to vector<8x32xf32>
    %617 = arith.addf %615, %616 : vector<8x32xf32>
    %618 = arith.negf %617 : vector<8x32xf32>
    %619 = math.exp %618 : vector<8x32xf32>
    %cst_177 = arith.constant 1.000000e+00 : f32
    %620 = vector.broadcast %cst_177 : f32 to vector<8x32xf32>
    %621 = arith.addf %620, %619 : vector<8x32xf32>
    %622 = arith.divf %620, %621 : vector<8x32xf32>
    %623 = vector.extract_strided_slice %603 {offsets = [0, 64], sizes = [8, 32], strides = [1, 1]} : vector<8x96xf32> to vector<8x32xf32>
    %624 = arith.mulf %614, %606 : vector<8x32xf32>
    %625 = arith.addf %623, %624 : vector<8x32xf32>
    %626 = math.tanh %625 : vector<8x32xf32>
    %cst_178 = arith.constant 1.000000e+00 : f32
    %627 = vector.broadcast %cst_178 : f32 to vector<8x32xf32>
    %628 = arith.subf %627, %622 : vector<8x32xf32>
    %629 = arith.mulf %628, %626 : vector<8x32xf32>
    %630 = arith.mulf %622, %599 : vector<8x32xf32>
    %631 = arith.addf %629, %630 : vector<8x32xf32>
    %c1_i32_179 = arith.constant 1 : i32
    %c8_i32_180 = arith.constant 8 : i32
    %632 = arith.muli %c1_i32_179, %c8_i32_180 : i32
    %633 = tpu.assume_multiple %632, 8 : i32
    %634 = arith.index_cast %633 : i32 to index
    %c0_181 = arith.constant 0 : index
    %635 = vector.load %arg20[%634, %c0_181] : memref<64x96xf32, #tpu.memory_space<vmem>>, vector<8x96xf32>
    %cst_182 = arith.constant dense<0.000000e+00> : vector<8x96xf32>
    %636 = tpu.matmul %631, %598, %cst_182 {dimension_numbers = #tpu.dot_dimension_numbers<[1], [0], [0], [1], [0, 0, 1, 1], [], []>} : vector<8x32xf32>, vector<32x96xf32>, vector<8x96xf32> -> vector<8x96xf32>
    %637 = vector.extract_strided_slice %636 {offsets = [0, 64], sizes = [8, 32], strides = [1, 1]} : vector<8x96xf32> to vector<8x32xf32>
    %638 = arith.addf %637, %597 : vector<8x32xf32>
    %639 = vector.extract_strided_slice %635 {offsets = [0, 0], sizes = [8, 32], strides = [1, 1]} : vector<8x96xf32> to vector<8x32xf32>
    %640 = vector.extract_strided_slice %636 {offsets = [0, 0], sizes = [8, 32], strides = [1, 1]} : vector<8x96xf32> to vector<8x32xf32>
    %641 = arith.addf %639, %640 : vector<8x32xf32>
    %642 = arith.negf %641 : vector<8x32xf32>
    %643 = math.exp %642 : vector<8x32xf32>
    %cst_183 = arith.constant 1.000000e+00 : f32
    %644 = vector.broadcast %cst_183 : f32 to vector<8x32xf32>
    %645 = arith.addf %644, %643 : vector<8x32xf32>
    %646 = arith.divf %644, %645 : vector<8x32xf32>
    %647 = vector.extract_strided_slice %635 {offsets = [0, 32], sizes = [8, 32], strides = [1, 1]} : vector<8x96xf32> to vector<8x32xf32>
    %648 = vector.extract_strided_slice %636 {offsets = [0, 32], sizes = [8, 32], strides = [1, 1]} : vector<8x96xf32> to vector<8x32xf32>
    %649 = arith.addf %647, %648 : vector<8x32xf32>
    %650 = arith.negf %649 : vector<8x32xf32>
    %651 = math.exp %650 : vector<8x32xf32>
    %cst_184 = arith.constant 1.000000e+00 : f32
    %652 = vector.broadcast %cst_184 : f32 to vector<8x32xf32>
    %653 = arith.addf %652, %651 : vector<8x32xf32>
    %654 = arith.divf %652, %653 : vector<8x32xf32>
    %655 = vector.extract_strided_slice %635 {offsets = [0, 64], sizes = [8, 32], strides = [1, 1]} : vector<8x96xf32> to vector<8x32xf32>
    %656 = arith.mulf %646, %638 : vector<8x32xf32>
    %657 = arith.addf %655, %656 : vector<8x32xf32>
    %658 = math.tanh %657 : vector<8x32xf32>
    %cst_185 = arith.constant 1.000000e+00 : f32
    %659 = vector.broadcast %cst_185 : f32 to vector<8x32xf32>
    %660 = arith.subf %659, %654 : vector<8x32xf32>
    %661 = arith.mulf %660, %658 : vector<8x32xf32>
    %662 = arith.mulf %654, %631 : vector<8x32xf32>
    %663 = arith.addf %661, %662 : vector<8x32xf32>
    %c2_i32_186 = arith.constant 2 : i32
    %c8_i32_187 = arith.constant 8 : i32
    %664 = arith.muli %c2_i32_186, %c8_i32_187 : i32
    %665 = tpu.assume_multiple %664, 8 : i32
    %666 = arith.index_cast %665 : i32 to index
    %c0_188 = arith.constant 0 : index
    %667 = vector.load %arg20[%666, %c0_188] : memref<64x96xf32, #tpu.memory_space<vmem>>, vector<8x96xf32>
    %cst_189 = arith.constant dense<0.000000e+00> : vector<8x96xf32>
    %668 = tpu.matmul %663, %598, %cst_189 {dimension_numbers = #tpu.dot_dimension_numbers<[1], [0], [0], [1], [0, 0, 1, 1], [], []>} : vector<8x32xf32>, vector<32x96xf32>, vector<8x96xf32> -> vector<8x96xf32>
    %669 = vector.extract_strided_slice %668 {offsets = [0, 64], sizes = [8, 32], strides = [1, 1]} : vector<8x96xf32> to vector<8x32xf32>
    %670 = arith.addf %669, %597 : vector<8x32xf32>
    %671 = vector.extract_strided_slice %667 {offsets = [0, 0], sizes = [8, 32], strides = [1, 1]} : vector<8x96xf32> to vector<8x32xf32>
    %672 = vector.extract_strided_slice %668 {offsets = [0, 0], sizes = [8, 32], strides = [1, 1]} : vector<8x96xf32> to vector<8x32xf32>
    %673 = arith.addf %671, %672 : vector<8x32xf32>
    %674 = arith.negf %673 : vector<8x32xf32>
    %675 = math.exp %674 : vector<8x32xf32>
    %cst_190 = arith.constant 1.000000e+00 : f32
    %676 = vector.broadcast %cst_190 : f32 to vector<8x32xf32>
    %677 = arith.addf %676, %675 : vector<8x32xf32>
    %678 = arith.divf %676, %677 : vector<8x32xf32>
    %679 = vector.extract_strided_slice %667 {offsets = [0, 32], sizes = [8, 32], strides = [1, 1]} : vector<8x96xf32> to vector<8x32xf32>
    %680 = vector.extract_strided_slice %668 {offsets = [0, 32], sizes = [8, 32], strides = [1, 1]} : vector<8x96xf32> to vector<8x32xf32>
    %681 = arith.addf %679, %680 : vector<8x32xf32>
    %682 = arith.negf %681 : vector<8x32xf32>
    %683 = math.exp %682 : vector<8x32xf32>
    %cst_191 = arith.constant 1.000000e+00 : f32
    %684 = vector.broadcast %cst_191 : f32 to vector<8x32xf32>
    %685 = arith.addf %684, %683 : vector<8x32xf32>
    %686 = arith.divf %684, %685 : vector<8x32xf32>
    %687 = vector.extract_strided_slice %667 {offsets = [0, 64], sizes = [8, 32], strides = [1, 1]} : vector<8x96xf32> to vector<8x32xf32>
    %688 = arith.mulf %678, %670 : vector<8x32xf32>
    %689 = arith.addf %687, %688 : vector<8x32xf32>
    %690 = math.tanh %689 : vector<8x32xf32>
    %cst_192 = arith.constant 1.000000e+00 : f32
    %691 = vector.broadcast %cst_192 : f32 to vector<8x32xf32>
    %692 = arith.subf %691, %686 : vector<8x32xf32>
    %693 = arith.mulf %692, %690 : vector<8x32xf32>
    %694 = arith.mulf %686, %663 : vector<8x32xf32>
    %695 = arith.addf %693, %694 : vector<8x32xf32>
    %c3_i32_193 = arith.constant 3 : i32
    %c8_i32_194 = arith.constant 8 : i32
    %696 = arith.muli %c3_i32_193, %c8_i32_194 : i32
    %697 = tpu.assume_multiple %696, 8 : i32
    %698 = arith.index_cast %697 : i32 to index
    %c0_195 = arith.constant 0 : index
    %699 = vector.load %arg20[%698, %c0_195] : memref<64x96xf32, #tpu.memory_space<vmem>>, vector<8x96xf32>
    %cst_196 = arith.constant dense<0.000000e+00> : vector<8x96xf32>
    %700 = tpu.matmul %695, %598, %cst_196 {dimension_numbers = #tpu.dot_dimension_numbers<[1], [0], [0], [1], [0, 0, 1, 1], [], []>} : vector<8x32xf32>, vector<32x96xf32>, vector<8x96xf32> -> vector<8x96xf32>
    %701 = vector.extract_strided_slice %700 {offsets = [0, 64], sizes = [8, 32], strides = [1, 1]} : vector<8x96xf32> to vector<8x32xf32>
    %702 = arith.addf %701, %597 : vector<8x32xf32>
    %703 = vector.extract_strided_slice %699 {offsets = [0, 0], sizes = [8, 32], strides = [1, 1]} : vector<8x96xf32> to vector<8x32xf32>
    %704 = vector.extract_strided_slice %700 {offsets = [0, 0], sizes = [8, 32], strides = [1, 1]} : vector<8x96xf32> to vector<8x32xf32>
    %705 = arith.addf %703, %704 : vector<8x32xf32>
    %706 = arith.negf %705 : vector<8x32xf32>
    %707 = math.exp %706 : vector<8x32xf32>
    %cst_197 = arith.constant 1.000000e+00 : f32
    %708 = vector.broadcast %cst_197 : f32 to vector<8x32xf32>
    %709 = arith.addf %708, %707 : vector<8x32xf32>
    %710 = arith.divf %708, %709 : vector<8x32xf32>
    %711 = vector.extract_strided_slice %699 {offsets = [0, 32], sizes = [8, 32], strides = [1, 1]} : vector<8x96xf32> to vector<8x32xf32>
    %712 = vector.extract_strided_slice %700 {offsets = [0, 32], sizes = [8, 32], strides = [1, 1]} : vector<8x96xf32> to vector<8x32xf32>
    %713 = arith.addf %711, %712 : vector<8x32xf32>
    %714 = arith.negf %713 : vector<8x32xf32>
    %715 = math.exp %714 : vector<8x32xf32>
    %cst_198 = arith.constant 1.000000e+00 : f32
    %716 = vector.broadcast %cst_198 : f32 to vector<8x32xf32>
    %717 = arith.addf %716, %715 : vector<8x32xf32>
    %718 = arith.divf %716, %717 : vector<8x32xf32>
    %719 = vector.extract_strided_slice %699 {offsets = [0, 64], sizes = [8, 32], strides = [1, 1]} : vector<8x96xf32> to vector<8x32xf32>
    %720 = arith.mulf %710, %702 : vector<8x32xf32>
    %721 = arith.addf %719, %720 : vector<8x32xf32>
    %722 = math.tanh %721 : vector<8x32xf32>
    %cst_199 = arith.constant 1.000000e+00 : f32
    %723 = vector.broadcast %cst_199 : f32 to vector<8x32xf32>
    %724 = arith.subf %723, %718 : vector<8x32xf32>
    %725 = arith.mulf %724, %722 : vector<8x32xf32>
    %726 = arith.mulf %718, %695 : vector<8x32xf32>
    %727 = arith.addf %725, %726 : vector<8x32xf32>
    %c4_i32_200 = arith.constant 4 : i32
    %c8_i32_201 = arith.constant 8 : i32
    %728 = arith.muli %c4_i32_200, %c8_i32_201 : i32
    %729 = tpu.assume_multiple %728, 8 : i32
    %730 = arith.index_cast %729 : i32 to index
    %c0_202 = arith.constant 0 : index
    %731 = vector.load %arg20[%730, %c0_202] : memref<64x96xf32, #tpu.memory_space<vmem>>, vector<8x96xf32>
    %cst_203 = arith.constant dense<0.000000e+00> : vector<8x96xf32>
    %732 = tpu.matmul %727, %598, %cst_203 {dimension_numbers = #tpu.dot_dimension_numbers<[1], [0], [0], [1], [0, 0, 1, 1], [], []>} : vector<8x32xf32>, vector<32x96xf32>, vector<8x96xf32> -> vector<8x96xf32>
    %733 = vector.extract_strided_slice %732 {offsets = [0, 64], sizes = [8, 32], strides = [1, 1]} : vector<8x96xf32> to vector<8x32xf32>
    %734 = arith.addf %733, %597 : vector<8x32xf32>
    %735 = vector.extract_strided_slice %731 {offsets = [0, 0], sizes = [8, 32], strides = [1, 1]} : vector<8x96xf32> to vector<8x32xf32>
    %736 = vector.extract_strided_slice %732 {offsets = [0, 0], sizes = [8, 32], strides = [1, 1]} : vector<8x96xf32> to vector<8x32xf32>
    %737 = arith.addf %735, %736 : vector<8x32xf32>
    %738 = arith.negf %737 : vector<8x32xf32>
    %739 = math.exp %738 : vector<8x32xf32>
    %cst_204 = arith.constant 1.000000e+00 : f32
    %740 = vector.broadcast %cst_204 : f32 to vector<8x32xf32>
    %741 = arith.addf %740, %739 : vector<8x32xf32>
    %742 = arith.divf %740, %741 : vector<8x32xf32>
    %743 = vector.extract_strided_slice %731 {offsets = [0, 32], sizes = [8, 32], strides = [1, 1]} : vector<8x96xf32> to vector<8x32xf32>
    %744 = vector.extract_strided_slice %732 {offsets = [0, 32], sizes = [8, 32], strides = [1, 1]} : vector<8x96xf32> to vector<8x32xf32>
    %745 = arith.addf %743, %744 : vector<8x32xf32>
    %746 = arith.negf %745 : vector<8x32xf32>
    %747 = math.exp %746 : vector<8x32xf32>
    %cst_205 = arith.constant 1.000000e+00 : f32
    %748 = vector.broadcast %cst_205 : f32 to vector<8x32xf32>
    %749 = arith.addf %748, %747 : vector<8x32xf32>
    %750 = arith.divf %748, %749 : vector<8x32xf32>
    %751 = vector.extract_strided_slice %731 {offsets = [0, 64], sizes = [8, 32], strides = [1, 1]} : vector<8x96xf32> to vector<8x32xf32>
    %752 = arith.mulf %742, %734 : vector<8x32xf32>
    %753 = arith.addf %751, %752 : vector<8x32xf32>
    %754 = math.tanh %753 : vector<8x32xf32>
    %cst_206 = arith.constant 1.000000e+00 : f32
    %755 = vector.broadcast %cst_206 : f32 to vector<8x32xf32>
    %756 = arith.subf %755, %750 : vector<8x32xf32>
    %757 = arith.mulf %756, %754 : vector<8x32xf32>
    %758 = arith.mulf %750, %727 : vector<8x32xf32>
    %759 = arith.addf %757, %758 : vector<8x32xf32>
    %c5_i32_207 = arith.constant 5 : i32
    %c8_i32_208 = arith.constant 8 : i32
    %760 = arith.muli %c5_i32_207, %c8_i32_208 : i32
    %761 = tpu.assume_multiple %760, 8 : i32
    %762 = arith.index_cast %761 : i32 to index
    %c0_209 = arith.constant 0 : index
    %763 = vector.load %arg20[%762, %c0_209] : memref<64x96xf32, #tpu.memory_space<vmem>>, vector<8x96xf32>
    %cst_210 = arith.constant dense<0.000000e+00> : vector<8x96xf32>
    %764 = tpu.matmul %759, %598, %cst_210 {dimension_numbers = #tpu.dot_dimension_numbers<[1], [0], [0], [1], [0, 0, 1, 1], [], []>} : vector<8x32xf32>, vector<32x96xf32>, vector<8x96xf32> -> vector<8x96xf32>
    %765 = vector.extract_strided_slice %764 {offsets = [0, 64], sizes = [8, 32], strides = [1, 1]} : vector<8x96xf32> to vector<8x32xf32>
    %766 = arith.addf %765, %597 : vector<8x32xf32>
    %767 = vector.extract_strided_slice %763 {offsets = [0, 0], sizes = [8, 32], strides = [1, 1]} : vector<8x96xf32> to vector<8x32xf32>
    %768 = vector.extract_strided_slice %764 {offsets = [0, 0], sizes = [8, 32], strides = [1, 1]} : vector<8x96xf32> to vector<8x32xf32>
    %769 = arith.addf %767, %768 : vector<8x32xf32>
    %770 = arith.negf %769 : vector<8x32xf32>
    %771 = math.exp %770 : vector<8x32xf32>
    %cst_211 = arith.constant 1.000000e+00 : f32
    %772 = vector.broadcast %cst_211 : f32 to vector<8x32xf32>
    %773 = arith.addf %772, %771 : vector<8x32xf32>
    %774 = arith.divf %772, %773 : vector<8x32xf32>
    %775 = vector.extract_strided_slice %763 {offsets = [0, 32], sizes = [8, 32], strides = [1, 1]} : vector<8x96xf32> to vector<8x32xf32>
    %776 = vector.extract_strided_slice %764 {offsets = [0, 32], sizes = [8, 32], strides = [1, 1]} : vector<8x96xf32> to vector<8x32xf32>
    %777 = arith.addf %775, %776 : vector<8x32xf32>
    %778 = arith.negf %777 : vector<8x32xf32>
    %779 = math.exp %778 : vector<8x32xf32>
    %cst_212 = arith.constant 1.000000e+00 : f32
    %780 = vector.broadcast %cst_212 : f32 to vector<8x32xf32>
    %781 = arith.addf %780, %779 : vector<8x32xf32>
    %782 = arith.divf %780, %781 : vector<8x32xf32>
    %783 = vector.extract_strided_slice %763 {offsets = [0, 64], sizes = [8, 32], strides = [1, 1]} : vector<8x96xf32> to vector<8x32xf32>
    %784 = arith.mulf %774, %766 : vector<8x32xf32>
    %785 = arith.addf %783, %784 : vector<8x32xf32>
    %786 = math.tanh %785 : vector<8x32xf32>
    %cst_213 = arith.constant 1.000000e+00 : f32
    %787 = vector.broadcast %cst_213 : f32 to vector<8x32xf32>
    %788 = arith.subf %787, %782 : vector<8x32xf32>
    %789 = arith.mulf %788, %786 : vector<8x32xf32>
    %790 = arith.mulf %782, %759 : vector<8x32xf32>
    %791 = arith.addf %789, %790 : vector<8x32xf32>
    %c6_i32_214 = arith.constant 6 : i32
    %c8_i32_215 = arith.constant 8 : i32
    %792 = arith.muli %c6_i32_214, %c8_i32_215 : i32
    %793 = tpu.assume_multiple %792, 8 : i32
    %794 = arith.index_cast %793 : i32 to index
    %c0_216 = arith.constant 0 : index
    %795 = vector.load %arg20[%794, %c0_216] : memref<64x96xf32, #tpu.memory_space<vmem>>, vector<8x96xf32>
    %cst_217 = arith.constant dense<0.000000e+00> : vector<8x96xf32>
    %796 = tpu.matmul %791, %598, %cst_217 {dimension_numbers = #tpu.dot_dimension_numbers<[1], [0], [0], [1], [0, 0, 1, 1], [], []>} : vector<8x32xf32>, vector<32x96xf32>, vector<8x96xf32> -> vector<8x96xf32>
    %797 = vector.extract_strided_slice %796 {offsets = [0, 64], sizes = [8, 32], strides = [1, 1]} : vector<8x96xf32> to vector<8x32xf32>
    %798 = arith.addf %797, %597 : vector<8x32xf32>
    %799 = vector.extract_strided_slice %795 {offsets = [0, 0], sizes = [8, 32], strides = [1, 1]} : vector<8x96xf32> to vector<8x32xf32>
    %800 = vector.extract_strided_slice %796 {offsets = [0, 0], sizes = [8, 32], strides = [1, 1]} : vector<8x96xf32> to vector<8x32xf32>
    %801 = arith.addf %799, %800 : vector<8x32xf32>
    %802 = arith.negf %801 : vector<8x32xf32>
    %803 = math.exp %802 : vector<8x32xf32>
    %cst_218 = arith.constant 1.000000e+00 : f32
    %804 = vector.broadcast %cst_218 : f32 to vector<8x32xf32>
    %805 = arith.addf %804, %803 : vector<8x32xf32>
    %806 = arith.divf %804, %805 : vector<8x32xf32>
    %807 = vector.extract_strided_slice %795 {offsets = [0, 32], sizes = [8, 32], strides = [1, 1]} : vector<8x96xf32> to vector<8x32xf32>
    %808 = vector.extract_strided_slice %796 {offsets = [0, 32], sizes = [8, 32], strides = [1, 1]} : vector<8x96xf32> to vector<8x32xf32>
    %809 = arith.addf %807, %808 : vector<8x32xf32>
    %810 = arith.negf %809 : vector<8x32xf32>
    %811 = math.exp %810 : vector<8x32xf32>
    %cst_219 = arith.constant 1.000000e+00 : f32
    %812 = vector.broadcast %cst_219 : f32 to vector<8x32xf32>
    %813 = arith.addf %812, %811 : vector<8x32xf32>
    %814 = arith.divf %812, %813 : vector<8x32xf32>
    %815 = vector.extract_strided_slice %795 {offsets = [0, 64], sizes = [8, 32], strides = [1, 1]} : vector<8x96xf32> to vector<8x32xf32>
    %816 = arith.mulf %806, %798 : vector<8x32xf32>
    %817 = arith.addf %815, %816 : vector<8x32xf32>
    %818 = math.tanh %817 : vector<8x32xf32>
    %cst_220 = arith.constant 1.000000e+00 : f32
    %819 = vector.broadcast %cst_220 : f32 to vector<8x32xf32>
    %820 = arith.subf %819, %814 : vector<8x32xf32>
    %821 = arith.mulf %820, %818 : vector<8x32xf32>
    %822 = arith.mulf %814, %791 : vector<8x32xf32>
    %823 = arith.addf %821, %822 : vector<8x32xf32>
    %c7_i32_221 = arith.constant 7 : i32
    %c8_i32_222 = arith.constant 8 : i32
    %824 = arith.muli %c7_i32_221, %c8_i32_222 : i32
    %825 = tpu.assume_multiple %824, 8 : i32
    %826 = arith.index_cast %825 : i32 to index
    %c0_223 = arith.constant 0 : index
    %827 = vector.load %arg20[%826, %c0_223] : memref<64x96xf32, #tpu.memory_space<vmem>>, vector<8x96xf32>
    %cst_224 = arith.constant dense<0.000000e+00> : vector<8x96xf32>
    %828 = tpu.matmul %823, %598, %cst_224 {dimension_numbers = #tpu.dot_dimension_numbers<[1], [0], [0], [1], [0, 0, 1, 1], [], []>} : vector<8x32xf32>, vector<32x96xf32>, vector<8x96xf32> -> vector<8x96xf32>
    %829 = vector.extract_strided_slice %828 {offsets = [0, 64], sizes = [8, 32], strides = [1, 1]} : vector<8x96xf32> to vector<8x32xf32>
    %830 = arith.addf %829, %597 : vector<8x32xf32>
    %831 = vector.extract_strided_slice %827 {offsets = [0, 0], sizes = [8, 32], strides = [1, 1]} : vector<8x96xf32> to vector<8x32xf32>
    %832 = vector.extract_strided_slice %828 {offsets = [0, 0], sizes = [8, 32], strides = [1, 1]} : vector<8x96xf32> to vector<8x32xf32>
    %833 = arith.addf %831, %832 : vector<8x32xf32>
    %834 = arith.negf %833 : vector<8x32xf32>
    %835 = math.exp %834 : vector<8x32xf32>
    %cst_225 = arith.constant 1.000000e+00 : f32
    %836 = vector.broadcast %cst_225 : f32 to vector<8x32xf32>
    %837 = arith.addf %836, %835 : vector<8x32xf32>
    %838 = arith.divf %836, %837 : vector<8x32xf32>
    %839 = vector.extract_strided_slice %827 {offsets = [0, 32], sizes = [8, 32], strides = [1, 1]} : vector<8x96xf32> to vector<8x32xf32>
    %840 = vector.extract_strided_slice %828 {offsets = [0, 32], sizes = [8, 32], strides = [1, 1]} : vector<8x96xf32> to vector<8x32xf32>
    %841 = arith.addf %839, %840 : vector<8x32xf32>
    %842 = arith.negf %841 : vector<8x32xf32>
    %843 = math.exp %842 : vector<8x32xf32>
    %cst_226 = arith.constant 1.000000e+00 : f32
    %844 = vector.broadcast %cst_226 : f32 to vector<8x32xf32>
    %845 = arith.addf %844, %843 : vector<8x32xf32>
    %846 = arith.divf %844, %845 : vector<8x32xf32>
    %847 = vector.extract_strided_slice %827 {offsets = [0, 64], sizes = [8, 32], strides = [1, 1]} : vector<8x96xf32> to vector<8x32xf32>
    %848 = arith.mulf %838, %830 : vector<8x32xf32>
    %849 = arith.addf %847, %848 : vector<8x32xf32>
    %850 = math.tanh %849 : vector<8x32xf32>
    %cst_227 = arith.constant 1.000000e+00 : f32
    %851 = vector.broadcast %cst_227 : f32 to vector<8x32xf32>
    %852 = arith.subf %851, %846 : vector<8x32xf32>
    %853 = arith.mulf %852, %850 : vector<8x32xf32>
    %854 = arith.mulf %846, %823 : vector<8x32xf32>
    %855 = arith.addf %853, %854 : vector<8x32xf32>
    %c8_i32_228 = arith.constant 8 : i32
    %856 = vector.extract_strided_slice %594 {offsets = [0, 0], sizes = [8, 32], strides = [1, 1]} : vector<8x96xf32> to vector<8x32xf32>
    %857 = arith.negf %856 : vector<8x32xf32>
    %858 = math.exp %857 : vector<8x32xf32>
    %cst_229 = arith.constant 1.000000e+00 : f32
    %859 = vector.broadcast %cst_229 : f32 to vector<8x32xf32>
    %860 = arith.addf %859, %858 : vector<8x32xf32>
    %861 = arith.divf %859, %860 : vector<8x32xf32>
    %862 = vector.extract_strided_slice %594 {offsets = [0, 32], sizes = [8, 32], strides = [1, 1]} : vector<8x96xf32> to vector<8x32xf32>
    %863 = arith.negf %862 : vector<8x32xf32>
    %864 = math.exp %863 : vector<8x32xf32>
    %cst_230 = arith.constant 1.000000e+00 : f32
    %865 = vector.broadcast %cst_230 : f32 to vector<8x32xf32>
    %866 = arith.addf %865, %864 : vector<8x32xf32>
    %867 = arith.divf %865, %866 : vector<8x32xf32>
    %868 = vector.extract_strided_slice %594 {offsets = [0, 64], sizes = [8, 32], strides = [1, 1]} : vector<8x96xf32> to vector<8x32xf32>
    %c0_231 = arith.constant 0 : index
    %c0_232 = arith.constant 0 : index
    %869 = vector.load %arg16[%c0_231, %c0_232] : memref<1x32xf32, #tpu.memory_space<vmem>>, vector<1x32xf32>
    %870 = vector.shape_cast %869 : vector<1x32xf32> to vector<1x32xf32>
    %871 = vector.broadcast %870 : vector<1x32xf32> to vector<8x32xf32>
    %872 = arith.mulf %861, %871 : vector<8x32xf32>
    %873 = arith.addf %868, %872 : vector<8x32xf32>
    %874 = math.tanh %873 : vector<8x32xf32>
    %cst_233 = arith.constant 1.000000e+00 : f32
    %875 = vector.broadcast %cst_233 : f32 to vector<8x32xf32>
    %876 = arith.subf %875, %867 : vector<8x32xf32>
    %877 = arith.mulf %876, %874 : vector<8x32xf32>
    %c0_234 = arith.constant 0 : index
    %c0_235 = arith.constant 0 : index
    %878 = vector.load %arg0[%c0_234, %c0_235] : memref<64x16xf32, #tpu.memory_space<vmem>>, vector<8x16xf32>
    %c0_236 = arith.constant 0 : index
    %c0_237 = arith.constant 0 : index
    %879 = vector.load %arg17[%c0_236, %c0_237] : memref<64x16xf32, #tpu.memory_space<vmem>>, vector<32x16xf32>
    %cst_238 = arith.constant dense<0.000000e+00> : vector<8x16xf32>
    %880 = tpu.matmul %855, %879, %cst_238 {dimension_numbers = #tpu.dot_dimension_numbers<[1], [0], [0], [1], [0, 0, 1, 1], [], []>} : vector<8x32xf32>, vector<32x16xf32>, vector<8x16xf32> -> vector<8x16xf32>
    %881 = arith.addf %878, %880 : vector<8x16xf32>
    %c32_239 = arith.constant 32 : index
    %c0_240 = arith.constant 0 : index
    %882 = vector.load %arg17[%c32_239, %c0_240] : memref<64x16xf32, #tpu.memory_space<vmem>>, vector<32x16xf32>
    %cst_241 = arith.constant dense<0.000000e+00> : vector<8x16xf32>
    %883 = tpu.matmul %877, %882, %cst_241 {dimension_numbers = #tpu.dot_dimension_numbers<[1], [0], [0], [1], [0, 0, 1, 1], [], []>} : vector<8x32xf32>, vector<32x16xf32>, vector<8x16xf32> -> vector<8x16xf32>
    %884 = arith.addf %881, %883 : vector<8x16xf32>
    %c0_242 = arith.constant 0 : index
    %c0_243 = arith.constant 0 : index
    %885 = vector.load %arg18[%c0_242, %c0_243] : memref<1x16xf32, #tpu.memory_space<vmem>>, vector<1x16xf32>
    %886 = vector.broadcast %885 : vector<1x16xf32> to vector<8x16xf32>
    %887 = arith.addf %884, %886 : vector<8x16xf32>
    %c0_244 = arith.constant 0 : index
    %c0_245 = arith.constant 0 : index
    %888 = vector.load %arg19[%c0_244, %c0_245] : memref<8x16xf32, #tpu.memory_space<vmem>>, vector<8x16xf32>
    tpu.vector_store %arg19[%c0_244, %c0_245], %887 {strides = array<i32>} : memref<8x16xf32, #tpu.memory_space<vmem>>, vector<8x16xf32>,
    return
  }
}

</mosaic_0001>

<bundles_post_ra>
// kernel: hai_forward.1
= control target key start
LH: loop header
LB: loop body
LE: loop exit
PB: predicated region body
PF: predicated region fallthrough
CT: control target
= control target key end

     0   :  { %s3595_s0 = inlined_call_operand.vmem [shape: f32[64,16], index: 0, kind: input, shape index: {}]   ;;  %s3596_s1 = inlined_call_operand.hbm [shape: f32[16,96], index: 1, kind: input, shape index: {}]   ;;  %s3597_s2 = inlined_call_operand.hbm [shape: f32[16,96], index: 2, kind: input, shape index: {}]   ;;  %s3598_s3 = inlined_call_operand.hbm [shape: f32[32,96], index: 3, kind: input, shape index: {}]   ;;  %s3599_s4 = inlined_call_operand.hbm [shape: f32[32,96], index: 4, kind: input, shape index: {}]   ;;  %s3600_s5 = inlined_call_operand.hbm [shape: f32[1,96], index: 5, kind: input, shape index: {}]   ;;  %s3601_s6 = inlined_call_operand.hbm [shape: f32[1,96], index: 6, kind: input, shape index: {}]   ;;  %s3602_s7 = inlined_call_operand.hbm [shape: f32[1,32], index: 7, kind: input, shape index: {}]   ;;  %s3603_s8 = inlined_call_operand.hbm [shape: f32[1,32], index: 8, kind: input, shape index: {}]   ;;  %s3604_s9 = inlined_call_operand.vmem [shape: f32[64,96], index: 9, kind: input, shape index: {}]   ;;  %s3605_s10 = inlined_call_operand.vmem [shape: f32[64,96], index: 10, kind: input, shape index: {}]   ;;  %s3606_s11 = inlined_call_operand.hbm [shape: f32[32,96], index: 11, kind: input, shape index: {}]   ;;  %s3607_s12 = inlined_call_operand.vmem [shape: f32[32,96], index: 12, kind: input, shape index: {}]   ;;  %s3608_s13 = inlined_call_operand.vmem [shape: f32[1,96], index: 13, kind: input, shape index: {}]   ;;  %s3609_s14 = inlined_call_operand.vmem [shape: f32[1,96], index: 14, kind: input, shape index: {}]   ;;  %s3610_s15 = inlined_call_operand.vmem [shape: f32[1,32], index: 15, kind: input, shape index: {}]   ;;  %s3611_s16 = inlined_call_operand.vmem [shape: f32[1,32], index: 16, kind: input, shape index: {}]   ;;  %s3612_s17 = inlined_call_operand.vmem [shape: f32[64,16], index: 17, kind: input, shape index: {}]   ;;  %s3613_s18 = inlined_call_operand.vmem [shape: f32[1,16], index: 18, kind: input, shape index: {}]   ;;  %s3614_s19 = inlined_call_operand.vmem [shape: f32[8,16], index: 19, kind: output, shape index: {}]  }
   0x1   :  { %3616 = sst [smem:[#allocation25_spill]] %s3595_s0 }
   0x2   :  { %3617 = sst [smem:[#allocation26_spill]] %s3596_s1 }
   0x3   :  { %3618 = sst [smem:[#allocation27_spill]] %s3597_s2 }
   0x4   :  { %3619 = sst [smem:[#allocation28_spill]] %s3598_s3 }
   0x5   :  { %24 = vsyncpa [#allocation7], 0 }
   0x6   :  { %25 = vsyncpa [#allocation9], 0 }
   0x7   :  { %26 = vsyncpa [#allocation12], 0 }
   0x8   :  { %27 = vsyncpa [#allocation15], 0 }
   0x9   :  { %28 = vsyncpa [#allocation18], 0  ;;  %s3620_s30 = sld [smem:[#allocation27_spill]]  ;;  %s2844_s21 = smov [#allocation8]  }
   0xa   :  { %s50_s1 = sshll.u32 %s2844_s21, 4  ;;  %s74_s23 = sshll.u32 %s3599_s4, 4  ;;  %s51_s1 = int_to_ptr.vmem [resolvable:$true] %s50_s1  ;;  %s75_s23 = int_to_ptr.hbm [resolvable:$true] %s74_s23 }
   0xb   :  { %s2845_s24 = smov 128   ;;  %s2846_s25 = smov 8  }
   0xc   :  { %s2847_s3 = smov [#allocation11]   ;;  %s99_s12 = sshll.u32 %s3601_s6, 4  ;;  %s100_s12 = int_to_ptr.hbm [resolvable:$true] %s99_s12 }
   0xd   :  { %s76_s26 = sshll.u32 %s2847_s3, 4  ;;  %s121_s0 = sshll.u32 %s3603_s8, 4  ;;  %s77_s26 = int_to_ptr.vmem [resolvable:$true] %s76_s26  ;;  %s122_s0 = int_to_ptr.hbm [resolvable:$true] %s121_s0 }
   0xe   :  { %82 = dma.hbm_to_vmem [thread:$0]  %s75_s23, 512, %s77_s26, [#allocation12], %s2845_s24, %s2845_s24, %s2846_s25  }
   0xf   :  { %s48_s20 = sshll.u32 %s3620_s30, 4  ;;  %s2848_s30 = smov [#allocation14]   ;;  %s49_s20 = int_to_ptr.hbm [resolvable:$true] %s48_s20 }
  0x10   :  { %56 = dma.hbm_to_vmem [thread:$0]  %s49_s20, 256, %s51_s1, [#allocation9], %s2845_s24, %s2845_s24, %s2846_s25  }
  0x11   :  { %s101_s21 = sshll.u32 %s2848_s30, 4  ;;  %s2849_s20 = smov [#allocation17]   ;;  %s102_s21 = int_to_ptr.vmem [resolvable:$true] %s101_s21 }
  0x12   :  { %104 = dma.hbm_to_vmem [thread:$0]  %s100_s12, 16, %s102_s21, [#allocation15]  }
  0x13   :  { %s123_s1 = sshll.u32 %s2849_s20, 4  ;;  %s3621_s6 = sld [smem:[#allocation26_spill]]  ;;  %s124_s1 = int_to_ptr.vmem [resolvable:$true] %s123_s1 }
  0x14   :  { %126 = dma.hbm_to_vmem [thread:$0]  %s122_s0, 16, %s124_s1, [#allocation18]  }
  0x15   :  { %s3622_s26 = sld [smem:[#allocation28_spill]]  ;;  %s2850_s4 = smov [#allocation6]  }
  0x16   :  { %s37_s8 = sshll.u32 %s2850_s4, 4  ;;  %s2851_s12 = smov [#allocation10]   ;;  %s38_s8 = int_to_ptr.vmem [resolvable:$true] %s37_s8 }
  0x17   :  { %s63_s29 = sshll.u32 %s2851_s12, 4  ;;  %s88_s20 = sshll.u32 %s3600_s5, 4  ;;  %s64_s29 = int_to_ptr.vmem [resolvable:$true] %s63_s29  ;;  %s89_s20 = int_to_ptr.hbm [resolvable:$true] %s88_s20 }
  0x18   :  { %s110_s22 = sshll.u32 %s3602_s7, 4  ;;  %s2852_s2 = smov [#allocation13]   ;;  %s111_s22 = int_to_ptr.hbm [resolvable:$true] %s110_s22 }
  0x19   :  { %s35_s3 = sshll.u32 %s3621_s6, 4  ;;  %s90_s6 = sshll.u32 %s2852_s2, 4  ;;  %s36_s3 = int_to_ptr.hbm [resolvable:$true] %s35_s3  ;;  %s91_s6 = int_to_ptr.vmem [resolvable:$true] %s90_s6 }
  0x1a   :  { %43 = dma.hbm_to_vmem [thread:$0]  %s36_s3, 256, %s38_s8, [#allocation7], %s2845_s24, %s2845_s24, %s2846_s25  }
  0x1b   :  { %s61_s28 = sshll.u32 %s3622_s26, 4  ;;  %s2853_s3 = smov [#allocation16]   ;;  %s62_s28 = int_to_ptr.hbm [resolvable:$true] %s61_s28 }
  0x1c   :  { %69 = dma.hbm_to_vmem [thread:$0]  %s62_s28, 512, %s64_s29, [#allocation9], %s2845_s24, %s2845_s24, %s2846_s25  }
  0x1d   :  { %93 = dma.hbm_to_vmem [thread:$0]  %s89_s20, 16, %s91_s6, [#allocation12]  }
  0x1e   :  { %s112_s27 = sshll.u32 %s2853_s3, 4  ;;  %s135_s5 = sshll.u32 %s3606_s11, 4  ;;  %s113_s27 = int_to_ptr.vmem [resolvable:$true] %s112_s27  ;;  %s136_s5 = int_to_ptr.hbm [resolvable:$true] %s135_s5 }
  0x1f   :  { %115 = dma.hbm_to_vmem [thread:$0]  %s111_s22, 16, %s113_s27, [#allocation15]  }
  0x20   :  { %s2854_s4 = smov [#allocation19]  }
  0x21   :  { %s137_s28 = sshll.u32 %s2854_s4, 4  ;;  %s138_s28 = int_to_ptr.vmem [resolvable:$true] %s137_s28 }
  0x22   :  { %143 = dma.hbm_to_vmem [thread:$0]  %s136_s5, 512, %s138_s28, [#allocation18], %s2845_s24, %s2845_s24, %s2846_s25  }
  0x23   :  { %2834 = dma.done.wait [#allocation7], 256  }
  0x24   :  { %2835 = vsyncadd [#allocation7], 4294967040 }
  0x25   :  { %2836 = dma.done.wait [#allocation9], 768  }
  0x26   :  { %2837 = vsyncadd [#allocation9], 4294966528 }
  0x27   :  { %2838 = dma.done.wait [#allocation12], 528  }
  0x28   :  { %2839 = vsyncadd [#allocation12], 4294966768 }
  0x29   :  { %2840 = dma.done.wait [#allocation15], 32  }
  0x2a   :  { %2841 = vsyncadd [#allocation15], 4294967264 }
  0x2b   :  { %2842 = dma.done.wait [#allocation18], 528  }
  0x2c   :  { %2843 = vsyncadd [#allocation18], 4294966768  ;;  %v284_v0 = vld [vmem:[#allocation8 + $0x8] sm:$0xff]  ;;  %v283_v2 = vld [vmem:[#allocation8] sm:$0xff]  ;;  %s3623_s24 = sld [smem:[#allocation25_spill]]  ;;  %vm208_vm0 = vcmask 130048  }
  0x2d   :  { %v3000_v1 = vld [vmem:[#allocation11 + $0x18] sm:$0xff]  ;;  %303 = vmatpush.msra.mxu1 %v284_v0  ;;  %v3003_v3 = vld [vmem:[#allocation11 + $0x10] sm:$0xff]  ;;  %v3010_v5 = vld [vmem:[#allocation11 + $0x8] sm:$0xff]  ;;  %s2855_s25 = smov 64   ;;  %v2856_v8 = vmov 0.0   ;;  %vm274_vm1 = vcmask 785408  }
  0x2e   :  { %391 = vmatpush.msra.mxu3 %v3000_v1  ;;  %v2450_v6 = vld [vmem:[#allocation17] ss:$0 sm:$0xff]  ;;  %v2451_v16 = vld [vmem:[#allocation14] ss:$0 sm:$0xff]  ;;  %v3091_v53 = vld [vmem:[#allocation10 + $0x18] sm:$0xff]  ;;  %s2857_s26 = smov 96  }
  0x2f   :  { %304 = vmatpush.msra.mxu1 %v283_v2  ;;  %v3015_v7 = vld [vmem:[#allocation11] sm:$0xff]  ;;  %442 = vrot.lane.b32.xlu0 %v2450_v6, %s2855_s25  ;;  %v3093_v54 = vld [vmem:[#allocation10 + $0x10] sm:$0xff]  ;;  %v203_v55 = vld [vmem:[#allocation6 + $0x8] sm:$0xff]  ;;  %vm355_vm6 = vcmask 261120  }
  0x30   :  { %392 = vmatpush.msra.mxu3 %v3003_v3  ;;  %371 = vmatpush.msra.mxu2 %v3091_v53  ;;  %v202_v56 = vld [vmem:[#allocation6] sm:$0xff]  ;;  %v3096_v57 = vld [vmem:[#allocation10 + $0x8] sm:$0xff] }
  0x31   :  { %247 = vmatpush.msra.mxu0 %v203_v55  ;;  %v3099_v58 = vld [vmem:[#allocation10] sm:$0xff] }
  0x32   :  { %v3008_v4 = vld [vmem:[%s3623_s24] sm:$0xff]  ;;  %393 = vmatpush.msra.mxu3 %v3010_v5  ;;  %v3024_v9 = vld [vmem:[%s3623_s24 + $0x8] sm:$0xff]  ;;  %v3036_v10 = vld [vmem:[%s3623_s24 + $0x10] sm:$0xff]  ;;  %372 = vmatpush.msra.mxu2 %v3093_v54 }
  0x33   :  { %2362 = vmatmul.msk.f32.vlgmr.msra.gmra.mxu1 %vm208_vm0, %v3008_v4  ;;  %v3046_v11 = vld [vmem:[%s3623_s24 + $0x18] sm:$0xff]  ;;  %v3053_v12 = vld [vmem:[%s3623_s24 + $0x20] sm:$0xff]  ;;  %v3060_v13 = vld [vmem:[%s3623_s24 + $0x28] sm:$0xff]  ;;  %248 = vmatpush.msra.mxu0 %v202_v56 }
  0x34   :  { %394 = vmatpush.msra.mxu3 %v3015_v7  ;;  %v3067_v14 = vld [vmem:[%s3623_s24 + $0x30] sm:$0xff]  ;;  %v3074_v15 = vld [vmem:[%s3623_s24 + $0x38] sm:$0xff]  ;;  %373 = vmatpush.msra.mxu2 %v3096_v57  ;;  %v2452_v6 = vld [vmem:[#allocation16] ss:$0 sm:$0xff] }
  0x35   :  { %395 = vmatmul.f32.vlgmr.msra.gmra.mxu3 %v2856_v8  ;;  %2354 = vmatmul.msk.f32.vlgmr.msra.gmra.mxu0 %vm208_vm0, %v3008_v4 }
  0x36   :  { %536 = vmatpush.msrb.mxu3 %v3000_v1  ;;  %374 = vmatpush.msra.mxu2 %v3099_v58 }
  0x37   :  { %375 = vmatmul.f32.vlgmr.msra.gmra.mxu2 %v2856_v8 }
  0x38   :  { %537 = vmatpush.msrb.mxu3 %v3003_v3  ;;  %514 = vmatpush.msrb.mxu2 %v3091_v53 }
  0x3a   :  { %538 = vmatpush.msrb.mxu3 %v3010_v5  ;;  %515 = vmatpush.msrb.mxu2 %v3093_v54 }
  0x3b   :  { %2363 = vmatmul.msk.f32.gmra.mxu1 %vm208_vm0, %v3024_v9 }
  0x3c   :  { %539 = vmatpush.msrb.mxu3 %v3015_v7  ;;  %516 = vmatpush.msrb.mxu2 %v3096_v57 }
  0x3d   :  { %2355 = vmatmul.msk.f32.gmra.mxu0 %vm208_vm0, %v3024_v9  ;;  %v3134_v9 = vld [vmem:[#allocation13] ss:$0 sm:$0xff] }
  0x3e   :  { %676 = vmatpush.msra.mxu3 %v3000_v1  ;;  %517 = vmatpush.msrb.mxu2 %v3099_v58 }
  0x40   :  { %677 = vmatpush.msra.mxu3 %v3003_v3  ;;  %654 = vmatpush.msra.mxu2 %v3091_v53 }
  0x42   :  { %678 = vmatpush.msra.mxu3 %v3010_v5  ;;  %655 = vmatpush.msra.mxu2 %v3093_v54 }
  0x43   :  { %2364 = vmatmul.msk.f32.gmra.mxu1 %vm208_vm0, %v3036_v10 }
  0x44   :  { %679 = vmatpush.msra.mxu3 %v3015_v7  ;;  %656 = vmatpush.msra.mxu2 %v3096_v57 }
  0x45   :  { %2356 = vmatmul.msk.f32.gmra.mxu0 %vm208_vm0, %v3036_v10 }
  0x46   :  { %657 = vmatpush.msra.mxu2 %v3099_v58 }
  0x4b   :  { %2365 = vmatmul.msk.f32.gmra.mxu1 %vm208_vm0, %v3046_v11 }
  0x4d   :  { %2357 = vmatmul.msk.f32.gmra.mxu0 %vm208_vm0, %v3046_v11 }
  0x53   :  { %2366 = vmatmul.msk.f32.gmra.mxu1 %vm208_vm0, %v3053_v12 }
  0x55   :  { %2358 = vmatmul.msk.f32.gmra.mxu0 %vm208_vm0, %v3053_v12 }
  0x5b   :  { %2367 = vmatmul.msk.f32.gmra.mxu1 %vm208_vm0, %v3060_v13 }
  0x5d   :  { %2359 = vmatmul.msk.f32.gmra.mxu0 %vm208_vm0, %v3060_v13 }
  0x63   :  { %2368 = vmatmul.msk.f32.gmra.mxu1 %vm208_vm0, %v3067_v14 }
  0x65   :  { %2360 = vmatmul.msk.f32.gmra.mxu0 %vm208_vm0, %v3067_v14 }
  0x6b   :  { %2369 = vmatmul.msk.f32.gmra.mxu1 %vm208_vm0, %v3074_v15 }
  0x6d   :  { %2361 = vmatmul.msk.f32.gmra.mxu0 %vm208_vm0, %v3074_v15 }
  0xa1   :  { %v3079_v20 = vpop.permute.xlu0 %442 }
  0xb0   :  { %v306_v17 = vpop.f32.mrf.mxu1 }
  0xb1   :  { %v307_v18 = vadd.f32 %v2451_v16, %v306_v17 }
  0xb2   :  { %v250_v10 = vpop.f32.mrf.mxu0 }
  0xb3   :  { %330 = vst.msk [vmem:[#allocation3] sm:$0xff] %vm274_vm1, %v307_v18  ;;  %v251_v11 = vadd.f32 %v3134_v9, %v250_v10 }
  0xb5   :  { %275 = vst.msk [vmem:[#allocation2] sm:$0xff] %vm274_vm1, %v251_v11  ;;  %v1493_v11 = vld [vmem:[%s3604_s9 + $0x18] sm:$0xff] }
  0xb6   :  { %1599 = vmatpush.msrb.mxu1 %v1493_v11 }
  0xb8   :  { %v309_v19 = vpop.f32.mrf.mxu1  ;;  %v396_v22 = vpop.f32.mrf.mxu3 }
  0xb9   :  { %v310_v21 = vadd.f32 %v2451_v16, %v309_v19  ;;  %v445_v23 = vadd.f32 %v3079_v20, %v396_v22 }
  0xba   :  { %v376_v13 = vpop.f32.mrf.mxu2 }
  0xbb   :  { %331 = vst.msk [vmem:[#allocation3 + $0x8] sm:$0xff] %vm274_vm1, %v310_v21  ;;  %467 = vrot.lane.b32.xlu0 %v445_v23, %s2855_s25 }
  0xc0   :  { %v312_v24 = vpop.f32.mrf.mxu1 }
  0xc1   :  { %v313_v25 = vadd.f32 %v2451_v16, %v312_v24 }
  0xc3   :  { %332 = vst.msk [vmem:[#allocation3 + $0x10] sm:$0xff] %vm274_vm1, %v313_v25 }
  0xc8   :  { %v315_v26 = vpop.f32.mrf.mxu1 }
  0xc9   :  { %v316_v27 = vadd.f32 %v2451_v16, %v315_v26 }
  0xcb   :  { %333 = vst.msk [vmem:[#allocation3 + $0x18] sm:$0xff] %vm274_vm1, %v316_v27 }
  0xd0   :  { %v318_v28 = vpop.f32.mrf.mxu1 }
  0xd1   :  { %v319_v29 = vadd.f32 %v2451_v16, %v318_v28 }
  0xd3   :  { %334 = vst.msk [vmem:[#allocation3 + $0x20] sm:$0xff] %vm274_vm1, %v319_v29 }
  0xd8   :  { %v321_v30 = vpop.f32.mrf.mxu1 }
  0xd9   :  { %v322_v31 = vadd.f32 %v2451_v16, %v321_v30 }
  0xdb   :  { %335 = vst.msk [vmem:[#allocation3 + $0x28] sm:$0xff] %vm274_vm1, %v322_v31 }
  0xe0   :  { %v324_v32 = vpop.f32.mrf.mxu1 }
  0xe1   :  { %v325_v33 = vadd.f32 %v2451_v16, %v324_v32 }
  0xe3   :  { %336 = vst.msk [vmem:[#allocation3 + $0x30] sm:$0xff] %vm274_vm1, %v325_v33 }
  0xe8   :  { %v327_v34 = vpop.f32.mrf.mxu1 }
  0xe9   :  { %v328_v35 = vadd.f32 %v2451_v16, %v327_v34  ;;  %v352_v16 = vld [vmem:[#allocation2] sm:$0xff] }
  0xea   :  { %v403_v17 = vadd.f32 %v376_v13, %v352_v16 }
  0xeb   :  { %337 = vst.msk [vmem:[#allocation3 + $0x38] sm:$0xff] %vm274_vm1, %v328_v35 }
  0xec   :  { %v2370_v18 = vmul.f32 -1.442695, %v403_v17 }
  0xf2   :  { %v354_v36 = vld [vmem:[#allocation3 + $0x38] sm:$0xff] }
  0xf3   :  { %v446_v37 = vadd.f32 %v396_v22, %v354_v36 }
  0xf5   :  { %v2371_v38 = vmul.f32 -1.442695, %v446_v37 }
  0xf7   :  { %2459 = vpow2.f32 %v2371_v38 }
  0xfd   :  { %v2460_v39 = vpop.eup %2459 }
  0xfe   :  { %v450_v40 = vadd.f32 1.0, %v2460_v39 }
 0x100   :  { %2461 = vrcp.f32 %v450_v40  ;;  %v462_v46 = vand.u32 2147483648, %v450_v40  ;;  %vm456_vm3 = vweird.f32 %v450_v40  ;;  %v460_v47 = vand.u32 2147483647, %v450_v40 }
 0x102   :  { %v463_v49 = vor.u32 1.1754944e-38, %v462_v46  ;;  %vm461_vm5 = vcmp.eq.f32.partialorder %v460_v47, 8.507059e+37 }
 0x106   :  { %v2462_v41 = vpop.eup %2461 }
 0x107   :  { %v452_v42 = vmul.f32 %v2462_v41, %v450_v40  ;;  %vm457_vm2 = vweird.f32 %v2462_v41 }
 0x108   :  { %vm458_vm4 = vmor %vm456_vm3, %vm457_vm2 }
 0x109   :  { %v453_v43 = vsub.f32 1.0, %v452_v42 }
 0x10b   :  { %v454_v44 = vmul.f32 %v2462_v41, %v453_v43 }
 0x10d   :  { %v455_v45 = vadd.f32 %v2462_v41, %v454_v44 }
 0x10f   :  { %v459_v48 = vsel %vm458_vm4, %v2462_v41, %v455_v45 }
 0x110   :  { %v464_v51 = vsel %vm461_vm5, %v463_v49, %v459_v48 }
 0x111   :  { %v477_v62 = vsub.f32 1.0, %v464_v51  ;;  %v483_v2 = vmul.f32 0.0, %v464_v51 }
 0x12d   :  { %v468_v50 = vpop.permute.xlu0 %467 }
 0x12e   :  { %v470_v52 = vmul.f32 %v468_v50, %v464_v51 }
 0x130   :  { %472 = vrot.lane.b32.xlu1 %v470_v52, %s2855_s25 }
 0x1a2   :  { %v473_v59 = vpop.permute.xlu1 %472 }
 0x1a3   :  { %v475_v60 = vadd.f32 %v473_v59, %v354_v36  ;;  %v499_v36 = vld [vmem:[#allocation3 + $0x30] sm:$0xff] }
 0x1a5   :  { %2463 = vtanh.f32 %v475_v60 }
 0x1a6   :  { %2465 = vpow2.f32 %v2370_v18 }
 0x1ab   :  { %v2464_v61 = vpop.eup %2463 }
 0x1ac   :  { %479 = vrot.lane.b32.xlu1 %v2464_v61, %s2857_s26  ;;  %v2466_v19 = vpop.eup %2465 }
 0x1ad   :  { %v407_v21 = vadd.f32 1.0, %v2466_v19 }
 0x1af   :  { %2467 = vrcp.f32 %v407_v21  ;;  %vm413_vm7 = vweird.f32 %v407_v21  ;;  %v419_v26 = vand.u32 2147483648, %v407_v21  ;;  %v417_v28 = vand.u32 2147483647, %v407_v21 }
 0x1b1   :  { %v420_v29 = vor.u32 1.1754944e-38, %v419_v26  ;;  %vm418_vm10 = vcmp.eq.f32.partialorder %v417_v28, 8.507059e+37 }
 0x1b5   :  { %v2468_v22 = vpop.eup %2467 }
 0x1b6   :  { %v409_v23 = vmul.f32 %v2468_v22, %v407_v21  ;;  %vm414_vm8 = vweird.f32 %v2468_v22 }
 0x1b7   :  { %vm415_vm9 = vmor %vm413_vm7, %vm414_vm8 }
 0x1b8   :  { %v410_v24 = vsub.f32 1.0, %v409_v23 }
 0x1ba   :  { %v411_v25 = vmul.f32 %v2468_v22, %v410_v24 }
 0x1bc   :  { %v412_v27 = vadd.f32 %v2468_v22, %v411_v25 }
 0x1be   :  { %v416_v30 = vsel %vm415_vm9, %v2468_v22, %v412_v27 }
 0x1bf   :  { %v421_v32 = vsel %vm418_vm10, %v420_v29, %v416_v30 }
 0x1c0   :  { %v434_v60 = vsub.f32 1.0, %v421_v32 }
 0x21e   :  { %v480_v63 = vpop.permute.xlu1 %479 }
 0x21f   :  { %v482_v0 = vmul.f32 %v480_v63, %v477_v62  ;;  %v440_v62 = vmul.f32 0.0, %v421_v32 }
 0x221   :  { %v3129_v4 = vadd.f32 %v483_v2, %v482_v0 }
 0x223   :  { %491 = vrot.lane.b32.xlu2 %v3129_v4, %s2857_s26 }
 0x22b   :  { %399 = vrot.lane.b32.xlu2 %v2452_v6, %s2855_s25 }
 0x27d   :  { %v492_v12 = vpop.permute.xlu2 %491 }
 0x27e   :  { %495 = vst.msk [vmem:[#allocation5 + $0x38] sm:$0xff] %vm355_vm6, %v492_v12  ;;  %2373 = vmatmul.msk.f32.vlgmr.msrb.gmra.mxu3 %vm355_vm6, %v492_v12  ;;  %v1492_v12 = vld [vmem:[%s3604_s9 + $0x10] sm:$0xff] }
 0x27f   :  { %816 = vmatpush.msrb.mxu3 %v3000_v1  ;;  %1600 = vmatpush.msrb.mxu1 %v1492_v12 }
 0x281   :  { %817 = vmatpush.msrb.mxu3 %v3003_v3 }
 0x283   :  { %818 = vmatpush.msrb.mxu3 %v3010_v5 }
 0x285   :  { %v3143_v14 = vpop.permute.xlu2 %399  ;;  %819 = vmatpush.msrb.mxu3 %v3015_v7 }
 0x286   :  { %v402_v15 = vadd.f32 %v3143_v14, %v376_v13  ;;  %v1491_v13 = vld [vmem:[%s3604_s9 + $0x8] sm:$0xff] }
 0x287   :  { %1601 = vmatpush.msrb.mxu1 %v1491_v13 }
 0x288   :  { %424 = vrot.lane.b32.xlu0 %v402_v15, %s2855_s25  ;;  %v1490_v15 = vld [vmem:[%s3604_s9] sm:$0xff] }
 0x289   :  { %1602 = vmatpush.msrb.mxu1 %v1490_v15 }
 0x2fa   :  { %v425_v31 = vpop.permute.xlu0 %424 }
 0x2fb   :  { %v427_v33 = vmul.f32 %v425_v31, %v421_v32 }
 0x2fd   :  { %429 = vrot.lane.b32.xlu2 %v427_v33, %s2855_s25 }
 0x301   :  { %v541_v34 = vpop.f32.mrf.mxu3 }
 0x302   :  { %v584_v35 = vadd.f32 %v541_v34, %v3079_v20  ;;  %v585_v37 = vadd.f32 %v541_v34, %v499_v36 }
 0x304   :  { %606 = vrot.lane.b32.xlu1 %v584_v35, %s2855_s25  ;;  %v2375_v38 = vmul.f32 -1.442695, %v585_v37 }
 0x306   :  { %2469 = vpow2.f32 %v2375_v38 }
 0x30c   :  { %v2470_v39 = vpop.eup %2469 }
 0x30d   :  { %v589_v40 = vadd.f32 1.0, %v2470_v39 }
 0x30f   :  { %2471 = vrcp.f32 %v589_v40  ;;  %v601_v49 = vand.u32 2147483648, %v589_v40  ;;  %vm595_vm12 = vweird.f32 %v589_v40  ;;  %v599_v50 = vand.u32 2147483647, %v589_v40 }
 0x311   :  { %v602_v52 = vor.u32 1.1754944e-38, %v601_v49  ;;  %vm600_vm14 = vcmp.eq.f32.partialorder %v599_v50, 8.507059e+37 }
 0x315   :  { %v2472_v43 = vpop.eup %2471 }
 0x316   :  { %v591_v45 = vmul.f32 %v2472_v43, %v589_v40  ;;  %vm596_vm11 = vweird.f32 %v2472_v43 }
 0x317   :  { %vm597_vm13 = vmor %vm595_vm12, %vm596_vm11 }
 0x318   :  { %v592_v46 = vsub.f32 1.0, %v591_v45 }
 0x31a   :  { %v593_v47 = vmul.f32 %v2472_v43, %v592_v46 }
 0x31c   :  { %v594_v48 = vadd.f32 %v2472_v43, %v593_v47  ;;  %v639_v47 = vld [vmem:[#allocation3 + $0x28] sm:$0xff] }
 0x31e   :  { %v598_v51 = vsel %vm597_vm13, %v2472_v43, %v594_v48 }
 0x31f   :  { %v603_v56 = vsel %vm600_vm14, %v602_v52, %v598_v51 }
 0x320   :  { %v616_v19 = vsub.f32 1.0, %v603_v56  ;;  %v622_v22 = vmul.f32 %v603_v56, %v3129_v4 }
 0x357   :  { %v430_v41 = vpop.permute.xlu2 %429 }
 0x358   :  { %v432_v42 = vadd.f32 %v430_v41, %v352_v16  ;;  %v253_v16 = vpop.f32.mrf.mxu0 }
 0x359   :  { %v254_v17 = vadd.f32 %v3134_v9, %v253_v16 }
 0x35a   :  { %2473 = vtanh.f32 %v432_v42 }
 0x35b   :  { %276 = vst.msk [vmem:[#allocation2 + $0x8] sm:$0xff] %vm274_vm1, %v254_v17 }
 0x360   :  { %v2474_v44 = vpop.eup %2473 }
 0x361   :  { %436 = vrot.lane.b32.xlu1 %v2474_v44, %s2857_s26 }
 0x362   :  { %v497_v28 = vld [vmem:[#allocation2 + $0x8] sm:$0xff] }
 0x376   :  { %v607_v55 = vpop.permute.xlu1 %606 }
 0x377   :  { %v609_v59 = vmul.f32 %v607_v55, %v603_v56 }
 0x379   :  { %611 = vrot.lane.b32.xlu0 %v609_v59, %s2855_s25 }
 0x3d3   :  { %v437_v61 = vpop.permute.xlu1 %436 }
 0x3d4   :  { %v439_v63 = vmul.f32 %v437_v61, %v434_v60 }
 0x3d6   :  { %v3153_v0 = vadd.f32 %v440_v62, %v439_v63 }
 0x3d8   :  { %486 = vrot.lane.b32.xlu0 %v3153_v0, %s2857_s26 }
 0x3eb   :  { %v612_v2 = vpop.permute.xlu0 %611 }
 0x3ec   :  { %v614_v6 = vadd.f32 %v612_v2, %v499_v36 }
 0x3ee   :  { %2475 = vtanh.f32 %v614_v6 }
 0x3f4   :  { %v2476_v10 = vpop.eup %2475 }
 0x3f5   :  { %618 = vrot.lane.b32.xlu2 %v2476_v10, %s2857_s26 }
 0x44a   :  { %v487_v18 = vpop.permute.xlu0 %486 }
 0x44b   :  { %489 = vst.msk [vmem:[#allocation4] sm:$0xff] %vm355_vm6, %v487_v18  ;;  %2372 = vmatmul.msk.f32.vlgmr.msrb.gmra.mxu2 %vm355_vm6, %v487_v18 }
 0x44c   :  { %794 = vmatpush.msrb.mxu2 %v3091_v53 }
 0x44e   :  { %795 = vmatpush.msrb.mxu2 %v3093_v54 }
 0x44f   :  { %v619_v21 = vpop.permute.xlu2 %618 }
 0x450   :  { %v621_v23 = vmul.f32 %v619_v21, %v616_v19  ;;  %796 = vmatpush.msrb.mxu2 %v3096_v57 }
 0x452   :  { %v3178_v24 = vadd.f32 %v622_v22, %v621_v23  ;;  %v1474_v25 = vld [vmem:[#allocation4] sm:$0xff]  ;;  %797 = vmatpush.msrb.mxu2 %v3099_v58 }
 0x453   :  { %2408 = vmatmul.msk.f32.vlgmr.msrb.gmra.mxu1 %vm355_vm6, %v1474_v25 }
 0x454   :  { %631 = vrot.lane.b32.xlu1 %v3178_v24, %s2857_s26 }
 0x4c6   :  { %v632_v26 = vpop.permute.xlu1 %631 }
 0x4c7   :  { %635 = vst.msk [vmem:[#allocation5 + $0x30] sm:$0xff] %vm355_vm6, %v632_v26  ;;  %2377 = vmatmul.msk.f32.vlgmr.msra.gmra.mxu3 %vm355_vm6, %v632_v26 }
 0x4c8   :  { %956 = vmatpush.msra.mxu3 %v3000_v1 }
 0x4ca   :  { %957 = vmatpush.msra.mxu3 %v3003_v3 }
 0x4cc   :  { %958 = vmatpush.msra.mxu3 %v3010_v5 }
 0x4ce   :  { %v519_v4 = vpop.f32.mrf.mxu2  ;;  %959 = vmatpush.msra.mxu3 %v3015_v7 }
 0x4cf   :  { %v544_v27 = vadd.f32 %v519_v4, %v3143_v14  ;;  %v545_v29 = vadd.f32 %v519_v4, %v497_v28  ;;  %v256_v4 = vpop.f32.mrf.mxu0 }
 0x4d1   :  { %566 = vrot.lane.b32.xlu2 %v544_v27, %s2855_s25  ;;  %v2374_v30 = vmul.f32 -1.442695, %v545_v29 }
 0x4d3   :  { %2477 = vpow2.f32 %v2374_v30 }
 0x4d9   :  { %v2478_v31 = vpop.eup %2477 }
 0x4da   :  { %v549_v32 = vadd.f32 1.0, %v2478_v31 }
 0x4dc   :  { %2479 = vrcp.f32 %v549_v32  ;;  %v561_v38 = vand.u32 2147483648, %v549_v32  ;;  %vm555_vm2 = vweird.f32 %v549_v32  ;;  %v559_v39 = vand.u32 2147483647, %v549_v32 }
 0x4de   :  { %v562_v41 = vor.u32 1.1754944e-38, %v561_v38  ;;  %vm560_vm4 = vcmp.eq.f32.partialorder %v559_v39, 8.507059e+37 }
 0x4e2   :  { %v2480_v33 = vpop.eup %2479 }
 0x4e3   :  { %v551_v34 = vmul.f32 %v2480_v33, %v549_v32  ;;  %vm556_vm15 = vweird.f32 %v2480_v33 }
 0x4e4   :  { %vm557_vm3 = vmor %vm555_vm2, %vm556_vm15 }
 0x4e5   :  { %v552_v35 = vsub.f32 1.0, %v551_v34 }
 0x4e7   :  { %v553_v36 = vmul.f32 %v2480_v33, %v552_v35 }
 0x4e9   :  { %v554_v37 = vadd.f32 %v2480_v33, %v553_v36 }
 0x4eb   :  { %v558_v40 = vsel %vm557_vm3, %v2480_v33, %v554_v37 }
 0x4ec   :  { %v563_v42 = vsel %vm560_vm4, %v562_v41, %v558_v40 }
 0x4ed   :  { %v576_v16 = vsub.f32 1.0, %v563_v42  ;;  %v582_v19 = vmul.f32 %v563_v42, %v3153_v0  ;;  %v257_v0 = vadd.f32 %v3134_v9, %v256_v4 }
 0x4ef   :  { %277 = vst.msk [vmem:[#allocation2 + $0x10] sm:$0xff] %vm274_vm1, %v257_v0 }
 0x52b   :  { %v567_v43 = vpop.permute.xlu2 %566 }
 0x52c   :  { %v569_v44 = vmul.f32 %v567_v43, %v563_v42 }
 0x52e   :  { %571 = vrot.lane.b32.xlu1 %v569_v44, %s2855_s25 }
 0x54a   :  { %v681_v45 = vpop.f32.mrf.mxu3 }
 0x54b   :  { %v724_v46 = vadd.f32 %v681_v45, %v3079_v20  ;;  %v725_v48 = vadd.f32 %v681_v45, %v639_v47 }
 0x54d   :  { %746 = vrot.lane.b32.xlu0 %v724_v46, %s2855_s25  ;;  %v2379_v49 = vmul.f32 -1.442695, %v725_v48 }
 0x54f   :  { %2481 = vpow2.f32 %v2379_v49 }
 0x555   :  { %v2482_v50 = vpop.eup %2481 }
 0x556   :  { %v729_v51 = vadd.f32 1.0, %v2482_v50 }
 0x558   :  { %2483 = vrcp.f32 %v729_v51  ;;  %v741_v2 = vand.u32 2147483648, %v729_v51  ;;  %vm735_vm7 = vweird.f32 %v729_v51  ;;  %v739_v6 = vand.u32 2147483647, %v729_v51 }
 0x55a   :  { %v742_v11 = vor.u32 1.1754944e-38, %v741_v2  ;;  %vm740_vm9 = vcmp.eq.f32.partialorder %v739_v6, 8.507059e+37 }
 0x55e   :  { %v2484_v56 = vpop.eup %2483 }
 0x55f   :  { %v731_v60 = vmul.f32 %v2484_v56, %v729_v51  ;;  %vm736_vm5 = vweird.f32 %v2484_v56 }
 0x560   :  { %vm737_vm8 = vmor %vm735_vm7, %vm736_vm5 }
 0x561   :  { %v732_v61 = vsub.f32 1.0, %v731_v60 }
 0x563   :  { %v733_v62 = vmul.f32 %v2484_v56, %v732_v61 }
 0x565   :  { %v734_v63 = vadd.f32 %v2484_v56, %v733_v62 }
 0x567   :  { %v738_v10 = vsel %vm737_vm8, %v2484_v56, %v734_v63  ;;  %v779_v56 = vld [vmem:[#allocation3 + $0x20] sm:$0xff] }
 0x568   :  { %v743_v12 = vsel %vm740_vm9, %v742_v11, %v738_v10 }
 0x569   :  { %v762_v30 = vmul.f32 %v743_v12, %v3178_v24  ;;  %v637_v24 = vld [vmem:[#allocation2 + $0x10] sm:$0xff] }
 0x5a0   :  { %v572_v52 = vpop.permute.xlu1 %571 }
 0x5a1   :  { %v574_v55 = vadd.f32 %v572_v52, %v497_v28  ;;  %v756_v28 = vsub.f32 1.0, %v743_v12 }
 0x5a3   :  { %2485 = vtanh.f32 %v574_v55 }
 0x5a9   :  { %v2486_v59 = vpop.eup %2485 }
 0x5aa   :  { %578 = vrot.lane.b32.xlu0 %v2486_v59, %s2857_s26 }
 0x5bf   :  { %v747_v13 = vpop.permute.xlu0 %746 }
 0x5c0   :  { %v749_v15 = vmul.f32 %v747_v13, %v743_v12 }
 0x5c2   :  { %751 = vrot.lane.b32.xlu2 %v749_v15, %s2855_s25 }
 0x61c   :  { %v579_v17 = vpop.permute.xlu0 %578  ;;  %v752_v18 = vpop.permute.xlu2 %751 }
 0x61d   :  { %v581_v21 = vmul.f32 %v579_v17, %v576_v16  ;;  %v754_v22 = vadd.f32 %v752_v18, %v639_v47 }
 0x61f   :  { %v3198_v23 = vadd.f32 %v582_v19, %v581_v21  ;;  %2487 = vtanh.f32 %v754_v22 }
 0x621   :  { %625 = vrot.lane.b32.xlu2 %v3198_v23, %s2857_s26 }
 0x625   :  { %v2488_v25 = vpop.eup %2487 }
 0x626   :  { %758 = vrot.lane.b32.xlu1 %v2488_v25, %s2857_s26 }
 0x67b   :  { %v626_v26 = vpop.permute.xlu2 %625 }
 0x67c   :  { %629 = vst.msk [vmem:[#allocation4 + $0x8] sm:$0xff] %vm355_vm6, %v626_v26  ;;  %2376 = vmatmul.msk.f32.vlgmr.msra.gmra.mxu2 %vm355_vm6, %v626_v26 }
 0x67d   :  { %934 = vmatpush.msra.mxu2 %v3091_v53 }
 0x67f   :  { %935 = vmatpush.msra.mxu2 %v3093_v54 }
 0x681   :  { %936 = vmatpush.msra.mxu2 %v3096_v57 }
 0x683   :  { %v1475_v27 = vld [vmem:[#allocation4 + $0x8] sm:$0xff]  ;;  %937 = vmatpush.msra.mxu2 %v3099_v58 }
 0x684   :  { %2409 = vmatmul.msk.f32.gmra.mxu1 %vm355_vm6, %v1475_v27 }
 0x698   :  { %v759_v29 = vpop.permute.xlu1 %758 }
 0x699   :  { %v761_v31 = vmul.f32 %v759_v29, %v756_v28 }
 0x69b   :  { %v3213_v32 = vadd.f32 %v762_v30, %v761_v31 }
 0x69d   :  { %771 = vrot.lane.b32.xlu0 %v3213_v32, %s2857_s26 }
 0x6ff   :  { %v659_v33 = vpop.f32.mrf.mxu2 }
 0x700   :  { %v684_v34 = vadd.f32 %v659_v33, %v3143_v14  ;;  %v685_v36 = vadd.f32 %v659_v33, %v637_v24 }
 0x702   :  { %706 = vrot.lane.b32.xlu1 %v684_v34, %s2855_s25  ;;  %v2378_v37 = vmul.f32 -1.442695, %v685_v36  ;;  %v259_v34 = vpop.f32.mrf.mxu0 }
 0x704   :  { %2489 = vpow2.f32 %v2378_v37 }
 0x70a   :  { %v2490_v38 = vpop.eup %2489 }
 0x70b   :  { %v689_v39 = vadd.f32 1.0, %v2490_v38 }
 0x70d   :  { %2491 = vrcp.f32 %v689_v39  ;;  %v701_v45 = vand.u32 2147483648, %v689_v39  ;;  %vm695_vm11 = vweird.f32 %v689_v39  ;;  %v699_v46 = vand.u32 2147483647, %v689_v39 }
 0x70f   :  { %v772_v35 = vpop.permute.xlu0 %771  ;;  %v702_v48 = vor.u32 1.1754944e-38, %v701_v45  ;;  %vm700_vm13 = vcmp.eq.f32.partialorder %v699_v46, 8.507059e+37 }
 0x710   :  { %775 = vst.msk [vmem:[#allocation5 + $0x28] sm:$0xff] %vm355_vm6, %v772_v35  ;;  %2381 = vmatmul.msk.f32.vlgmr.msrb.gmra.mxu3 %vm355_vm6, %v772_v35 }
 0x711   :  { %1096 = vmatpush.msrb.mxu3 %v3000_v1 }
 0x713   :  { %1097 = vmatpush.msrb.mxu3 %v3003_v3  ;;  %v2492_v40 = vpop.eup %2491 }
 0x714   :  { %v691_v41 = vmul.f32 %v2492_v40, %v689_v39  ;;  %vm696_vm10 = vweird.f32 %v2492_v40 }
 0x715   :  { %1098 = vmatpush.msrb.mxu3 %v3010_v5  ;;  %vm697_vm12 = vmor %vm695_vm11, %vm696_vm10 }
 0x716   :  { %v692_v42 = vsub.f32 1.0, %v691_v41 }
 0x717   :  { %1099 = vmatpush.msrb.mxu3 %v3015_v7 }
 0x718   :  { %v693_v43 = vmul.f32 %v2492_v40, %v692_v42 }
 0x71a   :  { %v694_v44 = vadd.f32 %v2492_v40, %v693_v43 }
 0x71c   :  { %v698_v47 = vsel %vm697_vm12, %v2492_v40, %v694_v44 }
 0x71d   :  { %v703_v49 = vsel %vm700_vm13, %v702_v48, %v698_v47 }
 0x71e   :  { %v716_v26 = vsub.f32 1.0, %v703_v49  ;;  %v722_v0 = vmul.f32 %v703_v49, %v3198_v23  ;;  %v260_v23 = vadd.f32 %v3134_v9, %v259_v34 }
 0x720   :  { %278 = vst.msk [vmem:[#allocation2 + $0x18] sm:$0xff] %vm274_vm1, %v260_v23 }
 0x727   :  { %v777_v42 = vld [vmem:[#allocation2 + $0x18] sm:$0xff] }
 0x774   :  { %v707_v50 = vpop.permute.xlu1 %706 }
 0x775   :  { %v709_v51 = vmul.f32 %v707_v50, %v703_v49 }
 0x777   :  { %711 = vrot.lane.b32.xlu0 %v709_v51, %s2855_s25 }
 0x793   :  { %v821_v52 = vpop.f32.mrf.mxu3 }
 0x794   :  { %v864_v55 = vadd.f32 %v821_v52, %v3079_v20  ;;  %v865_v59 = vadd.f32 %v821_v52, %v779_v56 }
 0x796   :  { %886 = vrot.lane.b32.xlu2 %v864_v55, %s2855_s25  ;;  %v2383_v60 = vmul.f32 -1.442695, %v865_v59 }
 0x798   :  { %2493 = vpow2.f32 %v2383_v60 }
 0x79e   :  { %v2494_v61 = vpop.eup %2493 }
 0x79f   :  { %v869_v62 = vadd.f32 1.0, %v2494_v61  ;;  %v919_v61 = vld [vmem:[#allocation3 + $0x18] sm:$0xff] }
 0x7a1   :  { %2495 = vrcp.f32 %v869_v62  ;;  %v881_v15 = vand.u32 2147483648, %v869_v62  ;;  %vm875_vm15 = vweird.f32 %v869_v62  ;;  %v879_v16 = vand.u32 2147483647, %v869_v62 }
 0x7a3   :  { %v882_v18 = vor.u32 1.1754944e-38, %v881_v15  ;;  %vm880_vm3 = vcmp.eq.f32.partialorder %v879_v16, 8.507059e+37 }
 0x7a7   :  { %v2496_v63 = vpop.eup %2495 }
 0x7a8   :  { %v871_v2 = vmul.f32 %v2496_v63, %v869_v62  ;;  %vm876_vm14 = vweird.f32 %v2496_v63 }
 0x7a9   :  { %vm877_vm2 = vmor %vm875_vm15, %vm876_vm14 }
 0x7aa   :  { %v872_v6 = vsub.f32 1.0, %v871_v2 }
 0x7ac   :  { %v873_v10 = vmul.f32 %v2496_v63, %v872_v6 }
 0x7ae   :  { %v874_v12 = vadd.f32 %v2496_v63, %v873_v10 }
 0x7b0   :  { %v878_v17 = vsel %vm877_vm2, %v2496_v63, %v874_v12 }
 0x7b1   :  { %v883_v19 = vsel %vm880_vm3, %v882_v18, %v878_v17 }
 0x7b2   :  { %v902_v37 = vmul.f32 %v883_v19, %v3213_v32 }
 0x7e9   :  { %v712_v11 = vpop.permute.xlu0 %711 }
 0x7ea   :  { %v714_v13 = vadd.f32 %v712_v11, %v637_v24  ;;  %v896_v24 = vsub.f32 1.0, %v883_v19 }
 0x7ec   :  { %2497 = vtanh.f32 %v714_v13 }
 0x7f0   :  { %v887_v21 = vpop.permute.xlu2 %886 }
 0x7f1   :  { %v889_v22 = vmul.f32 %v887_v21, %v883_v19 }
 0x7f2   :  { %v2498_v25 = vpop.eup %2497 }
 0x7f3   :  { %718 = vrot.lane.b32.xlu2 %v2498_v25, %s2857_s26  ;;  %891 = vrot.lane.b32.xlu1 %v889_v22, %s2855_s25 }
 0x84d   :  { %v719_v4 = vpop.permute.xlu2 %718 }
 0x84e   :  { %v721_v27 = vmul.f32 %v719_v4, %v716_v26 }
 0x850   :  { %v3231_v28 = vadd.f32 %v722_v0, %v721_v27 }
 0x852   :  { %765 = vrot.lane.b32.xlu1 %v3231_v28, %s2857_s26 }
 0x865   :  { %v892_v29 = vpop.permute.xlu1 %891 }
 0x866   :  { %v894_v30 = vadd.f32 %v892_v29, %v779_v56 }
 0x868   :  { %2499 = vtanh.f32 %v894_v30 }
 0x86e   :  { %v2500_v31 = vpop.eup %2499 }
 0x86f   :  { %898 = vrot.lane.b32.xlu0 %v2500_v31, %s2857_s26 }
 0x8c4   :  { %v766_v33 = vpop.permute.xlu1 %765 }
 0x8c5   :  { %769 = vst.msk [vmem:[#allocation4 + $0x10] sm:$0xff] %vm355_vm6, %v766_v33  ;;  %2380 = vmatmul.msk.f32.vlgmr.msrb.gmra.mxu2 %vm355_vm6, %v766_v33 }
 0x8c6   :  { %1074 = vmatpush.msrb.mxu2 %v3091_v53 }
 0x8c8   :  { %1075 = vmatpush.msrb.mxu2 %v3093_v54 }
 0x8ca   :  { %1076 = vmatpush.msrb.mxu2 %v3096_v57 }
 0x8cc   :  { %v1476_v35 = vld [vmem:[#allocation4 + $0x10] sm:$0xff]  ;;  %1077 = vmatpush.msrb.mxu2 %v3099_v58 }
 0x8cd   :  { %2410 = vmatmul.msk.f32.gmra.mxu1 %vm355_vm6, %v1476_v35 }
 0x8e1   :  { %v899_v36 = vpop.permute.xlu0 %898 }
 0x8e2   :  { %v901_v38 = vmul.f32 %v899_v36, %v896_v24  ;;  %v262_v24 = vpop.f32.mrf.mxu0 }
 0x8e3   :  { %v263_v36 = vadd.f32 %v3134_v9, %v262_v24 }
 0x8e4   :  { %v3246_v39 = vadd.f32 %v902_v37, %v901_v38 }
 0x8e5   :  { %279 = vst.msk [vmem:[#allocation2 + $0x20] sm:$0xff] %vm274_vm1, %v263_v36 }
 0x8e6   :  { %911 = vrot.lane.b32.xlu2 %v3246_v39, %s2857_s26 }
 0x940   :  { %v912_v40 = vpop.permute.xlu2 %911 }
 0x941   :  { %915 = vst.msk [vmem:[#allocation5 + $0x20] sm:$0xff] %vm355_vm6, %v912_v40  ;;  %2385 = vmatmul.msk.f32.vlgmr.msra.gmra.mxu3 %vm355_vm6, %v912_v40 }
 0x942   :  { %1236 = vmatpush.msra.mxu3 %v3000_v1 }
 0x944   :  { %1237 = vmatpush.msra.mxu3 %v3003_v3 }
 0x946   :  { %1238 = vmatpush.msra.mxu3 %v3010_v5 }
 0x948   :  { %v799_v41 = vpop.f32.mrf.mxu2  ;;  %1239 = vmatpush.msra.mxu3 %v3015_v7 }
 0x949   :  { %v824_v32 = vadd.f32 %v799_v41, %v3143_v14  ;;  %v825_v43 = vadd.f32 %v799_v41, %v777_v42 }
 0x94b   :  { %846 = vrot.lane.b32.xlu0 %v824_v32, %s2855_s25  ;;  %v2382_v44 = vmul.f32 -1.442695, %v825_v43 }
 0x94d   :  { %2501 = vpow2.f32 %v2382_v44  ;;  %v2612_v44 = vld [vmem:[#allocation11] sm:$0xff] }
 0x953   :  { %v2502_v45 = vpop.eup %2501 }
 0x954   :  { %v829_v46 = vadd.f32 1.0, %v2502_v45  ;;  %v917_v45 = vld [vmem:[#allocation2 + $0x20] sm:$0xff] }
 0x956   :  { %2503 = vrcp.f32 %v829_v46  ;;  %v841_v5 = vand.u32 2147483648, %v829_v46  ;;  %vm835_vm5 = vweird.f32 %v829_v46  ;;  %v839_v7 = vand.u32 2147483647, %v829_v46 }
 0x958   :  { %v842_v51 = vor.u32 1.1754944e-38, %v841_v5  ;;  %vm840_vm8 = vcmp.eq.f32.partialorder %v839_v7, 8.507059e+37 }
 0x95c   :  { %v2504_v47 = vpop.eup %2503 }
 0x95d   :  { %v831_v1 = vmul.f32 %v2504_v47, %v829_v46  ;;  %vm836_vm4 = vweird.f32 %v2504_v47 }
 0x95e   :  { %vm837_vm7 = vmor %vm835_vm5, %vm836_vm4 }
 0x95f   :  { %v832_v48 = vsub.f32 1.0, %v831_v1 }
 0x961   :  { %v833_v3 = vmul.f32 %v2504_v47, %v832_v48 }
 0x963   :  { %v834_v49 = vadd.f32 %v2504_v47, %v833_v3 }
 0x965   :  { %v838_v50 = vsel %vm837_vm7, %v2504_v47, %v834_v49 }
 0x966   :  { %v843_v52 = vsel %vm840_vm8, %v842_v51, %v838_v50 }
 0x967   :  { %v856_v27 = vsub.f32 1.0, %v843_v52  ;;  %v862_v30 = vmul.f32 %v843_v52, %v3231_v28 }
 0x9bd   :  { %v847_v55 = vpop.permute.xlu0 %846 }
 0x9be   :  { %v849_v56 = vmul.f32 %v847_v55, %v843_v52 }
 0x9c0   :  { %851 = vrot.lane.b32.xlu2 %v849_v56, %s2855_s25 }
 0x9c4   :  { %v961_v59 = vpop.f32.mrf.mxu3 }
 0x9c5   :  { %v1004_v60 = vadd.f32 %v961_v59, %v3079_v20  ;;  %v1005_v62 = vadd.f32 %v961_v59, %v919_v61 }
 0x9c7   :  { %1026 = vrot.lane.b32.xlu1 %v1004_v60, %s2855_s25  ;;  %v2387_v63 = vmul.f32 -1.442695, %v1005_v62 }
 0x9c9   :  { %2505 = vpow2.f32 %v2387_v63 }
 0x9cf   :  { %v2506_v2 = vpop.eup %2505 }
 0x9d0   :  { %v1009_v6 = vadd.f32 1.0, %v2506_v2  ;;  %v1059_v2 = vld [vmem:[#allocation3 + $0x10] sm:$0xff] }
 0x9d2   :  { %2507 = vrcp.f32 %v1009_v6  ;;  %v1021_v19 = vand.u32 2147483648, %v1009_v6  ;;  %vm1015_vm10 = vweird.f32 %v1009_v6  ;;  %v1019_v21 = vand.u32 2147483647, %v1009_v6 }
 0x9d4   :  { %v1022_v25 = vor.u32 1.1754944e-38, %v1021_v19  ;;  %vm1020_vm12 = vcmp.eq.f32.partialorder %v1019_v21, 8.507059e+37 }
 0x9d8   :  { %v2508_v12 = vpop.eup %2507 }
 0x9d9   :  { %v1011_v15 = vmul.f32 %v2508_v12, %v1009_v6  ;;  %vm1016_vm9 = vweird.f32 %v2508_v12 }
 0x9da   :  { %vm1017_vm11 = vmor %vm1015_vm10, %vm1016_vm9 }
 0x9db   :  { %v1012_v16 = vsub.f32 1.0, %v1011_v15 }
 0x9dd   :  { %v1013_v17 = vmul.f32 %v2508_v12, %v1012_v16 }
 0x9df   :  { %v1014_v18 = vadd.f32 %v2508_v12, %v1013_v17 }
 0x9e1   :  { %v1018_v22 = vsel %vm1017_vm11, %v2508_v12, %v1014_v18 }
 0x9e2   :  { %v1023_v26 = vsel %vm1020_vm12, %v1022_v25, %v1018_v22 }
 0x9e3   :  { %v1036_v28 = vsub.f32 1.0, %v1023_v26  ;;  %v1042_v40 = vmul.f32 %v1023_v26, %v3246_v39  ;;  %v2610_v39 = vld [vmem:[#allocation11 + $0x10] sm:$0xff] }
 0xa1a   :  { %v852_v10 = vpop.permute.xlu2 %851 }
 0xa1b   :  { %v854_v11 = vadd.f32 %v852_v10, %v777_v42 }
 0xa1d   :  { %2509 = vtanh.f32 %v854_v11 }
 0xa23   :  { %v2510_v13 = vpop.eup %2509 }
 0xa24   :  { %858 = vrot.lane.b32.xlu1 %v2510_v13, %s2857_s26 }
 0xa39   :  { %v1027_v4 = vpop.permute.xlu1 %1026 }
 0xa3a   :  { %v1029_v0 = vmul.f32 %v1027_v4, %v1023_v26 }
 0xa3c   :  { %1031 = vrot.lane.b32.xlu0 %v1029_v0, %s2855_s25 }
 0xa96   :  { %v859_v29 = vpop.permute.xlu1 %858 }
 0xa97   :  { %v861_v31 = vmul.f32 %v859_v29, %v856_v27 }
 0xa99   :  { %v3264_v33 = vadd.f32 %v862_v30, %v861_v31 }
 0xa9b   :  { %905 = vrot.lane.b32.xlu0 %v3264_v33, %s2857_s26 }
 0xaae   :  { %v1032_v34 = vpop.permute.xlu0 %1031 }
 0xaaf   :  { %v1034_v23 = vadd.f32 %v1032_v34, %v919_v61 }
 0xab1   :  { %2511 = vtanh.f32 %v1034_v23 }
 0xab7   :  { %v2512_v35 = vpop.eup %2511 }
 0xab8   :  { %1038 = vrot.lane.b32.xlu2 %v2512_v35, %s2857_s26 }
 0xb0d   :  { %v906_v37 = vpop.permute.xlu0 %905 }
 0xb0e   :  { %909 = vst.msk [vmem:[#allocation4 + $0x18] sm:$0xff] %vm355_vm6, %v906_v37  ;;  %2384 = vmatmul.msk.f32.vlgmr.msra.gmra.mxu2 %vm355_vm6, %v906_v37 }
 0xb0f   :  { %1214 = vmatpush.msra.mxu2 %v3091_v53 }
 0xb11   :  { %1215 = vmatpush.msra.mxu2 %v3093_v54  ;;  %v2609_v54 = vld [vmem:[#allocation11 + $0x18] sm:$0xff] }
 0xb12   :  { %v1039_v38 = vpop.permute.xlu2 %1038 }
 0xb13   :  { %v1041_v41 = vmul.f32 %v1039_v38, %v1036_v28  ;;  %1216 = vmatpush.msra.mxu2 %v3096_v57  ;;  %v2611_v57 = vld [vmem:[#allocation11 + $0x8] sm:$0xff] }
 0xb15   :  { %v3277_v32 = vadd.f32 %v1042_v40, %v1041_v41  ;;  %v1477_v42 = vld [vmem:[#allocation4 + $0x18] sm:$0xff]  ;;  %1217 = vmatpush.msra.mxu2 %v3099_v58  ;;  %v265_v40 = vpop.f32.mrf.mxu0 }
 0xb16   :  { %2411 = vmatmul.msk.f32.gmra.mxu1 %vm355_vm6, %v1477_v42  ;;  %v2613_v41 = vld [vmem:[#allocation10 + $0x18] sm:$0xff]  ;;  %v2614_v42 = vld [vmem:[#allocation10 + $0x10] sm:$0xff] }
 0xb17   :  { %1051 = vrot.lane.b32.xlu1 %v3277_v32, %s2857_s26 }
 0xb89   :  { %v1052_v53 = vpop.permute.xlu1 %1051 }
 0xb8a   :  { %1055 = vst.msk [vmem:[#allocation5 + $0x18] sm:$0xff] %vm355_vm6, %v1052_v53  ;;  %2389 = vmatmul.msk.f32.vlgmr.msrb.gmra.mxu3 %vm355_vm6, %v1052_v53  ;;  %v2615_v53 = vld [vmem:[#allocation10 + $0x8] sm:$0xff] }
 0xb8b   :  { %1375 = vmatpush.msrb.mxu3 %v2609_v54 }
 0xb8d   :  { %1376 = vmatpush.msrb.mxu3 %v2610_v39  ;;  %v2616_v39 = vld [vmem:[#allocation10] sm:$0xff] }
 0xb8f   :  { %1377 = vmatpush.msrb.mxu3 %v2611_v57 }
 0xb91   :  { %v939_v43 = vpop.f32.mrf.mxu2  ;;  %1378 = vmatpush.msrb.mxu3 %v2612_v44 }
 0xb92   :  { %v964_v58 = vadd.f32 %v939_v43, %v3143_v14  ;;  %v965_v46 = vadd.f32 %v939_v43, %v917_v45 }
 0xb94   :  { %986 = vrot.lane.b32.xlu2 %v964_v58, %s2855_s25  ;;  %v2386_v47 = vmul.f32 -1.442695, %v965_v46 }
 0xb96   :  { %2513 = vpow2.f32 %v2386_v47 }
 0xb9c   :  { %v2514_v1 = vpop.eup %2513 }
 0xb9d   :  { %v969_v48 = vadd.f32 1.0, %v2514_v1 }
 0xb9f   :  { %2515 = vrcp.f32 %v969_v48  ;;  %v981_v51 = vand.u32 2147483648, %v969_v48  ;;  %vm975_vm14 = vweird.f32 %v969_v48  ;;  %v979_v52 = vand.u32 2147483647, %v969_v48 }
 0xba1   :  { %v982_v56 = vor.u32 1.1754944e-38, %v981_v51  ;;  %vm980_vm2 = vcmp.eq.f32.partialorder %v979_v52, 8.507059e+37 }
 0xba5   :  { %v2516_v3 = vpop.eup %2515 }
 0xba6   :  { %v971_v49 = vmul.f32 %v2516_v3, %v969_v48  ;;  %vm976_vm13 = vweird.f32 %v2516_v3 }
 0xba7   :  { %vm977_vm15 = vmor %vm975_vm14, %vm976_vm13 }
 0xba8   :  { %v972_v5 = vsub.f32 1.0, %v971_v49 }
 0xbaa   :  { %v973_v7 = vmul.f32 %v2516_v3, %v972_v5 }
 0xbac   :  { %v974_v50 = vadd.f32 %v2516_v3, %v973_v7 }
 0xbae   :  { %v978_v55 = vsel %vm977_vm15, %v2516_v3, %v974_v50 }
 0xbaf   :  { %v983_v59 = vsel %vm980_vm2, %v982_v56, %v978_v55 }
 0xbb0   :  { %v996_v31 = vsub.f32 1.0, %v983_v59  ;;  %v1002_v35 = vmul.f32 %v983_v59, %v3264_v33  ;;  %v266_v33 = vadd.f32 %v3134_v9, %v265_v40 }
 0xbb2   :  { %280 = vst.msk [vmem:[#allocation2 + $0x28] sm:$0xff] %vm274_vm1, %v266_v33 }
 0xbb9   :  { %v1057_v1 = vld [vmem:[#allocation2 + $0x28] sm:$0xff] }
 0xbee   :  { %v987_v60 = vpop.permute.xlu2 %986 }
 0xbef   :  { %v989_v61 = vmul.f32 %v987_v60, %v983_v59 }
 0xbf1   :  { %991 = vrot.lane.b32.xlu1 %v989_v61, %s2855_s25 }
 0xc0d   :  { %v1101_v62 = vpop.f32.mrf.mxu3 }
 0xc0e   :  { %v1144_v63 = vadd.f32 %v1101_v62, %v3079_v20  ;;  %v1145_v6 = vadd.f32 %v1101_v62, %v1059_v2 }
 0xc10   :  { %1166 = vrot.lane.b32.xlu0 %v1144_v63, %s2855_s25  ;;  %v2391_v10 = vmul.f32 -1.442695, %v1145_v6 }
 0xc12   :  { %2517 = vpow2.f32 %v2391_v10  ;;  %v1199_v10 = vld [vmem:[#allocation3 + $0x8] sm:$0xff] }
 0xc18   :  { %v2518_v11 = vpop.eup %2517 }
 0xc19   :  { %v1149_v12 = vadd.f32 1.0, %v2518_v11 }
 0xc1b   :  { %2519 = vrcp.f32 %v1149_v12  ;;  %v1161_v25 = vand.u32 2147483648, %v1149_v12  ;;  %vm1155_vm4 = vweird.f32 %v1149_v12  ;;  %v1159_v26 = vand.u32 2147483647, %v1149_v12 }
 0xc1d   :  { %v1162_v0 = vor.u32 1.1754944e-38, %v1161_v25  ;;  %vm1160_vm7 = vcmp.eq.f32.partialorder %v1159_v26, 8.507059e+37 }
 0xc21   :  { %v2520_v16 = vpop.eup %2519 }
 0xc22   :  { %v1151_v18 = vmul.f32 %v2520_v16, %v1149_v12  ;;  %vm1156_vm3 = vweird.f32 %v2520_v16 }
 0xc23   :  { %vm1157_vm5 = vmor %vm1155_vm4, %vm1156_vm3 }
 0xc24   :  { %v1152_v19 = vsub.f32 1.0, %v1151_v18 }
 0xc26   :  { %v1153_v21 = vmul.f32 %v2520_v16, %v1152_v19 }
 0xc28   :  { %v1154_v22 = vadd.f32 %v2520_v16, %v1153_v21 }
 0xc2a   :  { %v1158_v4 = vsel %vm1157_vm5, %v2520_v16, %v1154_v22 }
 0xc2b   :  { %v1163_v27 = vsel %vm1160_vm7, %v1162_v0, %v1158_v4 }
 0xc2c   :  { %v1176_v57 = vsub.f32 1.0, %v1163_v27  ;;  %v1182_v44 = vmul.f32 %v1163_v27, %v3277_v32 }
 0xc63   :  { %v992_v13 = vpop.permute.xlu1 %991 }
 0xc64   :  { %v994_v15 = vadd.f32 %v992_v13, %v917_v45 }
 0xc66   :  { %2521 = vtanh.f32 %v994_v15 }
 0xc6c   :  { %v2522_v17 = vpop.eup %2521 }
 0xc6d   :  { %998 = vrot.lane.b32.xlu0 %v2522_v17, %s2857_s26 }
 0xc82   :  { %v1167_v29 = vpop.permute.xlu0 %1166 }
 0xc83   :  { %v1169_v30 = vmul.f32 %v1167_v29, %v1163_v27 }
 0xc85   :  { %1171 = vrot.lane.b32.xlu2 %v1169_v30, %s2855_s25 }
 0xcdf   :  { %v999_v34 = vpop.permute.xlu0 %998  ;;  %v1172_v23 = vpop.permute.xlu2 %1171 }
 0xce0   :  { %v1001_v24 = vmul.f32 %v999_v34, %v996_v31  ;;  %v1174_v36 = vadd.f32 %v1172_v23, %v1059_v2 }
 0xce2   :  { %v3293_v37 = vadd.f32 %v1002_v35, %v1001_v24  ;;  %2523 = vtanh.f32 %v1174_v36 }
 0xce4   :  { %1045 = vrot.lane.b32.xlu2 %v3293_v37, %s2857_s26 }
 0xce8   :  { %v2524_v28 = vpop.eup %2523 }
 0xce9   :  { %1178 = vrot.lane.b32.xlu1 %v2524_v28, %s2857_s26 }
 0xd3e   :  { %v1046_v38 = vpop.permute.xlu2 %1045 }
 0xd3f   :  { %1049 = vst.msk [vmem:[#allocation4 + $0x20] sm:$0xff] %vm355_vm6, %v1046_v38  ;;  %2388 = vmatmul.msk.f32.vlgmr.msrb.gmra.mxu2 %vm355_vm6, %v1046_v38 }
 0xd40   :  { %1353 = vmatpush.msrb.mxu2 %v2613_v41 }
 0xd42   :  { %1354 = vmatpush.msrb.mxu2 %v2614_v42  ;;  %v268_v42 = vpop.f32.mrf.mxu0 }
 0xd44   :  { %1355 = vmatpush.msrb.mxu2 %v2615_v53  ;;  %v3325_v53 = vld [vmem:[#allocation13] ss:$0 sm:$0xff] }
 0xd46   :  { %v1478_v54 = vld [vmem:[#allocation4 + $0x20] sm:$0xff]  ;;  %1356 = vmatpush.msrb.mxu2 %v2616_v39 }
 0xd47   :  { %2412 = vmatmul.msk.f32.gmra.mxu1 %vm355_vm6, %v1478_v54 }
 0xd5b   :  { %v1179_v43 = vpop.permute.xlu1 %1178 }
 0xd5c   :  { %v1181_v58 = vmul.f32 %v1179_v43, %v1176_v57 }
 0xd5e   :  { %v3304_v45 = vadd.f32 %v1182_v44, %v1181_v58 }
 0xd60   :  { %1191 = vrot.lane.b32.xlu0 %v3304_v45, %s2857_s26 }
 0xdc2   :  { %v1079_v9 = vpop.f32.mrf.mxu2 }
 0xdc3   :  { %v1104_v46 = vadd.f32 %v1079_v9, %v3143_v14  ;;  %v1105_v48 = vadd.f32 %v1079_v9, %v1057_v1 }
 0xdc5   :  { %1126 = vrot.lane.b32.xlu1 %v1104_v46, %s2855_s25  ;;  %v2390_v3 = vmul.f32 -1.442695, %v1105_v48 }
 0xdc7   :  { %2525 = vpow2.f32 %v2390_v3 }
 0xdcd   :  { %v2526_v32 = vpop.eup %2525 }
 0xdce   :  { %v1109_v49 = vadd.f32 1.0, %v2526_v32 }
 0xdd0   :  { %2527 = vrcp.f32 %v1109_v49  ;;  %v1121_v55 = vand.u32 2147483648, %v1109_v49  ;;  %vm1115_vm9 = vweird.f32 %v1109_v49  ;;  %v1119_v56 = vand.u32 2147483647, %v1109_v49 }
 0xdd2   :  { %v1192_v47 = vpop.permute.xlu0 %1191  ;;  %v1122_v60 = vor.u32 1.1754944e-38, %v1121_v55  ;;  %vm1120_vm11 = vcmp.eq.f32.partialorder %v1119_v56, 8.507059e+37 }
 0xdd3   :  { %1195 = vst.msk [vmem:[#allocation5 + $0x10] sm:$0xff] %vm355_vm6, %v1192_v47  ;;  %2393 = vmatmul.msk.f32.vlgmr.msra.gmra.mxu3 %vm355_vm6, %v1192_v47 }
 0xdd6   :  { %v2528_v5 = vpop.eup %2527 }
 0xdd7   :  { %v1111_v7 = vmul.f32 %v2528_v5, %v1109_v49  ;;  %vm1116_vm8 = vweird.f32 %v2528_v5 }
 0xdd8   :  { %vm1117_vm10 = vmor %vm1115_vm9, %vm1116_vm8 }
 0xdd9   :  { %v1112_v50 = vsub.f32 1.0, %v1111_v7 }
 0xddb   :  { %v1113_v51 = vmul.f32 %v2528_v5, %v1112_v50 }
 0xddd   :  { %v1114_v52 = vadd.f32 %v2528_v5, %v1113_v51 }
 0xddf   :  { %v1118_v59 = vsel %vm1117_vm10, %v2528_v5, %v1114_v52 }
 0xde0   :  { %v1123_v61 = vsel %vm1120_vm11, %v1122_v60, %v1118_v59 }
 0xde1   :  { %v1136_v23 = vsub.f32 1.0, %v1123_v61  ;;  %v1142_v24 = vmul.f32 %v1123_v61, %v3293_v37  ;;  %v269_v37 = vadd.f32 %v3325_v53, %v268_v42  ;;  %v1654_v42 = vld [vmem:[%s3605_s10 + $0x20] sm:$0xff] }
 0xde3   :  { %281 = vst.msk [vmem:[#allocation2 + $0x30] sm:$0xff] %vm274_vm1, %v269_v37  ;;  %v1497_v37 = vld [vmem:[%s3604_s9 + $0x38] sm:$0xff] }
 0xde4   :  { %1534 = vmatpush.msrb.mxu0 %v1497_v37 }
 0xe37   :  { %v1127_v62 = vpop.permute.xlu1 %1126 }
 0xe38   :  { %v1129_v63 = vmul.f32 %v1127_v62, %v1123_v61 }
 0xe3a   :  { %1131 = vrot.lane.b32.xlu0 %v1129_v63, %s2855_s25 }
 0xe56   :  { %v1241_v2 = vpop.f32.mrf.mxu3 }
 0xe57   :  { %v1284_v6 = vadd.f32 %v1241_v2, %v3079_v20  ;;  %v1285_v11 = vadd.f32 %v1241_v2, %v1199_v10 }
 0xe59   :  { %1306 = vrot.lane.b32.xlu2 %v1284_v6, %s2855_s25  ;;  %v2395_v12 = vmul.f32 -1.442695, %v1285_v11  ;;  %v1338_v6 = vld [vmem:[#allocation3] sm:$0xff] }
 0xe5b   :  { %2529 = vpow2.f32 %v2395_v12 }
 0xe61   :  { %v2530_v13 = vpop.eup %2529 }
 0xe62   :  { %v1289_v15 = vadd.f32 1.0, %v2530_v13 }
 0xe64   :  { %2531 = vrcp.f32 %v1289_v15  ;;  %v1301_v26 = vand.u32 2147483648, %v1289_v15  ;;  %vm1295_vm13 = vweird.f32 %v1289_v15  ;;  %v1299_v4 = vand.u32 2147483647, %v1289_v15 }
 0xe66   :  { %v1302_v27 = vor.u32 1.1754944e-38, %v1301_v26  ;;  %vm1300_vm15 = vcmp.eq.f32.partialorder %v1299_v4, 8.507059e+37 }
 0xe6a   :  { %v2532_v16 = vpop.eup %2531 }
 0xe6b   :  { %v1291_v17 = vmul.f32 %v2532_v16, %v1289_v15  ;;  %vm1296_vm12 = vweird.f32 %v2532_v16 }
 0xe6c   :  { %vm1297_vm14 = vmor %vm1295_vm13, %vm1296_vm12 }
 0xe6d   :  { %v1292_v18 = vsub.f32 1.0, %v1291_v17 }
 0xe6f   :  { %v1293_v19 = vmul.f32 %v2532_v16, %v1292_v18 }
 0xe71   :  { %v1294_v22 = vadd.f32 %v2532_v16, %v1293_v19 }
 0xe73   :  { %v1298_v0 = vsel %vm1297_vm14, %v2532_v16, %v1294_v22 }
 0xe74   :  { %v1303_v29 = vsel %vm1300_vm15, %v1302_v27, %v1298_v0 }
 0xe75   :  { %v1316_v39 = vsub.f32 1.0, %v1303_v29  ;;  %v1322_v43 = vmul.f32 %v1303_v29, %v3304_v45 }
 0xeac   :  { %v1132_v21 = vpop.permute.xlu0 %1131 }
 0xead   :  { %v1134_v25 = vadd.f32 %v1132_v21, %v1057_v1  ;;  %v1197_v1 = vld [vmem:[#allocation2 + $0x30] sm:$0xff] }
 0xeaf   :  { %2533 = vtanh.f32 %v1134_v25 }
 0xeb3   :  { %v1307_v30 = vpop.permute.xlu2 %1306 }
 0xeb4   :  { %v1309_v31 = vmul.f32 %v1307_v30, %v1303_v29 }
 0xeb5   :  { %v2534_v34 = vpop.eup %2533 }
 0xeb6   :  { %1138 = vrot.lane.b32.xlu2 %v2534_v34, %s2857_s26  ;;  %1311 = vrot.lane.b32.xlu1 %v1309_v31, %s2855_s25 }
 0xf10   :  { %v1139_v35 = vpop.permute.xlu2 %1138 }
 0xf11   :  { %v1141_v36 = vmul.f32 %v1139_v35, %v1136_v23 }
 0xf13   :  { %v3318_v28 = vadd.f32 %v1142_v24, %v1141_v36 }
 0xf15   :  { %1185 = vrot.lane.b32.xlu1 %v3318_v28, %s2857_s26 }
 0xf28   :  { %v1312_v38 = vpop.permute.xlu1 %1311 }
 0xf29   :  { %v1314_v40 = vadd.f32 %v1312_v38, %v1199_v10 }
 0xf2b   :  { %2535 = vtanh.f32 %v1314_v40 }
 0xf31   :  { %v2536_v41 = vpop.eup %2535 }
 0xf32   :  { %1318 = vrot.lane.b32.xlu0 %v2536_v41, %s2857_s26  ;;  %v1657_v41 = vld [vmem:[%s3605_s10 + $0x38] sm:$0xff] }
 0xf87   :  { %v1186_v33 = vpop.permute.xlu1 %1185 }
 0xf88   :  { %1189 = vst.msk [vmem:[#allocation4 + $0x28] sm:$0xff] %vm355_vm6, %v1186_v33  ;;  %2392 = vmatmul.msk.f32.vlgmr.msra.gmra.mxu2 %vm355_vm6, %v1186_v33  ;;  %v1655_v33 = vld [vmem:[%s3605_s10 + $0x28] sm:$0xff] }
 0xf89   :  { %1673 = vmatpush.msra.mxu2 %v1657_v41 }
 0xf8f   :  { %v1479_v54 = vld [vmem:[#allocation4 + $0x28] sm:$0xff] }
 0xf90   :  { %2413 = vmatmul.msk.f32.gmra.mxu1 %vm355_vm6, %v1479_v54  ;;  %v1496_v54 = vld [vmem:[%s3604_s9 + $0x30] sm:$0xff] }
 0xf91   :  { %1535 = vmatpush.msrb.mxu0 %v1496_v54 }
 0xfa4   :  { %v1319_v57 = vpop.permute.xlu0 %1318 }
 0xfa5   :  { %v1321_v44 = vmul.f32 %v1319_v57, %v1316_v39  ;;  %v2454_v39 = vld [vmem:[%s3610_s15] ss:$0 sm:$0xff]  ;;  %v271_v57 = vpop.f32.mrf.mxu0 }
 0xfa7   :  { %v3331_v58 = vadd.f32 %v1322_v43, %v1321_v44  ;;  %v272_v43 = vadd.f32 %v3325_v53, %v271_v57  ;;  %v1495_v44 = vld [vmem:[%s3604_s9 + $0x28] sm:$0xff]  ;;  %v3384_v53 = vld [vmem:[#allocation19 + $0x10] sm:$0xff] }
 0xfa8   :  { %1536 = vmatpush.msrb.mxu0 %v1495_v44 }
 0xfa9   :  { %1331 = vrot.lane.b32.xlu2 %v3331_v58, %s2857_s26  ;;  %282 = vst.msk [vmem:[#allocation2 + $0x38] sm:$0xff] %vm274_vm1, %v272_v43 }
0x1003   :  { %v1332_v9 = vpop.permute.xlu2 %1331 }
0x1004   :  { %1335 = vst.msk [vmem:[#allocation5 + $0x8] sm:$0xff] %vm355_vm6, %v1332_v9  ;;  %2397 = vmatmul.msk.f32.vlgmr.msrb.gmra.mxu3 %vm355_vm6, %v1332_v9  ;;  %v1494_v9 = vld [vmem:[%s3604_s9 + $0x20] sm:$0xff] }
0x1005   :  { %1537 = vmatpush.msrb.mxu0 %v1494_v9 }
0x100b   :  { %v1219_v46 = vpop.f32.mrf.mxu2 }
0x100c   :  { %v1244_v47 = vadd.f32 %v1219_v46, %v3143_v14  ;;  %v1245_v48 = vadd.f32 %v1219_v46, %v1197_v1  ;;  %v3380_v46 = vld [vmem:[#allocation19 + $0x18] sm:$0xff] }
0x100e   :  { %1266 = vrot.lane.b32.xlu0 %v1244_v47, %s2855_s25  ;;  %v2394_v3 = vmul.f32 -1.442695, %v1245_v48 }
0x1010   :  { %2537 = vpow2.f32 %v2394_v3 }
0x1016   :  { %v2538_v45 = vpop.eup %2537 }
0x1017   :  { %v1249_v32 = vadd.f32 1.0, %v2538_v45  ;;  %v3390_v45 = vld [vmem:[#allocation19] sm:$0xff] }
0x1019   :  { %2539 = vrcp.f32 %v1249_v32  ;;  %v1261_v52 = vand.u32 2147483648, %v1249_v32  ;;  %vm1255_vm3 = vweird.f32 %v1249_v32  ;;  %v1259_v55 = vand.u32 2147483647, %v1249_v32 }
0x101b   :  { %v1262_v59 = vor.u32 1.1754944e-38, %v1261_v52  ;;  %vm1260_vm5 = vcmp.eq.f32.partialorder %v1259_v55, 8.507059e+37 }
0x101f   :  { %v2540_v49 = vpop.eup %2539 }
0x1020   :  { %v1251_v5 = vmul.f32 %v2540_v49, %v1249_v32  ;;  %vm1256_vm2 = vweird.f32 %v2540_v49 }
0x1021   :  { %vm1257_vm4 = vmor %vm1255_vm3, %vm1256_vm2 }
0x1022   :  { %v1252_v7 = vsub.f32 1.0, %v1251_v5 }
0x1024   :  { %v1253_v50 = vmul.f32 %v2540_v49, %v1252_v7 }
0x1026   :  { %v1254_v51 = vadd.f32 %v2540_v49, %v1253_v50  ;;  %v1649_v50 = vld [vmem:[#allocation5 + $0x38] sm:$0xff] }
0x1028   :  { %v1258_v56 = vsel %vm1257_vm4, %v2540_v49, %v1254_v51 }
0x1029   :  { %v1263_v60 = vsel %vm1260_vm5, %v1262_v59, %v1258_v56  ;;  %v1484_v59 = vld [vmem:[#allocation5 + $0x10] sm:$0xff] }
0x102a   :  { %v1276_v31 = vsub.f32 1.0, %v1263_v60  ;;  %v1282_v23 = vmul.f32 %v1263_v60, %v3318_v28  ;;  %v1656_v28 = vld [vmem:[%s3605_s10 + $0x30] sm:$0xff] }
0x102b   :  { %1674 = vmatpush.msra.mxu2 %v1656_v28 }
0x102d   :  { %1675 = vmatpush.msra.mxu2 %v1655_v33 }
0x102f   :  { %1676 = vmatpush.msra.mxu2 %v1654_v42 }
0x1080   :  { %v1267_v61 = vpop.permute.xlu0 %1266 }
0x1081   :  { %v1269_v62 = vmul.f32 %v1267_v61, %v1263_v60 }
0x1083   :  { %1271 = vrot.lane.b32.xlu2 %v1269_v62, %s2855_s25 }
0x1087   :  { %v1380_v63 = vpop.f32.mrf.mxu3 }
0x1088   :  { %v1423_v2 = vadd.f32 %v1380_v63, %v3079_v20  ;;  %v1424_v10 = vadd.f32 %v1380_v63, %v1338_v6  ;;  %v1486_v63 = vld [vmem:[#allocation5 + $0x20] sm:$0xff] }
0x108a   :  { %1445 = vrot.lane.b32.xlu1 %v1423_v2, %s2855_s25  ;;  %v2399_v11 = vmul.f32 -1.442695, %v1424_v10  ;;  %v1487_v2 = vld [vmem:[#allocation5 + $0x28] sm:$0xff]  ;;  %v3424_v10 = vld [vmem:[#allocation2 + $0x38] sm:$0xff] }
0x108c   :  { %2541 = vpow2.f32 %v2399_v11 }
0x1092   :  { %v2542_v12 = vpop.eup %2541 }
0x1093   :  { %v1428_v13 = vadd.f32 1.0, %v2542_v12 }
0x1095   :  { %2543 = vrcp.f32 %v1428_v13  ;;  %v1440_v25 = vand.u32 2147483648, %v1428_v13  ;;  %vm1434_vm8 = vweird.f32 %v1428_v13  ;;  %v1438_v26 = vand.u32 2147483647, %v1428_v13 }
0x1097   :  { %v1441_v0 = vor.u32 1.1754944e-38, %v1440_v25  ;;  %vm1439_vm10 = vcmp.eq.f32.partialorder %v1438_v26, 8.507059e+37 }
0x109b   :  { %v2544_v17 = vpop.eup %2543 }
0x109c   :  { %v1430_v19 = vmul.f32 %v2544_v17, %v1428_v13  ;;  %vm1435_vm7 = vweird.f32 %v2544_v17 }
0x109d   :  { %vm1436_vm9 = vmor %vm1434_vm8, %vm1435_vm7 }
0x109e   :  { %v1431_v21 = vsub.f32 1.0, %v1430_v19 }
0x10a0   :  { %v1432_v22 = vmul.f32 %v2544_v17, %v1431_v21 }
0x10a2   :  { %v1433_v20 = vadd.f32 %v2544_v17, %v1432_v22 }
0x10a4   :  { %v1437_v4 = vsel %vm1436_vm9, %v2544_v17, %v1433_v20 }
0x10a5   :  { %v1442_v27 = vsel %vm1439_vm10, %v1441_v0, %v1437_v4 }
0x10a6   :  { %v1455_v48 = vsub.f32 1.0, %v1442_v27  ;;  %v1461_v32 = vmul.f32 %v1442_v27, %v3331_v58 }
0x10dd   :  { %v1272_v15 = vpop.permute.xlu2 %1271 }
0x10de   :  { %v1274_v16 = vadd.f32 %v1272_v15, %v1197_v1  ;;  %v3387_v1 = vld [vmem:[#allocation19 + $0x8] sm:$0xff] }
0x10e0   :  { %2545 = vtanh.f32 %v1274_v16 }
0x10e6   :  { %v2546_v18 = vpop.eup %2545 }
0x10e7   :  { %1278 = vrot.lane.b32.xlu1 %v2546_v18, %s2857_s26 }
0x10fc   :  { %v1446_v29 = vpop.permute.xlu1 %1445 }
0x10fd   :  { %v1448_v30 = vmul.f32 %v1446_v29, %v1442_v27  ;;  %v1604_v29 = vpop.f32.mrf.mxu1 }
0x10ff   :  { %1450 = vrot.lane.b32.xlu0 %v1448_v30, %s2855_s25  ;;  %v3434_v30 = vld [vmem:[%s3608_s13] ss:$0 sm:$0xff] }
0x1159   :  { %v1279_v34 = vpop.permute.xlu1 %1278 }
0x115a   :  { %v1281_v35 = vmul.f32 %v1279_v34, %v1276_v31 }
0x115c   :  { %v3345_v24 = vadd.f32 %v1282_v23, %v1281_v35  ;;  %v1607_v35 = vpop.f32.mrf.mxu1 }
0x115e   :  { %1325 = vrot.lane.b32.xlu0 %v3345_v24, %s2857_s26 }
0x1164   :  { %v1610_v33 = vpop.f32.mrf.mxu1 }
0x116c   :  { %v1613_v43 = vpop.f32.mrf.mxu1 }
0x1171   :  { %v1451_v36 = vpop.permute.xlu0 %1450 }
0x1172   :  { %v1453_v38 = vadd.f32 %v1451_v36, %v1338_v6  ;;  %v1488_v6 = vld [vmem:[#allocation5 + $0x30] sm:$0xff] }
0x1174   :  { %2547 = vtanh.f32 %v1453_v38 }
0x117a   :  { %v2548_v40 = vpop.eup %2547 }
0x117b   :  { %1457 = vrot.lane.b32.xlu2 %v2548_v40, %s2857_s26 }
0x1183   :  { %1737 = vrot.lane.b32.xlu2 %v2454_v39, %s2855_s25 }
0x11d0   :  { %v1326_v47 = vpop.permute.xlu0 %1325 }
0x11d1   :  { %1329 = vst.msk [vmem:[#allocation4 + $0x30] sm:$0xff] %vm355_vm6, %v1326_v47  ;;  %2396 = vmatmul.msk.f32.vlgmr.msrb.gmra.mxu2 %vm355_vm6, %v1326_v47 }
0x11d2   :  { %1729 = vmatpush.msrb.mxu2 %v3380_v46 }
0x11d4   :  { %1730 = vmatpush.msrb.mxu2 %v3384_v53 }
0x11d5   :  { %v1458_v3 = vpop.permute.xlu2 %1457 }
0x11d6   :  { %v1460_v49 = vmul.f32 %v1458_v3, %v1455_v48  ;;  %1731 = vmatpush.msrb.mxu2 %v3387_v1  ;;  %v1616_v3 = vpop.f32.mrf.mxu1 }
0x11d8   :  { %v1462_v5 = vadd.f32 %v1461_v32, %v1460_v49  ;;  %v1480_v7 = vld [vmem:[#allocation4 + $0x30] sm:$0xff]  ;;  %1732 = vmatpush.msrb.mxu2 %v3390_v45 }
0x11d9   :  { %2414 = vmatmul.msk.f32.gmra.mxu1 %vm355_vm6, %v1480_v7  ;;  %2416 = vmatmul.msk.f32.vlgmr.msra.gmra.mxu2 %vm355_vm6, %v1649_v50 }
0x11da   :  { %1470 = vrot.lane.b32.xlu1 %v1462_v5, %s2857_s26  ;;  %1864 = vmatpush.msra.mxu2 %v3380_v46 }
0x11dc   :  { %1865 = vmatpush.msra.mxu2 %v3384_v53 }
0x11dd   :  { %v3415_v61 = vpop.permute.xlu2 %1737 }
0x11de   :  { %1866 = vmatpush.msra.mxu2 %v3387_v1 }
0x11e0   :  { %1867 = vmatpush.msra.mxu2 %v3390_v45 }
0x11e1   :  { %1733 = vmatmul.f32.vlgmr.msrb.gmra.mxu2 %v2856_v8  ;;  %v1483_v8 = vld [vmem:[#allocation5 + $0x8] sm:$0xff] }
0x11e2   :  { %1996 = vmatpush.msrb.mxu2 %v3380_v46 }
0x11e4   :  { %1997 = vmatpush.msrb.mxu2 %v3384_v53 }
0x11e6   :  { %1998 = vmatpush.msrb.mxu2 %v3387_v1 }
0x11e8   :  { %1999 = vmatpush.msrb.mxu2 %v3390_v45 }
0x124c   :  { %v1471_v58 = vpop.permute.xlu1 %1470 }
0x124d   :  { %1473 = vst.msk [vmem:[#allocation5] sm:$0xff] %vm355_vm6, %v1471_v58 }
0x1254   :  { %v1358_v51 = vpop.f32.mrf.mxu2  ;;  %v1482_v52 = vld [vmem:[#allocation5] sm:$0xff] }
0x1255   :  { %v1383_v55 = vadd.f32 %v1358_v51, %v3143_v14  ;;  %2400 = vmatmul.msk.f32.vlgmr.msrb.gmra.mxu0 %vm355_vm6, %v1482_v52  ;;  %v1485_v14 = vld [vmem:[#allocation5 + $0x18] sm:$0xff]  ;;  %v1384_v11 = vadd.f32 %v1358_v51, %v3424_v10 }
0x1257   :  { %1405 = vrot.lane.b32.xlu0 %v1383_v55, %s2855_s25  ;;  %v2398_v12 = vmul.f32 -1.442695, %v1384_v11 }
0x1259   :  { %2549 = vpow2.f32 %v2398_v12 }
0x125c   :  { %v3411_v56 = vpop.f32.mrf.mxu2 }
0x125d   :  { %2401 = vmatmul.msk.f32.gmra.mxu0 %vm355_vm6, %v1483_v8  ;;  %v1619_v8 = vpop.f32.mrf.mxu1 }
0x125f   :  { %v2550_v13 = vpop.eup %2549 }
0x1260   :  { %v1388_v15 = vadd.f32 1.0, %v2550_v13 }
0x1262   :  { %2551 = vrcp.f32 %v1388_v15  ;;  %v1400_v22 = vand.u32 2147483648, %v1388_v15  ;;  %vm1394_vm12 = vweird.f32 %v1388_v15  ;;  %v1398_v20 = vand.u32 2147483647, %v1388_v15 }
0x1264   :  { %v1734_v60 = vpop.f32.mrf.mxu2  ;;  %v1401_v26 = vor.u32 1.1754944e-38, %v1400_v22  ;;  %vm1399_vm14 = vcmp.eq.f32.partialorder %v1398_v20, 8.507059e+37 }
0x1265   :  { %2402 = vmatmul.msk.f32.gmra.mxu0 %vm355_vm6, %v1484_v59  ;;  %v1740_v62 = vadd.f32 %v3415_v61, %v1734_v60  ;;  %v1622_v13 = vpop.f32.mrf.mxu1 }
0x1267   :  { %1762 = vrot.lane.b32.xlu1 %v1740_v62, %s2855_s25 }
0x1268   :  { %v2552_v16 = vpop.eup %2551 }
0x1269   :  { %v1390_v17 = vmul.f32 %v2552_v16, %v1388_v15  ;;  %vm1395_vm11 = vweird.f32 %v2552_v16 }
0x126a   :  { %vm1396_vm13 = vmor %vm1394_vm12, %vm1395_vm11 }
0x126b   :  { %v1391_v18 = vsub.f32 1.0, %v1390_v17 }
0x126d   :  { %2403 = vmatmul.msk.f32.gmra.mxu0 %vm355_vm6, %v1485_v14  ;;  %v1392_v19 = vmul.f32 %v2552_v16, %v1391_v18 }
0x126f   :  { %v1393_v21 = vadd.f32 %v2552_v16, %v1392_v19 }
0x1271   :  { %v1397_v25 = vsel %vm1396_vm13, %v2552_v16, %v1393_v21 }
0x1272   :  { %v3427_v4 = vsel %vm1399_vm14, %v1401_v26, %v1397_v25 }
0x1273   :  { %v1415_v26 = vsub.f32 1.0, %v3427_v4 }
0x1275   :  { %2404 = vmatmul.msk.f32.gmra.mxu0 %vm355_vm6, %v1486_v63 }
0x127d   :  { %2405 = vmatmul.msk.f32.gmra.mxu0 %vm355_vm6, %v1487_v2 }
0x1285   :  { %2406 = vmatmul.msk.f32.gmra.mxu0 %vm355_vm6, %v1488_v6 }
0x128d   :  { %2407 = vmatmul.msk.f32.gmra.mxu0 %vm355_vm6, %v1649_v50 }
0x12c9   :  { %v1406_v0 = vpop.permute.xlu0 %1405 }
0x12ca   :  { %v1408_v27 = vmul.f32 %v1406_v0, %v3427_v4 }
0x12cc   :  { %1410 = vrot.lane.b32.xlu2 %v1408_v27, %s2855_s25  ;;  %v1421_v27 = vmul.f32 %v3427_v4, %v3345_v24  ;;  %v1652_v24 = vld [vmem:[%s3605_s10 + $0x10] sm:$0xff]  ;;  %v1651_v4 = vld [vmem:[%s3605_s10 + $0x8] sm:$0xff] }
0x12d2   :  { %v1539_v31 = vpop.f32.mrf.mxu0 }
0x12d3   :  { %v1605_v34 = vadd.f32 %v1604_v29, %v1539_v31 }
0x12d5   :  { %v1632_v23 = vadd.f32 %v3434_v30, %v1605_v34 }
0x12d7   :  { %1640 = vst.msk [vmem:[#allocation2] sm:$0xff] %vm274_vm1, %v1632_v23 }
0x12d9   :  { %v1763_v14 = vpop.permute.xlu1 %1762 }
0x12da   :  { %v1542_v36 = vpop.f32.mrf.mxu0 }
0x12db   :  { %v1608_v38 = vadd.f32 %v1607_v35, %v1542_v36 }
0x12dd   :  { %v1633_v40 = vadd.f32 %v3434_v30, %v1608_v38  ;;  %v1653_v38 = vld [vmem:[%s3605_s10 + $0x18] sm:$0xff] }
0x12de   :  { %v1716_v41 = vld [vmem:[#allocation2] sm:$0xff]  ;;  %1696 = vmatpush.msra.mxu3 %v1653_v38 }
0x12df   :  { %1641 = vst.msk [vmem:[#allocation2 + $0x8] sm:$0xff] %vm274_vm1, %v1633_v40  ;;  %v1741_v28 = vadd.f32 %v1734_v60, %v1716_v41  ;;  %v1650_v40 = vld [vmem:[%s3605_s10] sm:$0xff] }
0x12e0   :  { %1697 = vmatpush.msra.mxu3 %v1652_v24 }
0x12e1   :  { %v2418_v42 = vmul.f32 -1.442695, %v1741_v28 }
0x12e2   :  { %v1545_v37 = vpop.f32.mrf.mxu0  ;;  %1698 = vmatpush.msra.mxu3 %v1651_v4 }
0x12e3   :  { %v1611_v54 = vadd.f32 %v1610_v33, %v1545_v37  ;;  %2553 = vpow2.f32 %v2418_v42 }
0x12e4   :  { %1699 = vmatpush.msra.mxu3 %v1650_v40 }
0x12e5   :  { %v1634_v39 = vadd.f32 %v3434_v30, %v1611_v54 }
0x12e6   :  { %1798 = vmatpush.msrb.mxu3 %v3380_v46 }
0x12e7   :  { %1642 = vst.msk [vmem:[#allocation2 + $0x10] sm:$0xff] %vm274_vm1, %v1634_v39 }
0x12e8   :  { %1799 = vmatpush.msrb.mxu3 %v3384_v53 }
0x12e9   :  { %v2554_v57 = vpop.eup %2553 }
0x12ea   :  { %v1548_v44 = vpop.f32.mrf.mxu0  ;;  %v1745_v9 = vadd.f32 1.0, %v2554_v57  ;;  %1800 = vmatpush.msrb.mxu3 %v3387_v1 }
0x12eb   :  { %v1614_v47 = vadd.f32 %v1613_v43, %v1548_v44 }
0x12ec   :  { %2555 = vrcp.f32 %v1745_v9  ;;  %v1757_v51 = vand.u32 2147483648, %v1745_v9  ;;  %v1755_v55 = vand.u32 2147483647, %v1745_v9  ;;  %vm1751_vm2 = vweird.f32 %v1745_v9  ;;  %1801 = vmatpush.msrb.mxu3 %v3390_v45 }
0x12ed   :  { %v1635_v48 = vadd.f32 %v3434_v30, %v1614_v47 }
0x12ee   :  { %v1758_v62 = vor.u32 1.1754944e-38, %v1757_v51  ;;  %vm1756_vm4 = vcmp.eq.f32.partialorder %v1755_v55, 8.507059e+37 }
0x12ef   :  { %1643 = vst.msk [vmem:[#allocation2 + $0x18] sm:$0xff] %vm274_vm1, %v1635_v48 }
0x12f2   :  { %v2556_v32 = vpop.eup %2555  ;;  %v1551_v49 = vpop.f32.mrf.mxu0 }
0x12f3   :  { %v1617_v5 = vadd.f32 %v1616_v3, %v1551_v49  ;;  %v1747_v7 = vmul.f32 %v2556_v32, %v1745_v9  ;;  %vm1752_vm15 = vweird.f32 %v2556_v32  ;;  %v1780_v9 = vld [vmem:[#allocation2 + $0x8] sm:$0xff] }
0x12f4   :  { %vm1753_vm3 = vmor %vm1751_vm2, %vm1752_vm15 }
0x12f5   :  { %v1636_v50 = vadd.f32 %v3434_v30, %v1617_v5  ;;  %v1748_v58 = vsub.f32 1.0, %v1747_v7 }
0x12f7   :  { %1644 = vst.msk [vmem:[#allocation2 + $0x20] sm:$0xff] %vm274_vm1, %v1636_v50  ;;  %v1749_v52 = vmul.f32 %v2556_v32, %v1748_v58 }
0x12f9   :  { %v1750_v59 = vadd.f32 %v2556_v32, %v1749_v52 }
0x12fa   :  { %v1554_v60 = vpop.f32.mrf.mxu0 }
0x12fb   :  { %v1620_v63 = vadd.f32 %v1619_v8, %v1554_v60  ;;  %v1754_v2 = vsel %vm1753_vm3, %v2556_v32, %v1750_v59 }
0x12fc   :  { %v1759_v6 = vsel %vm1756_vm4, %v1758_v62, %v1754_v2 }
0x12fd   :  { %v1637_v11 = vadd.f32 %v3434_v30, %v1620_v63  ;;  %v1765_v12 = vmul.f32 %v1763_v14, %v1759_v6  ;;  %v1778_v23 = vmul.f32 0.0, %v1759_v6 }
0x12ff   :  { %1645 = vst.msk [vmem:[#allocation2 + $0x28] sm:$0xff] %vm274_vm1, %v1637_v11  ;;  %1767 = vrot.lane.b32.xlu0 %v1765_v12, %s2855_s25 }
0x1302   :  { %v1557_v15 = vpop.f32.mrf.mxu0 }
0x1303   :  { %v1623_v16 = vadd.f32 %v1622_v13, %v1557_v15 }
0x1305   :  { %v1638_v17 = vadd.f32 %v3434_v30, %v1623_v16 }
0x1307   :  { %1646 = vst.msk [vmem:[#allocation2 + $0x30] sm:$0xff] %vm274_vm1, %v1638_v17 }
0x130a   :  { %v1560_v42 = vpop.f32.mrf.mxu0 }
0x1326   :  { %v1411_v18 = vpop.permute.xlu2 %1410 }
0x1327   :  { %v1413_v19 = vadd.f32 %v1411_v18, %v3424_v10  ;;  %v1772_v10 = vsub.f32 1.0, %v1759_v6  ;;  %v1846_v18 = vld [vmem:[#allocation2 + $0x10] sm:$0xff] }
0x1329   :  { %2557 = vtanh.f32 %v1413_v19 }
0x132f   :  { %v2558_v21 = vpop.eup %2557 }
0x1330   :  { %1417 = vrot.lane.b32.xlu1 %v2558_v21, %s2857_s26 }
0x1371   :  { %v1768_v22 = vpop.permute.xlu0 %1767 }
0x1372   :  { %v1770_v20 = vadd.f32 %v1768_v22, %v1716_v41 }
0x1374   :  { %2559 = vtanh.f32 %v1770_v20 }
0x137a   :  { %v2560_v25 = vpop.eup %2559 }
0x137b   :  { %1774 = vrot.lane.b32.xlu2 %v2560_v25, %s2857_s26 }
0x13a2   :  { %v1418_v0 = vpop.permute.xlu1 %1417 }
0x13a3   :  { %v1420_v29 = vmul.f32 %v1418_v0, %v1415_v26 }
0x13a5   :  { %v1422_v31 = vadd.f32 %v1421_v27, %v1420_v29 }
0x13a7   :  { %1464 = vrot.lane.b32.xlu0 %v1422_v31, %s2857_s26 }
0x13d5   :  { %v1775_v34 = vpop.permute.xlu2 %1774 }
0x13d6   :  { %v1777_v35 = vmul.f32 %v1775_v34, %v1772_v10 }
0x13d8   :  { %v3458_v36 = vadd.f32 %v1778_v23, %v1777_v35 }
0x13da   :  { %1782 = vrot.lane.b32.xlu1 %v3458_v36, %s2857_s26 }
0x1419   :  { %v1465_v41 = vpop.permute.xlu0 %1464 }
0x141a   :  { %1468 = vst.msk [vmem:[#allocation4 + $0x38] sm:$0xff] %vm355_vm6, %v1465_v41 }
0x1421   :  { %v1481_v28 = vld [vmem:[#allocation4 + $0x38] sm:$0xff] }
0x1422   :  { %2415 = vmatmul.msk.f32.gmra.mxu1 %vm355_vm6, %v1481_v28  ;;  %2417 = vmatmul.msk.f32.vlgmr.msra.gmra.mxu3 %vm355_vm6, %v1481_v28 }
0x1423   :  { %1930 = vmatpush.msra.mxu3 %v3380_v46 }
0x1425   :  { %1931 = vmatpush.msra.mxu3 %v3384_v53 }
0x1427   :  { %1932 = vmatpush.msra.mxu3 %v3387_v1 }
0x1429   :  { %1933 = vmatpush.msra.mxu3 %v3390_v45 }
0x144c   :  { %v1783_v33 = vpop.permute.xlu1 %1782 }
0x144d   :  { %2419 = vmatmul.msk.f32.vlgmr.msrb.gmra.mxu3 %vm355_vm6, %v1783_v33 }
0x144e   :  { %2062 = vmatpush.msrb.mxu3 %v3380_v46 }
0x1450   :  { %2063 = vmatpush.msrb.mxu3 %v3384_v53 }
0x1452   :  { %2064 = vmatpush.msrb.mxu3 %v3387_v1 }
0x1454   :  { %2065 = vmatpush.msrb.mxu3 %v3390_v45 }
0x149f   :  { %v1625_v37 = vpop.f32.mrf.mxu1 }
0x14a0   :  { %v1626_v54 = vadd.f32 %v1625_v37, %v1560_v42 }
0x14a2   :  { %v1639_v39 = vadd.f32 %v3434_v30, %v1626_v54 }
0x14a4   :  { %1647 = vst.msk [vmem:[#allocation2 + $0x38] sm:$0xff] %vm274_vm1, %v1639_v39 }
0x14a5   :  { %v3492_v57 = vpop.f32.mrf.mxu3 }
0x14d0   :  { %v1803_v43 = vpop.f32.mrf.mxu3 }
0x14d1   :  { %v1806_v44 = vadd.f32 %v1803_v43, %v3415_v61  ;;  %v1807_v47 = vadd.f32 %v1803_v43, %v1780_v9 }
0x14d3   :  { %1828 = vrot.lane.b32.xlu2 %v1806_v44, %s2855_s25  ;;  %v2420_v48 = vmul.f32 -1.442695, %v1807_v47  ;;  %v1912_v44 = vld [vmem:[#allocation2 + $0x18] sm:$0xff] }
0x14d5   :  { %2561 = vpow2.f32 %v2420_v48 }
0x14db   :  { %v2562_v3 = vpop.eup %2561 }
0x14dc   :  { %v1811_v32 = vadd.f32 1.0, %v2562_v3 }
0x14de   :  { %2563 = vrcp.f32 %v1811_v32  ;;  %v1823_v58 = vand.u32 2147483648, %v1811_v32  ;;  %vm1817_vm5 = vweird.f32 %v1811_v32  ;;  %v1821_v51 = vand.u32 2147483647, %v1811_v32 }
0x14e0   :  { %v1824_v55 = vor.u32 1.1754944e-38, %v1823_v58  ;;  %vm1822_vm8 = vcmp.eq.f32.partialorder %v1821_v51, 8.507059e+37 }
0x14e4   :  { %v2564_v49 = vpop.eup %2563 }
0x14e5   :  { %v1813_v5 = vmul.f32 %v2564_v49, %v1811_v32  ;;  %vm1818_vm1 = vweird.f32 %v2564_v49 }
0x14e6   :  { %vm1819_vm7 = vmor %vm1817_vm5, %vm1818_vm1 }
0x14e7   :  { %v1814_v7 = vsub.f32 1.0, %v1813_v5 }
0x14e9   :  { %v1815_v30 = vmul.f32 %v2564_v49, %v1814_v7 }
0x14eb   :  { %v1816_v50 = vadd.f32 %v2564_v49, %v1815_v30 }
0x14ed   :  { %v1820_v52 = vsel %vm1819_vm7, %v2564_v49, %v1816_v50 }
0x14ee   :  { %v1825_v8 = vsel %vm1822_vm8, %v1824_v55, %v1820_v52 }
0x14ef   :  { %v1838_v2 = vsub.f32 1.0, %v1825_v8  ;;  %v1844_v11 = vmul.f32 %v1825_v8, %v3458_v36 }
0x152d   :  { %v1829_v59 = vpop.permute.xlu2 %1828 }
0x152e   :  { %v1831_v60 = vmul.f32 %v1829_v59, %v1825_v8 }
0x1530   :  { %1833 = vrot.lane.b32.xlu0 %v1831_v60, %s2855_s25 }
0x15a2   :  { %v1834_v62 = vpop.permute.xlu0 %1833 }
0x15a3   :  { %v1836_v14 = vadd.f32 %v1834_v62, %v1780_v9 }
0x15a5   :  { %2565 = vtanh.f32 %v1836_v14 }
0x15ab   :  { %v2566_v63 = vpop.eup %2565 }
0x15ac   :  { %1840 = vrot.lane.b32.xlu1 %v2566_v63, %s2857_s26 }
0x161e   :  { %v1841_v6 = vpop.permute.xlu1 %1840 }
0x161f   :  { %v1843_v12 = vmul.f32 %v1841_v6, %v1838_v2 }
0x1621   :  { %v1845_v13 = vadd.f32 %v1844_v11, %v1843_v12  ;;  %v1978_v12 = vld [vmem:[#allocation2 + $0x20] sm:$0xff] }
0x1623   :  { %1848 = vrot.lane.b32.xlu2 %v1845_v13, %s2857_s26 }
0x167d   :  { %v1849_v15 = vpop.permute.xlu2 %1848 }
0x167e   :  { %2421 = vmatmul.msk.f32.vlgmr.msra.gmra.mxu2 %vm355_vm6, %v1849_v15 }
0x167f   :  { %2128 = vmatpush.msra.mxu2 %v3380_v46 }
0x1681   :  { %2129 = vmatpush.msra.mxu2 %v3384_v53 }
0x1683   :  { %2130 = vmatpush.msra.mxu2 %v3387_v1 }
0x1685   :  { %2131 = vmatpush.msra.mxu2 %v3390_v45 }
0x1701   :  { %v1869_v16 = vpop.f32.mrf.mxu2 }
0x1702   :  { %v1872_v17 = vadd.f32 %v1869_v16, %v3415_v61  ;;  %v1873_v19 = vadd.f32 %v1869_v16, %v1846_v18 }
0x1704   :  { %1894 = vrot.lane.b32.xlu0 %v1872_v17, %s2855_s25  ;;  %v2422_v21 = vmul.f32 -1.442695, %v1873_v19 }
0x1706   :  { %2567 = vpow2.f32 %v2422_v21 }
0x170c   :  { %v2568_v22 = vpop.eup %2567 }
0x170d   :  { %v1877_v20 = vadd.f32 1.0, %v2568_v22 }
0x170f   :  { %2569 = vrcp.f32 %v1877_v20  ;;  %v1889_v31 = vand.u32 2147483648, %v1877_v20  ;;  %vm1883_vm10 = vweird.f32 %v1877_v20  ;;  %v1887_v10 = vand.u32 2147483647, %v1877_v20 }
0x1711   :  { %v1890_v23 = vor.u32 1.1754944e-38, %v1889_v31  ;;  %vm1888_vm12 = vcmp.eq.f32.partialorder %v1887_v10, 8.507059e+37 }
0x1715   :  { %v2570_v25 = vpop.eup %2569 }
0x1716   :  { %v1879_v26 = vmul.f32 %v2570_v25, %v1877_v20  ;;  %vm1884_vm9 = vweird.f32 %v2570_v25 }
0x1717   :  { %vm1885_vm11 = vmor %vm1883_vm10, %vm1884_vm9 }
0x1718   :  { %v1880_v0 = vsub.f32 1.0, %v1879_v26 }
0x171a   :  { %v1881_v27 = vmul.f32 %v2570_v25, %v1880_v0 }
0x171c   :  { %v1882_v29 = vadd.f32 %v2570_v25, %v1881_v27 }
0x171e   :  { %v1886_v34 = vsel %vm1885_vm11, %v2570_v25, %v1882_v29 }
0x171f   :  { %v1891_v35 = vsel %vm1888_vm12, %v1890_v23, %v1886_v34 }
0x1720   :  { %v1904_v41 = vsub.f32 1.0, %v1891_v35  ;;  %v1910_v33 = vmul.f32 %v1891_v35, %v1845_v13 }
0x1776   :  { %v1895_v36 = vpop.permute.xlu0 %1894 }
0x1777   :  { %v1897_v38 = vmul.f32 %v1895_v36, %v1891_v35 }
0x1779   :  { %1899 = vrot.lane.b32.xlu1 %v1897_v38, %s2855_s25 }
0x17eb   :  { %v1900_v24 = vpop.permute.xlu1 %1899 }
0x17ec   :  { %v1902_v4 = vadd.f32 %v1900_v24, %v1846_v18 }
0x17ee   :  { %2571 = vtanh.f32 %v1902_v4 }
0x17f4   :  { %v2572_v40 = vpop.eup %2571 }
0x17f5   :  { %1906 = vrot.lane.b32.xlu2 %v2572_v40, %s2857_s26 }
0x184f   :  { %v1907_v28 = vpop.permute.xlu2 %1906 }
0x1850   :  { %v1909_v42 = vmul.f32 %v1907_v28, %v1904_v41 }
0x1852   :  { %v1911_v37 = vadd.f32 %v1910_v33, %v1909_v42  ;;  %v2044_v42 = vld [vmem:[#allocation2 + $0x28] sm:$0xff] }
0x1854   :  { %1914 = vrot.lane.b32.xlu0 %v1911_v37, %s2857_s26 }
0x18c6   :  { %v1915_v54 = vpop.permute.xlu0 %1914 }
0x18c7   :  { %2423 = vmatmul.msk.f32.vlgmr.msra.gmra.mxu3 %vm355_vm6, %v1915_v54 }
0x18c8   :  { %2194 = vmatpush.msra.mxu3 %v3380_v46 }
0x18ca   :  { %2195 = vmatpush.msra.mxu3 %v3384_v53 }
0x18cc   :  { %2196 = vmatpush.msra.mxu3 %v3387_v1 }
0x18ce   :  { %2197 = vmatpush.msra.mxu3 %v3390_v45 }
0x194a   :  { %v1935_v39 = vpop.f32.mrf.mxu3 }
0x194b   :  { %v1938_v43 = vadd.f32 %v1935_v39, %v3415_v61  ;;  %v1939_v9 = vadd.f32 %v1935_v39, %v1912_v44 }
0x194d   :  { %1960 = vrot.lane.b32.xlu1 %v1938_v43, %s2855_s25  ;;  %v2424_v47 = vmul.f32 -1.442695, %v1939_v9 }
0x194f   :  { %2573 = vpow2.f32 %v2424_v47 }
0x1955   :  { %v2574_v48 = vpop.eup %2573 }
0x1956   :  { %v1943_v3 = vadd.f32 1.0, %v2574_v48 }
0x1958   :  { %2575 = vrcp.f32 %v1943_v3  ;;  %v1955_v1 = vand.u32 2147483648, %v1943_v3  ;;  %vm1949_vm14 = vweird.f32 %v1943_v3  ;;  %v1953_v45 = vand.u32 2147483647, %v1943_v3 }
0x195a   :  { %v1956_v30 = vor.u32 1.1754944e-38, %v1955_v1  ;;  %vm1954_vm2 = vcmp.eq.f32.partialorder %v1953_v45, 8.507059e+37 }
0x195e   :  { %v2576_v32 = vpop.eup %2575 }
0x195f   :  { %v1945_v46 = vmul.f32 %v2576_v32, %v1943_v3  ;;  %vm1950_vm13 = vweird.f32 %v2576_v32 }
0x1960   :  { %vm1951_vm15 = vmor %vm1949_vm14, %vm1950_vm13 }
0x1961   :  { %v1946_v49 = vsub.f32 1.0, %v1945_v46 }
0x1963   :  { %v1947_v53 = vmul.f32 %v2576_v32, %v1946_v49 }
0x1965   :  { %v1948_v5 = vadd.f32 %v2576_v32, %v1947_v53 }
0x1967   :  { %v1952_v7 = vsel %vm1951_vm15, %v2576_v32, %v1948_v5 }
0x1968   :  { %v1957_v50 = vsel %vm1954_vm2, %v1956_v30, %v1952_v7 }
0x1969   :  { %v1970_v59 = vsub.f32 1.0, %v1957_v50  ;;  %v1976_v62 = vmul.f32 %v1957_v50, %v1911_v37 }
0x19bf   :  { %v1961_v58 = vpop.permute.xlu1 %1960 }
0x19c0   :  { %v1963_v51 = vmul.f32 %v1961_v58, %v1957_v50 }
0x19c2   :  { %1965 = vrot.lane.b32.xlu2 %v1963_v51, %s2855_s25 }
0x1a1c   :  { %v1966_v52 = vpop.permute.xlu2 %1965 }
0x1a1d   :  { %v1968_v55 = vadd.f32 %v1966_v52, %v1912_v44 }
0x1a1f   :  { %2577 = vtanh.f32 %v1968_v55 }
0x1a25   :  { %v2578_v8 = vpop.eup %2577 }
0x1a26   :  { %1972 = vrot.lane.b32.xlu0 %v2578_v8, %s2857_s26 }
0x1a98   :  { %v1973_v60 = vpop.permute.xlu0 %1972 }
0x1a99   :  { %v1975_v14 = vmul.f32 %v1973_v60, %v1970_v59 }
0x1a9b   :  { %v1977_v63 = vadd.f32 %v1976_v62, %v1975_v14  ;;  %v2110_v14 = vld [vmem:[#allocation2 + $0x30] sm:$0xff] }
0x1a9d   :  { %1980 = vrot.lane.b32.xlu1 %v1977_v63, %s2857_s26 }
0x1b0f   :  { %v1981_v2 = vpop.permute.xlu1 %1980 }
0x1b10   :  { %2425 = vmatmul.msk.f32.vlgmr.msrb.gmra.mxu2 %vm355_vm6, %v1981_v2 }
0x1b93   :  { %v2001_v6 = vpop.f32.mrf.mxu2 }
0x1b94   :  { %v2004_v11 = vadd.f32 %v2001_v6, %v3415_v61  ;;  %v2005_v13 = vadd.f32 %v2001_v6, %v1978_v12 }
0x1b96   :  { %2026 = vrot.lane.b32.xlu2 %v2004_v11, %s2855_s25  ;;  %v2426_v15 = vmul.f32 -1.442695, %v2005_v13 }
0x1b98   :  { %2579 = vpow2.f32 %v2426_v15 }
0x1b9e   :  { %v2580_v16 = vpop.eup %2579 }
0x1b9f   :  { %v2009_v17 = vadd.f32 1.0, %v2580_v16 }
0x1ba1   :  { %2581 = vrcp.f32 %v2009_v17  ;;  %v2021_v25 = vand.u32 2147483648, %v2009_v17  ;;  %vm2015_vm4 = vweird.f32 %v2009_v17  ;;  %v2019_v26 = vand.u32 2147483647, %v2009_v17 }
0x1ba3   :  { %v2022_v27 = vor.u32 1.1754944e-38, %v2021_v25  ;;  %vm2020_vm5 = vcmp.eq.f32.partialorder %v2019_v26, 8.507059e+37 }
0x1ba7   :  { %v2582_v18 = vpop.eup %2581 }
0x1ba8   :  { %v2011_v19 = vmul.f32 %v2582_v18, %v2009_v17  ;;  %vm2016_vm3 = vweird.f32 %v2582_v18 }
0x1ba9   :  { %vm2017_vm1 = vmor %vm2015_vm4, %vm2016_vm3 }
0x1baa   :  { %v2012_v21 = vsub.f32 1.0, %v2011_v19 }
0x1bac   :  { %v2013_v22 = vmul.f32 %v2582_v18, %v2012_v21 }
0x1bae   :  { %v2014_v20 = vadd.f32 %v2582_v18, %v2013_v22 }
0x1bb0   :  { %v2018_v0 = vsel %vm2017_vm1, %v2582_v18, %v2014_v20 }
0x1bb1   :  { %v2023_v29 = vsel %vm2020_vm5, %v2022_v27, %v2018_v0 }
0x1bb2   :  { %v2036_v36 = vsub.f32 1.0, %v2023_v29  ;;  %v2042_v24 = vmul.f32 %v2023_v29, %v1977_v63 }
0x1bf0   :  { %v2027_v31 = vpop.permute.xlu2 %2026 }
0x1bf1   :  { %v2029_v10 = vmul.f32 %v2027_v31, %v2023_v29  ;;  %v1702_v31 = vadd.f32 %v3492_v57, %v3411_v56 }
0x1bf3   :  { %2031 = vrot.lane.b32.xlu0 %v2029_v10, %s2855_s25  ;;  %v2456_v10 = vld [vmem:[%s3609_s14] ss:$0 sm:$0xff] }
0x1c65   :  { %v2032_v34 = vpop.permute.xlu0 %2031 }
0x1c66   :  { %v2034_v23 = vadd.f32 %v2032_v34, %v1978_v12  ;;  %v1708_v34 = vadd.f32 %v2456_v10, %v1702_v31 }
0x1c68   :  { %2583 = vtanh.f32 %v2034_v23  ;;  %v2433_v23 = vmul.f32 -1.442695, %v1708_v34 }
0x1c6e   :  { %v2584_v35 = vpop.eup %2583 }
0x1c6f   :  { %2038 = vrot.lane.b32.xlu1 %v2584_v35, %s2857_s26 }
0x1ce1   :  { %v2039_v38 = vpop.permute.xlu1 %2038 }
0x1ce2   :  { %v2041_v4 = vmul.f32 %v2039_v38, %v2036_v36 }
0x1ce4   :  { %v2043_v40 = vadd.f32 %v2042_v24, %v2041_v4 }
0x1ce6   :  { %2046 = vrot.lane.b32.xlu2 %v2043_v40, %s2857_s26 }
0x1d40   :  { %v2047_v41 = vpop.permute.xlu2 %2046 }
0x1d41   :  { %2427 = vmatmul.msk.f32.vlgmr.msrb.gmra.mxu3 %vm355_vm6, %v2047_v41 }
0x1dc4   :  { %v2067_v28 = vpop.f32.mrf.mxu3 }
0x1dc5   :  { %v2070_v33 = vadd.f32 %v2067_v28, %v3415_v61  ;;  %v2071_v37 = vadd.f32 %v2067_v28, %v2044_v42 }
0x1dc7   :  { %2092 = vrot.lane.b32.xlu0 %v2070_v33, %s2855_s25  ;;  %v2428_v54 = vmul.f32 -1.442695, %v2071_v37 }
0x1dc9   :  { %2585 = vpow2.f32 %v2428_v54 }
0x1dcf   :  { %v2586_v39 = vpop.eup %2585 }
0x1dd0   :  { %v2075_v43 = vadd.f32 1.0, %v2586_v39 }
0x1dd2   :  { %2587 = vrcp.f32 %v2075_v43  ;;  %v2087_v32 = vand.u32 2147483648, %v2075_v43  ;;  %vm2081_vm8 = vweird.f32 %v2075_v43  ;;  %v2085_v46 = vand.u32 2147483647, %v2075_v43 }
0x1dd4   :  { %v2088_v53 = vor.u32 1.1754944e-38, %v2087_v32  ;;  %vm2086_vm10 = vcmp.eq.f32.partialorder %v2085_v46, 8.507059e+37  ;;  %v2176_v46 = vld [vmem:[#allocation2 + $0x38] sm:$0xff] }
0x1dd8   :  { %v2588_v44 = vpop.eup %2587 }
0x1dd9   :  { %v2077_v9 = vmul.f32 %v2588_v44, %v2075_v43  ;;  %vm2082_vm7 = vweird.f32 %v2588_v44 }
0x1dda   :  { %vm2083_vm9 = vmor %vm2081_vm8, %vm2082_vm7 }
0x1ddb   :  { %v2078_v47 = vsub.f32 1.0, %v2077_v9 }
0x1ddd   :  { %v2079_v48 = vmul.f32 %v2588_v44, %v2078_v47 }
0x1ddf   :  { %v2080_v3 = vadd.f32 %v2588_v44, %v2079_v48 }
0x1de1   :  { %v2084_v49 = vsel %vm2083_vm9, %v2588_v44, %v2080_v3  ;;  %v2457_v44 = vld [vmem:[%s3611_s16] ss:$0 sm:$0xff] }
0x1de2   :  { %v2089_v5 = vsel %vm2086_vm10, %v2088_v53, %v2084_v49 }
0x1de3   :  { %v2102_v58 = vsub.f32 1.0, %v2089_v5  ;;  %v2108_v52 = vmul.f32 %v2089_v5, %v2043_v40 }
0x1e39   :  { %v2093_v1 = vpop.permute.xlu0 %2092 }
0x1e3a   :  { %v2095_v45 = vmul.f32 %v2093_v1, %v2089_v5 }
0x1e3c   :  { %2097 = vrot.lane.b32.xlu1 %v2095_v45, %s2855_s25 }
0x1eae   :  { %v2098_v7 = vpop.permute.xlu1 %2097 }
0x1eaf   :  { %v2100_v30 = vadd.f32 %v2098_v7, %v2044_v42 }
0x1eb1   :  { %2589 = vtanh.f32 %v2100_v30 }
0x1eb7   :  { %v2590_v50 = vpop.eup %2589 }
0x1eb8   :  { %2104 = vrot.lane.b32.xlu2 %v2590_v50, %s2857_s26 }
0x1f12   :  { %v2105_v51 = vpop.permute.xlu2 %2104 }
0x1f13   :  { %v2107_v55 = vmul.f32 %v2105_v51, %v2102_v58 }
0x1f15   :  { %v2109_v8 = vadd.f32 %v2108_v52, %v2107_v55 }
0x1f17   :  { %2112 = vrot.lane.b32.xlu0 %v2109_v8, %s2857_s26 }
0x1f89   :  { %v2113_v59 = vpop.permute.xlu0 %2112 }
0x1f8a   :  { %2429 = vmatmul.msk.f32.vlgmr.msra.gmra.mxu2 %vm355_vm6, %v2113_v59 }
0x200d   :  { %v2133_v60 = vpop.f32.mrf.mxu2 }
0x200e   :  { %v2136_v62 = vadd.f32 %v2133_v60, %v3415_v61  ;;  %v2137_v63 = vadd.f32 %v2133_v60, %v2110_v14 }
0x2010   :  { %2158 = vrot.lane.b32.xlu1 %v2136_v62, %s2855_s25  ;;  %v2430_v2 = vmul.f32 -1.442695, %v2137_v63 }
0x2012   :  { %2591 = vpow2.f32 %v2430_v2 }
0x2018   :  { %v2592_v6 = vpop.eup %2591 }
0x2019   :  { %v2141_v11 = vadd.f32 1.0, %v2592_v6 }
0x201b   :  { %2593 = vrcp.f32 %v2141_v11  ;;  %v2153_v18 = vand.u32 2147483648, %v2141_v11  ;;  %vm2147_vm12 = vweird.f32 %v2141_v11  ;;  %v2151_v19 = vand.u32 2147483647, %v2141_v11 }
0x201d   :  { %v2154_v22 = vor.u32 1.1754944e-38, %v2153_v18  ;;  %vm2152_vm14 = vcmp.eq.f32.partialorder %v2151_v19, 8.507059e+37  ;;  %v2310_v18 = vld [vmem:[%s3612_s17 + $0x28] sm:$0xff]  ;;  %v2309_v19 = vld [vmem:[%s3612_s17 + $0x20] sm:$0xff] }
0x2021   :  { %v2594_v12 = vpop.eup %2593 }
0x2022   :  { %v2143_v13 = vmul.f32 %v2594_v12, %v2141_v11  ;;  %vm2148_vm11 = vweird.f32 %v2594_v12 }
0x2023   :  { %vm2149_vm13 = vmor %vm2147_vm12, %vm2148_vm11 }
0x2024   :  { %v2144_v15 = vsub.f32 1.0, %v2143_v13 }
0x2026   :  { %v2145_v16 = vmul.f32 %v2594_v12, %v2144_v15 }
0x2028   :  { %v2146_v17 = vadd.f32 %v2594_v12, %v2145_v16  ;;  %v2312_v16 = vld [vmem:[%s3612_s17 + $0x38] sm:$0xff] }
0x2029   :  { %2330 = vmatpush.msrb.mxu3 %v2312_v16 }
0x202a   :  { %v2150_v21 = vsel %vm2149_vm13, %v2594_v12, %v2146_v17  ;;  %v2311_v17 = vld [vmem:[%s3612_s17 + $0x30] sm:$0xff] }
0x202b   :  { %v2155_v20 = vsel %vm2152_vm14, %v2154_v22, %v2150_v21  ;;  %2331 = vmatpush.msrb.mxu3 %v2311_v17  ;;  %v2282_v21 = vld [vmem:[%s3612_s17 + $0x18] sm:$0xff]  ;;  %v2281_v22 = vld [vmem:[%s3612_s17 + $0x10] sm:$0xff] }
0x202c   :  { %v2168_v41 = vsub.f32 1.0, %v2155_v20  ;;  %v2174_v33 = vmul.f32 %v2155_v20, %v2109_v8  ;;  %2300 = vmatpush.msrb.mxu2 %v2282_v21 }
0x202d   :  { %2332 = vmatpush.msrb.mxu3 %v2310_v18 }
0x202e   :  { %2301 = vmatpush.msrb.mxu2 %v2281_v22 }
0x202f   :  { %2333 = vmatpush.msrb.mxu3 %v2309_v19 }
0x2082   :  { %v2159_v25 = vpop.permute.xlu1 %2158 }
0x2083   :  { %v2161_v26 = vmul.f32 %v2159_v25, %v2155_v20  ;;  %v2280_v20 = vld [vmem:[%s3612_s17 + $0x8] sm:$0xff]  ;;  %v2279_v25 = vld [vmem:[%s3612_s17] sm:$0xff] }
0x2084   :  { %2302 = vmatpush.msrb.mxu2 %v2280_v20 }
0x2085   :  { %2163 = vrot.lane.b32.xlu2 %v2161_v26, %s2855_s25 }
0x2086   :  { %2303 = vmatpush.msrb.mxu2 %v2279_v25 }
0x20df   :  { %v2164_v0 = vpop.permute.xlu2 %2163 }
0x20e0   :  { %v2166_v27 = vadd.f32 %v2164_v0, %v2110_v14 }
0x20e2   :  { %2595 = vtanh.f32 %v2166_v27 }
0x20e3   :  { %2597 = vpow2.f32 %v2433_v23  ;;  %v2278_v23 = vld [vmem:[%s3623_s24] sm:$0xff] }
0x20e8   :  { %v2596_v29 = vpop.eup %2595 }
0x20e9   :  { %2170 = vrot.lane.b32.xlu0 %v2596_v29, %s2857_s26  ;;  %v2598_v35 = vpop.eup %2597 }
0x20ea   :  { %v2245_v36 = vadd.f32 1.0, %v2598_v35 }
0x20ec   :  { %2599 = vrcp.f32 %v2245_v36  ;;  %v2257_v56 = vand.u32 2147483648, %v2245_v36  ;;  %vm2251_vm2 = vweird.f32 %v2245_v36  ;;  %v2255_v54 = vand.u32 2147483647, %v2245_v36 }
0x20ee   :  { %v2258_v43 = vor.u32 1.1754944e-38, %v2257_v56  ;;  %vm2256_vm4 = vcmp.eq.f32.partialorder %v2255_v54, 8.507059e+37 }
0x20f2   :  { %v2600_v38 = vpop.eup %2599 }
0x20f3   :  { %v2247_v24 = vmul.f32 %v2600_v38, %v2245_v36  ;;  %vm2252_vm15 = vweird.f32 %v2600_v38 }
0x20f4   :  { %vm2253_vm3 = vmor %vm2251_vm2, %vm2252_vm15 }
0x20f5   :  { %v2248_v4 = vsub.f32 1.0, %v2247_v24 }
0x20f7   :  { %v2249_v40 = vmul.f32 %v2600_v38, %v2248_v4 }
0x20f9   :  { %v2250_v37 = vadd.f32 %v2600_v38, %v2249_v40 }
0x20fb   :  { %v2254_v39 = vsel %vm2253_vm3, %v2600_v38, %v2250_v37  ;;  %v2458_v38 = vld [vmem:[%s3613_s18] ss:$0 sm:$0xff] }
0x20fc   :  { %v2259_v9 = vsel %vm2256_vm4, %v2258_v43, %v2254_v39 }
0x20fd   :  { %v2265_v47 = vmul.f32 %v2457_v44, %v2259_v9  ;;  %v2272_v13 = vsub.f32 1.0, %v2259_v9 }
0x215b   :  { %v2171_v28 = vpop.permute.xlu0 %2170 }
0x215c   :  { %v2173_v42 = vmul.f32 %v2171_v28, %v2168_v41 }
0x215e   :  { %v3542_v57 = vadd.f32 %v2174_v33, %v2173_v42 }
0x2160   :  { %2178 = vrot.lane.b32.xlu1 %v3542_v57, %s2857_s26 }
0x2168   :  { %2267 = vrot.lane.b32.xlu1 %v2265_v47, %s2855_s25 }
0x21d2   :  { %v2179_v48 = vpop.permute.xlu1 %2178 }
0x21d3   :  { %2431 = vmatmul.msk.f32.vlgmr.msra.gmra.mxu3 %vm355_vm6, %v2179_v48 }
0x2256   :  { %v2199_v3 = vpop.f32.mrf.mxu3 }
0x2257   :  { %v2202_v32 = vadd.f32 %v2199_v3, %v3415_v61  ;;  %v2203_v49 = vadd.f32 %v2199_v3, %v2176_v46  ;;  %v2268_v61 = vpop.permute.xlu1 %2267 }
0x2258   :  { %v2270_v59 = vadd.f32 %v2268_v61, %v1708_v34 }
0x2259   :  { %2224 = vrot.lane.b32.xlu2 %v2202_v32, %s2855_s25  ;;  %v2432_v53 = vmul.f32 -1.442695, %v2203_v49 }
0x225b   :  { %2601 = vpow2.f32 %v2432_v53 }
0x2261   :  { %v2602_v5 = vpop.eup %2601 }
0x2262   :  { %v2207_v1 = vadd.f32 1.0, %v2602_v5 }
0x2264   :  { %2603 = vrcp.f32 %v2207_v1  ;;  %v2219_v51 = vand.u32 2147483648, %v2207_v1  ;;  %vm2213_vm5 = vweird.f32 %v2207_v1  ;;  %v2217_v52 = vand.u32 2147483647, %v2207_v1 }
0x2265   :  { %2605 = vtanh.f32 %v2270_v59 }
0x2266   :  { %v2220_v8 = vor.u32 1.1754944e-38, %v2219_v51  ;;  %vm2218_vm8 = vcmp.eq.f32.partialorder %v2217_v52, 8.507059e+37 }
0x226a   :  { %v2604_v45 = vpop.eup %2603 }
0x226b   :  { %v2209_v7 = vmul.f32 %v2604_v45, %v2207_v1  ;;  %vm2214_vm1 = vweird.f32 %v2604_v45  ;;  %v2606_v63 = vpop.eup %2605 }
0x226c   :  { %vm2215_vm7 = vmor %vm2213_vm5, %vm2214_vm1 }
0x226d   :  { %v2210_v30 = vsub.f32 1.0, %v2209_v7 }
0x226f   :  { %v2211_v50 = vmul.f32 %v2604_v45, %v2210_v30 }
0x2271   :  { %v2212_v58 = vadd.f32 %v2604_v45, %v2211_v50 }
0x2273   :  { %v2216_v55 = vsel %vm2215_vm7, %v2604_v45, %v2212_v58 }
0x2274   :  { %v2221_v60 = vsel %vm2218_vm8, %v2220_v8, %v2216_v55 }
0x2275   :  { %v2234_v26 = vsub.f32 1.0, %v2221_v60  ;;  %v2240_v27 = vmul.f32 %v2221_v60, %v3542_v57 }
0x22b3   :  { %v2225_v62 = vpop.permute.xlu2 %2224 }
0x22b4   :  { %v2227_v14 = vmul.f32 %v2225_v62, %v2221_v60 }
0x22b6   :  { %2229 = vrot.lane.b32.xlu0 %v2227_v14, %s2855_s25 }
0x22be   :  { %2274 = vrot.lane.b32.xlu0 %v2606_v63, %s2857_s26 }
0x2328   :  { %v2230_v2 = vpop.permute.xlu0 %2229 }
0x2329   :  { %v2232_v6 = vadd.f32 %v2230_v2, %v2176_v46 }
0x232b   :  { %2607 = vtanh.f32 %v2232_v6 }
0x2330   :  { %v2275_v12 = vpop.permute.xlu0 %2274 }
0x2331   :  { %v2608_v11 = vpop.eup %2607  ;;  %v2277_v15 = vmul.f32 %v2275_v12, %v2272_v13 }
0x2332   :  { %2236 = vrot.lane.b32.xlu2 %v2608_v11, %s2857_s26 }
0x233a   :  { %2314 = vrot.lane.b32.xlu2 %v2277_v15, %s2857_s26 }
0x238c   :  { %v2237_v0 = vpop.permute.xlu2 %2236 }
0x238d   :  { %v2239_v29 = vmul.f32 %v2237_v0, %v2234_v26 }
0x238f   :  { %v2241_v31 = vadd.f32 %v2240_v27, %v2239_v29 }
0x2391   :  { %2284 = vrot.lane.b32.xlu1 %v2241_v31, %s2857_s26 }
0x2394   :  { %v2315_v10 = vpop.permute.xlu2 %2314 }
0x2395   :  { %2435 = vmatmul.msk.f32.vlgmr.msrb.gmra.mxu3 %vm355_vm6, %v2315_v10 }
0x2403   :  { %v2285_v34 = vpop.permute.xlu1 %2284 }
0x2404   :  { %2434 = vmatmul.msk.f32.vlgmr.msrb.gmra.mxu2 %vm355_vm6, %v2285_v34 }
0x2418   :  { %v2335_v24 = vpop.f32.mrf.mxu3 }
0x2487   :  { %v2305_v35 = vpop.f32.mrf.mxu2 }
0x2488   :  { %v2308_v36 = vadd.f32 %v2305_v35, %v2278_v23 }
0x248a   :  { %v2338_v4 = vadd.f32 %v2335_v24, %v2308_v36 }
0x248c   :  { %v2343_v40 = vadd.f32 %v2458_v38, %v2338_v4 }
0x248e   :  { %2344 = vst.msk [vmem:[%s3614_s19] sm:$0xff] %vm208_vm0, %v2343_v40 }
0x248f   :  { %2349 = vsyncpa [#allocation7], 1 }
0x2490   :  { %2350 = vsyncpa [#allocation9], 1 }
0x2491   :  { %2351 = vsyncpa [#allocation12], 1 }
0x2492   :  { %2352 = vsyncpa [#allocation15], 1 }
0x2493   :  { %2353 = vsyncpa [#allocation18], 1 }

</bundles_post_ra>
